<compile_context>
chip_gen: v7x
topology: tpu7x:2x2x1
jax: 0.10.0
libtpu: 0.0.40
codegen_flags: <defaults>
</compile_context>

<pallas_src>
import jax
import jax.numpy as jnp
from jax import lax
from jax.experimental import pallas as pl
from jax.experimental.pallas import tpu as pltpu

BN_EPS = 1e-5
COUT = 24          # out_channels of the 9x9 conv (fixed by the module)
KSIZE = 9          # conv kernel size
KHALF = KSIZE // 2
POOL = 2           # avg-pool window / stride

# MXU operand dtype.  Flip to jnp.bfloat16 for ~2x MXU throughput (the test
# tolerance below auto-relaxes); float32 keeps the strict 1e-4 check.
MXU_DTYPE = jnp.float32
MXU_ITEMSIZE = 2 if MXU_DTYPE == jnp.bfloat16 else 4


def _round_up(x, m):
    return ((x + m - 1) // m) * m


# ---------------------------------------------------------------------------
# Kernel factory (closes over the static geometry)
# ---------------------------------------------------------------------------
def _make_kernel(cin, wp, hwp, b_blk, slot, sls, gap, nc, dt):
    head = gap

    def kernel(x_ref, w_ref, shift_ref, pool_ref, out_ref, line_ref, s_ref, acc_ref):
        # ---- stage row-padded images into the flat zero-haloed line buffer --
        # layout: [gap zeros][img0 (hwp)][gap zeros][img1 (hwp)][gap]...[gap]
        # All image offsets are 128-lane aligned; only the small halo strips are
        # re-zeroed each step (scratch persists across grid steps / cores).
        zeros_gap = jnp.zeros((cin, gap), dt)
        line_ref[:, 0:head] = zeros_gap
        for b in range(b_blk):
            base = head + b * slot
            line_ref[:, base + hwp:base + slot] = zeros_gap       # inter-image halo
            line_ref[:, base:base + hwp] = x_ref[b]               # aligned image write
        tail = head + b_blk * slot
        line_ref[:, tail:tail + gap] = zeros_gap                  # trailing halo

        # ---- ky-stacked staging buffer S: 9 lane-shifted copies per image ----
        #   S[ky*cin + ci, b*sls + m] = line[ci, base_b + (ky-4)*wp + m - 4]
        # so the 9 ky taps of every output pixel sit in one (9*cin) column of S.
        for ky in range(KSIZE):
            dy = ky - KHALF
            for b in range(b_blk):
                src = head + b * slot + dy * wp - KHALF
                s_ref[ky * cin:(ky + 1) * cin, b * sls:(b + 1) * sls] = \
                    line_ref[:, src:src + sls]

        # ---- conv: 9 accumulating K=9*cin matmuls (BN scale folded in w) -----
        # RHS for horizontal tap kx is just the lane-shifted slice S[:, kx:kx+nc].
        acc_ref[...] = jnp.dot(w_ref[0], s_ref[:, 0:nc],
                               preferred_element_type=jnp.float32)
        for kx in range(1, KSIZE):
            acc_ref[...] += jnp.dot(w_ref[kx], s_ref[:, kx:kx + nc],
                                    preferred_element_type=jnp.float32)

        # ---- fused BN shift + ReLU (f32) --------------------------------------
        act = jnp.maximum(acc_ref[...] + shift_ref[...], 0.0)     # (COUT, nc)

        # ---- 2x2 stride-2 avg pool + junk-column compaction as ONE matmul ----
        out_ref[...] = jnp.dot(act, pool_ref[...],
                               preferred_element_type=jnp.float32
                               ).astype(out_ref.dtype)            # (COUT, b_blk*hwo)

    return kernel


# ---------------------------------------------------------------------------
# Wrapper: param folding + host-side constants + pallas_call
# ---------------------------------------------------------------------------
@jax.jit
def preprocessing_block(x_nchw, params):
    """Conv2d(Cin,24,9x9,pad 4) -> BN(eval) -> ReLU -> AvgPool2d(2,2). NCHW in/out."""
    n, cin, h, w = x_nchw.shape
    assert h % POOL == 0 and w % POOL == 0
    ho, wo = h // POOL, w // POOL
    hwo = ho * wo
    wp = w + 2 * KHALF          # row-padded width (removes row-wrap masking)
    hwp = h * wp

    # Batch block: >=2 keeps the pooled output slab >=128 lanes (unmasked stores),
    # <=4 keeps the block-diagonal pooling matrix small; for real batches this
    # also keeps the grid length >=2 so v7x's two TensorCores both get work.
    b_blk = min(4, 2 * ((n + 1) // 2))
    nb = -(-n // b_blk)
    n_pad = nb * b_blk

    gap = _round_up(KHALF * wp + KHALF, 128)   # zero halo between images (>= 4*wp+4)
    slot = hwp + gap                           # per-image slot in the line buffer
    sls = _round_up(hwp + 2 * KHALF, 128)      # per-image slot in the S buffer
    nc = (b_blk - 1) * sls + hwp               # conv-output columns fed to pooling
    assert nc + 2 * KHALF <= b_blk * sls       # matmul RHS slices stay in-bounds

    # ---- fold conv bias + eval-mode BatchNorm into (scaled weights, shift) --
    scale = params["gamma"] / jnp.sqrt(params["var"] + BN_EPS)             # (24,)
    shift = params["beta"] + (params["bias"] - params["mean"]) * scale     # (24,)
    w_scaled = params["w"] * scale[:, None, None, None]          # (24, Cin, 9, 9)
    # (Cout, Cin, ky, kx) -> (kx, Cout, ky*Cin + ci): one (24, 9*Cin) matrix per kx
    w_kx = jnp.transpose(w_scaled, (3, 0, 2, 1)).reshape(KSIZE, COUT, KSIZE * cin)
    w_kx = w_kx.astype(MXU_DTYPE)
    shift2 = shift.reshape(COUT, 1).astype(jnp.float32)

    # ---- host-side constant: block-diagonal pooling / compaction matrix -----
    # Rows are conv-output columns in padded coordinates; pad / inter-image junk
    # columns get all-zero rows, valid 2x2 windows get 0.25.
    c = jnp.arange(nc, dtype=jnp.int32)
    cb, cp = c // sls, c % sls
    ci_, cjp = cp // wp, cp % wp
    cj = cjp - KHALF
    cvalid = (cp < hwp) & (cj >= 0) & (cj < w)
    o = jnp.arange(b_blk * hwo, dtype=jnp.int32)
    ob, oq = o // hwo, o % hwo
    oi, oj = oq // wo, oq % wo
    pool_mat = ((cvalid[:, None]
                 & (cb[:, None] == ob[None, :])
                 & ((ci_[:, None] // POOL) == oi[None, :])
                 & ((cj[:, None] // POOL) == oj[None, :]))
                .astype(jnp.float32) / float(POOL * POOL))       # (nc, b_blk*hwo)

    # ---- row-pad W by khalf, pad batch to a multiple of b_blk ----------------
    x_rp = jnp.pad(x_nchw, ((0, n_pad - n), (0, 0), (0, 0), (KHALF, KHALF)))
    x_rp = x_rp.reshape(n_pad, cin, hwp).astype(MXU_DTYPE)

    kernel = _make_kernel(cin, wp, hwp, b_blk, slot, sls, gap, nc, MXU_DTYPE)

    cost = pl.CostEstimate(
        flops=2 * n_pad * COUT * (KSIZE * KSIZE * cin + 1) * h * w,
        transcendentals=0,
        bytes_accessed=(x_rp.size * MXU_ITEMSIZE + w_kx.size * MXU_ITEMSIZE
                        + shift2.size * 4 + pool_mat.size * 4
                        + nb * COUT * b_blk * hwo * 4))

    out = pl.pallas_call(
        kernel,
        out_shape=jax.ShapeDtypeStruct((nb, COUT, b_blk * hwo), jnp.float32),
        grid=(nb,),
        in_specs=[
            pl.BlockSpec((b_blk, cin, hwp), lambda g: (g, 0, 0)),
            pl.BlockSpec((KSIZE, COUT, KSIZE * cin), lambda g: (0, 0, 0)),
            pl.BlockSpec((COUT, 1), lambda g: (0, 0)),
            pl.BlockSpec((nc, b_blk * hwo), lambda g: (0, 0)),
        ],
        out_specs=pl.BlockSpec((None, COUT, b_blk * hwo), lambda g: (g, 0, 0)),
        scratch_shapes=[
            pltpu.VMEM((cin, 2 * gap + b_blk * slot), MXU_DTYPE),    # line buffer
            pltpu.VMEM((KSIZE * cin, b_blk * sls), MXU_DTYPE),       # ky-stacked S
            pltpu.VMEM((COUT, nc), jnp.float32),                     # conv accumulator
        ],
        compiler_params=pltpu.CompilerParams(
            dimension_semantics=("parallel",)),
        cost_estimate=cost,
    )(x_rp, w_kx, shift2, pool_mat)

    # (nb, COUT, b_blk*hwo) -> (N, COUT, Ho, Wo)
    out = out.reshape(nb, COUT, b_blk, ho, wo).transpose(0, 2, 1, 3, 4)
    return out.reshape(n_pad, COUT, ho, wo)[:n]


# ---------------------------------------------------------------------------
# Pure-JAX reference for correctness checking
# ---------------------------------------------------------------------------
def reference(x_nchw, p):
    y = lax.conv_general_dilated(
        x_nchw, p["w"], window_strides=(1, 1),
        padding=[(KHALF, KHALF)] * 2,
        dimension_numbers=("NCHW", "OIHW", "NCHW"))
    y = y + p["bias"][None, :, None, None]
    scale = p["gamma"] / jnp.sqrt(p["var"] + BN_EPS)
    y = (y - p["mean"][None, :, None, None]) * scale[None, :, None, None] \
        + p["beta"][None, :, None, None]
    y = jnp.maximum(y, 0.0)
    n, c, h, w = y.shape
    return y.reshape(n, c, h // POOL, POOL, w // POOL, POOL).mean(axis=(3, 5))


# ---------------------------------------------------------------------------
# Deterministic parameters (conv + eval-mode BN stats)
# ---------------------------------------------------------------------------
def make_params(key, cin):
    ks = jax.random.split(key, 6)
    fan_in = cin * KSIZE * KSIZE
    return {
        "w": jax.random.normal(ks[0], (COUT, cin, KSIZE, KSIZE), jnp.float32)
             / jnp.sqrt(fan_in),
        "bias": 0.05 * jax.random.normal(ks[1], (COUT,), jnp.float32),
        "gamma": jax.random.uniform(ks[2], (COUT,), jnp.float32, 0.5, 1.5),
        "beta": 0.1 * jax.random.normal(ks[3], (COUT,), jnp.float32),
        "mean": 0.1 * jax.random.normal(ks[4], (COUT,), jnp.float32),
        "var": jax.random.uniform(ks[5], (COUT,), jnp.float32, 0.5, 1.5),
    }


if __name__ == "__main__":
    key = jax.random.PRNGKey(0)
    kx_, kp = jax.random.split(key)

    N, CIN, H, W = 2, 4, 16, 16
    # PyTorch input layout is NCHW; the kernel keeps NCHW end-to-end.
    x = jax.random.normal(kx_, (N, CIN, H, W), jnp.float32)
    params = make_params(kp, CIN)

    out = jax.block_until_ready(preprocessing_block(x, params))
    ref = jax.block_until_ready(reference(x, params))

    assert out.shape == (N, COUT, H // POOL, W // POOL), out.shape
    tol = 1e-4 if MXU_DTYPE == jnp.float32 else 2e-2   # bf16 operands: ~2e-3 input quant.
    err = float(jnp.max(jnp.abs(out - ref)))
    assert jnp.allclose(out, ref, rtol=tol, atol=tol), f"max abs err {err}"
    print("KERNEL_OK")
</pallas_src>

<mosaic_0001>
module attributes {stable_mosaic.version = 11 : i64} {
  func.func @kernel(%arg0: i32, %arg1: memref<2x4x384xf32, #tpu.memory_space<vmem>>, %arg2: memref<9x24x36xf32, #tpu.memory_space<vmem>>, %arg3: memref<24x1xf32, #tpu.memory_space<vmem>>, %arg4: memref<896x128xf32, #tpu.memory_space<vmem>>, %arg5: memref<1x24x128xf32, #tpu.memory_space<vmem>>, %arg6: memref<4x1280xf32, #tpu.memory_space<vmem>>, %arg7: memref<36x1024xf32, #tpu.memory_space<vmem>>, %arg8: memref<24x896xf32, #tpu.memory_space<vmem>>) attributes {dimension_semantics = [#tpu.dimension_semantics<parallel>], iteration_bounds = array<i64: 1>, scalar_prefetch = 0 : i64, scratch_operands = 3 : i64, tpu.core_type = #tpu.core_type<tc>, window_params = [{transform_indices = @transform_0, window_bounds = array<i64: 2, 4, 384>}, {pipeline_mode = #tpu.pipeline_mode<synchronous>, transform_indices = @transform_1, window_bounds = array<i64: 9, 24, 36>}, {pipeline_mode = #tpu.pipeline_mode<synchronous>, transform_indices = @transform_2, window_bounds = array<i64: 24, 1>}, {pipeline_mode = #tpu.pipeline_mode<synchronous>, transform_indices = @transform_3, window_bounds = array<i64: 896, 128>}, {transform_indices = @transform_4, window_bounds = array<i64: 1, 24, 128>}]} {
    %cst = arith.constant 0.000000e+00 : f32
    %0 = vector.broadcast %cst : f32 to vector<4x128xf32>
    %c0 = arith.constant 0 : index
    %c0_0 = arith.constant 0 : index
    %1 = vector.load %arg6[%c0, %c0_0] : memref<4x1280xf32, #tpu.memory_space<vmem>>, vector<4x128xf32>
    tpu.vector_store %arg6[%c0, %c0_0], %0 {strides = array<i32>} : memref<4x1280xf32, #tpu.memory_space<vmem>>, vector<4x128xf32>,
    %c0_1 = arith.constant 0 : index
    %c512 = arith.constant 512 : index
    %2 = vector.load %arg6[%c0_1, %c512] : memref<4x1280xf32, #tpu.memory_space<vmem>>, vector<4x128xf32>
    tpu.vector_store %arg6[%c0_1, %c512], %0 {strides = array<i32>} : memref<4x1280xf32, #tpu.memory_space<vmem>>, vector<4x128xf32>,
    %c0_2 = arith.constant 0 : index
    %c0_3 = arith.constant 0 : index
    %c0_4 = arith.constant 0 : index
    %3 = vector.load %arg1[%c0_2, %c0_3, %c0_4] : memref<2x4x384xf32, #tpu.memory_space<vmem>>, vector<1x4x384xf32>
    %4 = vector.shape_cast %3 : vector<1x4x384xf32> to vector<4x384xf32>
    %c0_5 = arith.constant 0 : index
    %c128 = arith.constant 128 : index
    %5 = vector.load %arg6[%c0_5, %c128] : memref<4x1280xf32, #tpu.memory_space<vmem>>, vector<4x384xf32>
    tpu.vector_store %arg6[%c0_5, %c128], %4 {strides = array<i32>} : memref<4x1280xf32, #tpu.memory_space<vmem>>, vector<4x384xf32>,
    %c0_6 = arith.constant 0 : index
    %c1024 = arith.constant 1024 : index
    %6 = vector.load %arg6[%c0_6, %c1024] : memref<4x1280xf32, #tpu.memory_space<vmem>>, vector<4x128xf32>
    tpu.vector_store %arg6[%c0_6, %c1024], %0 {strides = array<i32>} : memref<4x1280xf32, #tpu.memory_space<vmem>>, vector<4x128xf32>,
    %c1 = arith.constant 1 : index
    %c0_7 = arith.constant 0 : index
    %c0_8 = arith.constant 0 : index
    %7 = vector.load %arg1[%c1, %c0_7, %c0_8] : memref<2x4x384xf32, #tpu.memory_space<vmem>>, vector<1x4x384xf32>
    %8 = vector.shape_cast %7 : vector<1x4x384xf32> to vector<4x384xf32>
    %c0_9 = arith.constant 0 : index
    %c640 = arith.constant 640 : index
    %9 = vector.load %arg6[%c0_9, %c640] : memref<4x1280xf32, #tpu.memory_space<vmem>>, vector<4x384xf32>
    tpu.vector_store %arg6[%c0_9, %c640], %8 {strides = array<i32>} : memref<4x1280xf32, #tpu.memory_space<vmem>>, vector<4x384xf32>,
    %c0_10 = arith.constant 0 : index
    %c1152 = arith.constant 1152 : index
    %10 = vector.load %arg6[%c0_10, %c1152] : memref<4x1280xf32, #tpu.memory_space<vmem>>, vector<4x128xf32>
    tpu.vector_store %arg6[%c0_10, %c1152], %0 {strides = array<i32>} : memref<4x1280xf32, #tpu.memory_space<vmem>>, vector<4x128xf32>,
    %c0_11 = arith.constant 0 : index
    %c28 = arith.constant 28 : index
    %11 = vector.load %arg6[%c0_11, %c28] : memref<4x1280xf32, #tpu.memory_space<vmem>>, vector<4x512xf32>
    %c0_12 = arith.constant 0 : index
    %c0_13 = arith.constant 0 : index
    %12 = vector.load %arg7[%c0_12, %c0_13] : memref<36x1024xf32, #tpu.memory_space<vmem>>, vector<4x512xf32>
    tpu.vector_store %arg7[%c0_12, %c0_13], %11 {strides = array<i32>} : memref<36x1024xf32, #tpu.memory_space<vmem>>, vector<4x512xf32>,
    %c0_14 = arith.constant 0 : index
    %c540 = arith.constant 540 : index
    %13 = vector.load %arg6[%c0_14, %c540] : memref<4x1280xf32, #tpu.memory_space<vmem>>, vector<4x512xf32>
    %c0_15 = arith.constant 0 : index
    %c512_16 = arith.constant 512 : index
    %14 = vector.load %arg7[%c0_15, %c512_16] : memref<36x1024xf32, #tpu.memory_space<vmem>>, vector<4x512xf32>
    tpu.vector_store %arg7[%c0_15, %c512_16], %13 {strides = array<i32>} : memref<36x1024xf32, #tpu.memory_space<vmem>>, vector<4x512xf32>,
    %c0_17 = arith.constant 0 : index
    %c52 = arith.constant 52 : index
    %15 = vector.load %arg6[%c0_17, %c52] : memref<4x1280xf32, #tpu.memory_space<vmem>>, vector<4x512xf32>
    %c4 = arith.constant 4 : index
    %c0_18 = arith.constant 0 : index
    %16 = vector.load %arg7[%c4, %c0_18] : memref<36x1024xf32, #tpu.memory_space<vmem>>, vector<4x512xf32>
    tpu.vector_store %arg7[%c4, %c0_18], %15 {strides = array<i32>} : memref<36x1024xf32, #tpu.memory_space<vmem>>, vector<4x512xf32>,
    %c0_19 = arith.constant 0 : index
    %c564 = arith.constant 564 : index
    %17 = vector.load %arg6[%c0_19, %c564] : memref<4x1280xf32, #tpu.memory_space<vmem>>, vector<4x512xf32>
    %c4_20 = arith.constant 4 : index
    %c512_21 = arith.constant 512 : index
    %18 = vector.load %arg7[%c4_20, %c512_21] : memref<36x1024xf32, #tpu.memory_space<vmem>>, vector<4x512xf32>
    tpu.vector_store %arg7[%c4_20, %c512_21], %17 {strides = array<i32>} : memref<36x1024xf32, #tpu.memory_space<vmem>>, vector<4x512xf32>,
    %c0_22 = arith.constant 0 : index
    %c76 = arith.constant 76 : index
    %19 = vector.load %arg6[%c0_22, %c76] : memref<4x1280xf32, #tpu.memory_space<vmem>>, vector<4x512xf32>
    %c8 = arith.constant 8 : index
    %c0_23 = arith.constant 0 : index
    %20 = vector.load %arg7[%c8, %c0_23] : memref<36x1024xf32, #tpu.memory_space<vmem>>, vector<4x512xf32>
    tpu.vector_store %arg7[%c8, %c0_23], %19 {strides = array<i32>} : memref<36x1024xf32, #tpu.memory_space<vmem>>, vector<4x512xf32>,
    %c0_24 = arith.constant 0 : index
    %c588 = arith.constant 588 : index
    %21 = vector.load %arg6[%c0_24, %c588] : memref<4x1280xf32, #tpu.memory_space<vmem>>, vector<4x512xf32>
    %c8_25 = arith.constant 8 : index
    %c512_26 = arith.constant 512 : index
    %22 = vector.load %arg7[%c8_25, %c512_26] : memref<36x1024xf32, #tpu.memory_space<vmem>>, vector<4x512xf32>
    tpu.vector_store %arg7[%c8_25, %c512_26], %21 {strides = array<i32>} : memref<36x1024xf32, #tpu.memory_space<vmem>>, vector<4x512xf32>,
    %c0_27 = arith.constant 0 : index
    %c100 = arith.constant 100 : index
    %23 = vector.load %arg6[%c0_27, %c100] : memref<4x1280xf32, #tpu.memory_space<vmem>>, vector<4x512xf32>
    %c12 = arith.constant 12 : index
    %c0_28 = arith.constant 0 : index
    %24 = vector.load %arg7[%c12, %c0_28] : memref<36x1024xf32, #tpu.memory_space<vmem>>, vector<4x512xf32>
    tpu.vector_store %arg7[%c12, %c0_28], %23 {strides = array<i32>} : memref<36x1024xf32, #tpu.memory_space<vmem>>, vector<4x512xf32>,
    %c0_29 = arith.constant 0 : index
    %c612 = arith.constant 612 : index
    %25 = vector.load %arg6[%c0_29, %c612] : memref<4x1280xf32, #tpu.memory_space<vmem>>, vector<4x512xf32>
    %c12_30 = arith.constant 12 : index
    %c512_31 = arith.constant 512 : index
    %26 = vector.load %arg7[%c12_30, %c512_31] : memref<36x1024xf32, #tpu.memory_space<vmem>>, vector<4x512xf32>
    tpu.vector_store %arg7[%c12_30, %c512_31], %25 {strides = array<i32>} : memref<36x1024xf32, #tpu.memory_space<vmem>>, vector<4x512xf32>,
    %c0_32 = arith.constant 0 : index
    %c124 = arith.constant 124 : index
    %27 = vector.load %arg6[%c0_32, %c124] : memref<4x1280xf32, #tpu.memory_space<vmem>>, vector<4x512xf32>
    %c16 = arith.constant 16 : index
    %c0_33 = arith.constant 0 : index
    %28 = vector.load %arg7[%c16, %c0_33] : memref<36x1024xf32, #tpu.memory_space<vmem>>, vector<4x512xf32>
    tpu.vector_store %arg7[%c16, %c0_33], %27 {strides = array<i32>} : memref<36x1024xf32, #tpu.memory_space<vmem>>, vector<4x512xf32>,
    %c0_34 = arith.constant 0 : index
    %c636 = arith.constant 636 : index
    %29 = vector.load %arg6[%c0_34, %c636] : memref<4x1280xf32, #tpu.memory_space<vmem>>, vector<4x512xf32>
    %c16_35 = arith.constant 16 : index
    %c512_36 = arith.constant 512 : index
    %30 = vector.load %arg7[%c16_35, %c512_36] : memref<36x1024xf32, #tpu.memory_space<vmem>>, vector<4x512xf32>
    tpu.vector_store %arg7[%c16_35, %c512_36], %29 {strides = array<i32>} : memref<36x1024xf32, #tpu.memory_space<vmem>>, vector<4x512xf32>,
    %c0_37 = arith.constant 0 : index
    %c148 = arith.constant 148 : index
    %31 = vector.load %arg6[%c0_37, %c148] : memref<4x1280xf32, #tpu.memory_space<vmem>>, vector<4x512xf32>
    %c20 = arith.constant 20 : index
    %c0_38 = arith.constant 0 : index
    %32 = vector.load %arg7[%c20, %c0_38] : memref<36x1024xf32, #tpu.memory_space<vmem>>, vector<4x512xf32>
    tpu.vector_store %arg7[%c20, %c0_38], %31 {strides = array<i32>} : memref<36x1024xf32, #tpu.memory_space<vmem>>, vector<4x512xf32>,
    %c0_39 = arith.constant 0 : index
    %c660 = arith.constant 660 : index
    %33 = vector.load %arg6[%c0_39, %c660] : memref<4x1280xf32, #tpu.memory_space<vmem>>, vector<4x512xf32>
    %c20_40 = arith.constant 20 : index
    %c512_41 = arith.constant 512 : index
    %34 = vector.load %arg7[%c20_40, %c512_41] : memref<36x1024xf32, #tpu.memory_space<vmem>>, vector<4x512xf32>
    tpu.vector_store %arg7[%c20_40, %c512_41], %33 {strides = array<i32>} : memref<36x1024xf32, #tpu.memory_space<vmem>>, vector<4x512xf32>,
    %c0_42 = arith.constant 0 : index
    %c172 = arith.constant 172 : index
    %35 = vector.load %arg6[%c0_42, %c172] : memref<4x1280xf32, #tpu.memory_space<vmem>>, vector<4x512xf32>
    %c24 = arith.constant 24 : index
    %c0_43 = arith.constant 0 : index
    %36 = vector.load %arg7[%c24, %c0_43] : memref<36x1024xf32, #tpu.memory_space<vmem>>, vector<4x512xf32>
    tpu.vector_store %arg7[%c24, %c0_43], %35 {strides = array<i32>} : memref<36x1024xf32, #tpu.memory_space<vmem>>, vector<4x512xf32>,
    %c0_44 = arith.constant 0 : index
    %c684 = arith.constant 684 : index
    %37 = vector.load %arg6[%c0_44, %c684] : memref<4x1280xf32, #tpu.memory_space<vmem>>, vector<4x512xf32>
    %c24_45 = arith.constant 24 : index
    %c512_46 = arith.constant 512 : index
    %38 = vector.load %arg7[%c24_45, %c512_46] : memref<36x1024xf32, #tpu.memory_space<vmem>>, vector<4x512xf32>
    tpu.vector_store %arg7[%c24_45, %c512_46], %37 {strides = array<i32>} : memref<36x1024xf32, #tpu.memory_space<vmem>>, vector<4x512xf32>,
    %c0_47 = arith.constant 0 : index
    %c196 = arith.constant 196 : index
    %39 = vector.load %arg6[%c0_47, %c196] : memref<4x1280xf32, #tpu.memory_space<vmem>>, vector<4x512xf32>
    %c28_48 = arith.constant 28 : index
    %c0_49 = arith.constant 0 : index
    %40 = vector.load %arg7[%c28_48, %c0_49] : memref<36x1024xf32, #tpu.memory_space<vmem>>, vector<4x512xf32>
    tpu.vector_store %arg7[%c28_48, %c0_49], %39 {strides = array<i32>} : memref<36x1024xf32, #tpu.memory_space<vmem>>, vector<4x512xf32>,
    %c0_50 = arith.constant 0 : index
    %c708 = arith.constant 708 : index
    %41 = vector.load %arg6[%c0_50, %c708] : memref<4x1280xf32, #tpu.memory_space<vmem>>, vector<4x512xf32>
    %c28_51 = arith.constant 28 : index
    %c512_52 = arith.constant 512 : index
    %42 = vector.load %arg7[%c28_51, %c512_52] : memref<36x1024xf32, #tpu.memory_space<vmem>>, vector<4x512xf32>
    tpu.vector_store %arg7[%c28_51, %c512_52], %41 {strides = array<i32>} : memref<36x1024xf32, #tpu.memory_space<vmem>>, vector<4x512xf32>,
    %c0_53 = arith.constant 0 : index
    %c220 = arith.constant 220 : index
    %43 = vector.load %arg6[%c0_53, %c220] : memref<4x1280xf32, #tpu.memory_space<vmem>>, vector<4x512xf32>
    %c32 = arith.constant 32 : index
    %c0_54 = arith.constant 0 : index
    %44 = vector.load %arg7[%c32, %c0_54] : memref<36x1024xf32, #tpu.memory_space<vmem>>, vector<4x512xf32>
    tpu.vector_store %arg7[%c32, %c0_54], %43 {strides = array<i32>} : memref<36x1024xf32, #tpu.memory_space<vmem>>, vector<4x512xf32>,
    %c0_55 = arith.constant 0 : index
    %c732 = arith.constant 732 : index
    %45 = vector.load %arg6[%c0_55, %c732] : memref<4x1280xf32, #tpu.memory_space<vmem>>, vector<4x512xf32>
    %c32_56 = arith.constant 32 : index
    %c512_57 = arith.constant 512 : index
    %46 = vector.load %arg7[%c32_56, %c512_57] : memref<36x1024xf32, #tpu.memory_space<vmem>>, vector<4x512xf32>
    tpu.vector_store %arg7[%c32_56, %c512_57], %45 {strides = array<i32>} : memref<36x1024xf32, #tpu.memory_space<vmem>>, vector<4x512xf32>,
    %c0_58 = arith.constant 0 : index
    %c0_59 = arith.constant 0 : index
    %c0_60 = arith.constant 0 : index
    %47 = vector.load %arg2[%c0_58, %c0_59, %c0_60] : memref<9x24x36xf32, #tpu.memory_space<vmem>>, vector<1x24x36xf32>
    %48 = vector.shape_cast %47 : vector<1x24x36xf32> to vector<24x36xf32>
    %c0_61 = arith.constant 0 : index
    %c0_62 = arith.constant 0 : index
    %49 = vector.load %arg7[%c0_61, %c0_62] : memref<36x1024xf32, #tpu.memory_space<vmem>>, vector<36x896xf32>
    %cst_63 = arith.constant dense<0.000000e+00> : vector<24x896xf32>
    %50 = tpu.matmul %48, %49, %cst_63 {dimension_numbers = #tpu.dot_dimension_numbers<[1], [0], [0], [1], [0, 0, 1, 1], [], []>} : vector<24x36xf32>, vector<36x896xf32>, vector<24x896xf32> -> vector<24x896xf32>
    %c0_64 = arith.constant 0 : index
    %c0_65 = arith.constant 0 : index
    %51 = vector.load %arg8[%c0_64, %c0_65] : memref<24x896xf32, #tpu.memory_space<vmem>>, vector<24x896xf32>
    tpu.vector_store %arg8[%c0_64, %c0_65], %50 {strides = array<i32>} : memref<24x896xf32, #tpu.memory_space<vmem>>, vector<24x896xf32>,
    %c0_66 = arith.constant 0 : index
    %c0_67 = arith.constant 0 : index
    %52 = vector.load %arg8[%c0_66, %c0_67] : memref<24x896xf32, #tpu.memory_space<vmem>>, vector<24x896xf32>
    %c1_68 = arith.constant 1 : index
    %c0_69 = arith.constant 0 : index
    %c0_70 = arith.constant 0 : index
    %53 = vector.load %arg2[%c1_68, %c0_69, %c0_70] : memref<9x24x36xf32, #tpu.memory_space<vmem>>, vector<1x24x36xf32>
    %54 = vector.shape_cast %53 : vector<1x24x36xf32> to vector<24x36xf32>
    %c0_71 = arith.constant 0 : index
    %c1_72 = arith.constant 1 : index
    %55 = vector.load %arg7[%c0_71, %c1_72] : memref<36x1024xf32, #tpu.memory_space<vmem>>, vector<36x896xf32>
    %cst_73 = arith.constant dense<0.000000e+00> : vector<24x896xf32>
    %56 = tpu.matmul %54, %55, %cst_73 {dimension_numbers = #tpu.dot_dimension_numbers<[1], [0], [0], [1], [0, 0, 1, 1], [], []>} : vector<24x36xf32>, vector<36x896xf32>, vector<24x896xf32> -> vector<24x896xf32>
    %57 = arith.addf %52, %56 : vector<24x896xf32>
    %c0_74 = arith.constant 0 : index
    %c0_75 = arith.constant 0 : index
    %58 = vector.load %arg8[%c0_74, %c0_75] : memref<24x896xf32, #tpu.memory_space<vmem>>, vector<24x896xf32>
    tpu.vector_store %arg8[%c0_74, %c0_75], %57 {strides = array<i32>} : memref<24x896xf32, #tpu.memory_space<vmem>>, vector<24x896xf32>,
    %c0_76 = arith.constant 0 : index
    %c0_77 = arith.constant 0 : index
    %59 = vector.load %arg8[%c0_76, %c0_77] : memref<24x896xf32, #tpu.memory_space<vmem>>, vector<24x896xf32>
    %c2 = arith.constant 2 : index
    %c0_78 = arith.constant 0 : index
    %c0_79 = arith.constant 0 : index
    %60 = vector.load %arg2[%c2, %c0_78, %c0_79] : memref<9x24x36xf32, #tpu.memory_space<vmem>>, vector<1x24x36xf32>
    %61 = vector.shape_cast %60 : vector<1x24x36xf32> to vector<24x36xf32>
    %c0_80 = arith.constant 0 : index
    %c2_81 = arith.constant 2 : index
    %62 = vector.load %arg7[%c0_80, %c2_81] : memref<36x1024xf32, #tpu.memory_space<vmem>>, vector<36x896xf32>
    %cst_82 = arith.constant dense<0.000000e+00> : vector<24x896xf32>
    %63 = tpu.matmul %61, %62, %cst_82 {dimension_numbers = #tpu.dot_dimension_numbers<[1], [0], [0], [1], [0, 0, 1, 1], [], []>} : vector<24x36xf32>, vector<36x896xf32>, vector<24x896xf32> -> vector<24x896xf32>
    %64 = arith.addf %59, %63 : vector<24x896xf32>
    %c0_83 = arith.constant 0 : index
    %c0_84 = arith.constant 0 : index
    %65 = vector.load %arg8[%c0_83, %c0_84] : memref<24x896xf32, #tpu.memory_space<vmem>>, vector<24x896xf32>
    tpu.vector_store %arg8[%c0_83, %c0_84], %64 {strides = array<i32>} : memref<24x896xf32, #tpu.memory_space<vmem>>, vector<24x896xf32>,
    %c0_85 = arith.constant 0 : index
    %c0_86 = arith.constant 0 : index
    %66 = vector.load %arg8[%c0_85, %c0_86] : memref<24x896xf32, #tpu.memory_space<vmem>>, vector<24x896xf32>
    %c3 = arith.constant 3 : index
    %c0_87 = arith.constant 0 : index
    %c0_88 = arith.constant 0 : index
    %67 = vector.load %arg2[%c3, %c0_87, %c0_88] : memref<9x24x36xf32, #tpu.memory_space<vmem>>, vector<1x24x36xf32>
    %68 = vector.shape_cast %67 : vector<1x24x36xf32> to vector<24x36xf32>
    %c0_89 = arith.constant 0 : index
    %c3_90 = arith.constant 3 : index
    %69 = vector.load %arg7[%c0_89, %c3_90] : memref<36x1024xf32, #tpu.memory_space<vmem>>, vector<36x896xf32>
    %cst_91 = arith.constant dense<0.000000e+00> : vector<24x896xf32>
    %70 = tpu.matmul %68, %69, %cst_91 {dimension_numbers = #tpu.dot_dimension_numbers<[1], [0], [0], [1], [0, 0, 1, 1], [], []>} : vector<24x36xf32>, vector<36x896xf32>, vector<24x896xf32> -> vector<24x896xf32>
    %71 = arith.addf %66, %70 : vector<24x896xf32>
    %c0_92 = arith.constant 0 : index
    %c0_93 = arith.constant 0 : index
    %72 = vector.load %arg8[%c0_92, %c0_93] : memref<24x896xf32, #tpu.memory_space<vmem>>, vector<24x896xf32>
    tpu.vector_store %arg8[%c0_92, %c0_93], %71 {strides = array<i32>} : memref<24x896xf32, #tpu.memory_space<vmem>>, vector<24x896xf32>,
    %c0_94 = arith.constant 0 : index
    %c0_95 = arith.constant 0 : index
    %73 = vector.load %arg8[%c0_94, %c0_95] : memref<24x896xf32, #tpu.memory_space<vmem>>, vector<24x896xf32>
    %c4_96 = arith.constant 4 : index
    %c0_97 = arith.constant 0 : index
    %c0_98 = arith.constant 0 : index
    %74 = vector.load %arg2[%c4_96, %c0_97, %c0_98] : memref<9x24x36xf32, #tpu.memory_space<vmem>>, vector<1x24x36xf32>
    %75 = vector.shape_cast %74 : vector<1x24x36xf32> to vector<24x36xf32>
    %c0_99 = arith.constant 0 : index
    %c4_100 = arith.constant 4 : index
    %76 = vector.load %arg7[%c0_99, %c4_100] : memref<36x1024xf32, #tpu.memory_space<vmem>>, vector<36x896xf32>
    %cst_101 = arith.constant dense<0.000000e+00> : vector<24x896xf32>
    %77 = tpu.matmul %75, %76, %cst_101 {dimension_numbers = #tpu.dot_dimension_numbers<[1], [0], [0], [1], [0, 0, 1, 1], [], []>} : vector<24x36xf32>, vector<36x896xf32>, vector<24x896xf32> -> vector<24x896xf32>
    %78 = arith.addf %73, %77 : vector<24x896xf32>
    %c0_102 = arith.constant 0 : index
    %c0_103 = arith.constant 0 : index
    %79 = vector.load %arg8[%c0_102, %c0_103] : memref<24x896xf32, #tpu.memory_space<vmem>>, vector<24x896xf32>
    tpu.vector_store %arg8[%c0_102, %c0_103], %78 {strides = array<i32>} : memref<24x896xf32, #tpu.memory_space<vmem>>, vector<24x896xf32>,
    %c0_104 = arith.constant 0 : index
    %c0_105 = arith.constant 0 : index
    %80 = vector.load %arg8[%c0_104, %c0_105] : memref<24x896xf32, #tpu.memory_space<vmem>>, vector<24x896xf32>
    %c5 = arith.constant 5 : index
    %c0_106 = arith.constant 0 : index
    %c0_107 = arith.constant 0 : index
    %81 = vector.load %arg2[%c5, %c0_106, %c0_107] : memref<9x24x36xf32, #tpu.memory_space<vmem>>, vector<1x24x36xf32>
    %82 = vector.shape_cast %81 : vector<1x24x36xf32> to vector<24x36xf32>
    %c0_108 = arith.constant 0 : index
    %c5_109 = arith.constant 5 : index
    %83 = vector.load %arg7[%c0_108, %c5_109] : memref<36x1024xf32, #tpu.memory_space<vmem>>, vector<36x896xf32>
    %cst_110 = arith.constant dense<0.000000e+00> : vector<24x896xf32>
    %84 = tpu.matmul %82, %83, %cst_110 {dimension_numbers = #tpu.dot_dimension_numbers<[1], [0], [0], [1], [0, 0, 1, 1], [], []>} : vector<24x36xf32>, vector<36x896xf32>, vector<24x896xf32> -> vector<24x896xf32>
    %85 = arith.addf %80, %84 : vector<24x896xf32>
    %c0_111 = arith.constant 0 : index
    %c0_112 = arith.constant 0 : index
    %86 = vector.load %arg8[%c0_111, %c0_112] : memref<24x896xf32, #tpu.memory_space<vmem>>, vector<24x896xf32>
    tpu.vector_store %arg8[%c0_111, %c0_112], %85 {strides = array<i32>} : memref<24x896xf32, #tpu.memory_space<vmem>>, vector<24x896xf32>,
    %c0_113 = arith.constant 0 : index
    %c0_114 = arith.constant 0 : index
    %87 = vector.load %arg8[%c0_113, %c0_114] : memref<24x896xf32, #tpu.memory_space<vmem>>, vector<24x896xf32>
    %c6 = arith.constant 6 : index
    %c0_115 = arith.constant 0 : index
    %c0_116 = arith.constant 0 : index
    %88 = vector.load %arg2[%c6, %c0_115, %c0_116] : memref<9x24x36xf32, #tpu.memory_space<vmem>>, vector<1x24x36xf32>
    %89 = vector.shape_cast %88 : vector<1x24x36xf32> to vector<24x36xf32>
    %c0_117 = arith.constant 0 : index
    %c6_118 = arith.constant 6 : index
    %90 = vector.load %arg7[%c0_117, %c6_118] : memref<36x1024xf32, #tpu.memory_space<vmem>>, vector<36x896xf32>
    %cst_119 = arith.constant dense<0.000000e+00> : vector<24x896xf32>
    %91 = tpu.matmul %89, %90, %cst_119 {dimension_numbers = #tpu.dot_dimension_numbers<[1], [0], [0], [1], [0, 0, 1, 1], [], []>} : vector<24x36xf32>, vector<36x896xf32>, vector<24x896xf32> -> vector<24x896xf32>
    %92 = arith.addf %87, %91 : vector<24x896xf32>
    %c0_120 = arith.constant 0 : index
    %c0_121 = arith.constant 0 : index
    %93 = vector.load %arg8[%c0_120, %c0_121] : memref<24x896xf32, #tpu.memory_space<vmem>>, vector<24x896xf32>
    tpu.vector_store %arg8[%c0_120, %c0_121], %92 {strides = array<i32>} : memref<24x896xf32, #tpu.memory_space<vmem>>, vector<24x896xf32>,
    %c0_122 = arith.constant 0 : index
    %c0_123 = arith.constant 0 : index
    %94 = vector.load %arg8[%c0_122, %c0_123] : memref<24x896xf32, #tpu.memory_space<vmem>>, vector<24x896xf32>
    %c7 = arith.constant 7 : index
    %c0_124 = arith.constant 0 : index
    %c0_125 = arith.constant 0 : index
    %95 = vector.load %arg2[%c7, %c0_124, %c0_125] : memref<9x24x36xf32, #tpu.memory_space<vmem>>, vector<1x24x36xf32>
    %96 = vector.shape_cast %95 : vector<1x24x36xf32> to vector<24x36xf32>
    %c0_126 = arith.constant 0 : index
    %c7_127 = arith.constant 7 : index
    %97 = vector.load %arg7[%c0_126, %c7_127] : memref<36x1024xf32, #tpu.memory_space<vmem>>, vector<36x896xf32>
    %cst_128 = arith.constant dense<0.000000e+00> : vector<24x896xf32>
    %98 = tpu.matmul %96, %97, %cst_128 {dimension_numbers = #tpu.dot_dimension_numbers<[1], [0], [0], [1], [0, 0, 1, 1], [], []>} : vector<24x36xf32>, vector<36x896xf32>, vector<24x896xf32> -> vector<24x896xf32>
    %99 = arith.addf %94, %98 : vector<24x896xf32>
    %c0_129 = arith.constant 0 : index
    %c0_130 = arith.constant 0 : index
    %100 = vector.load %arg8[%c0_129, %c0_130] : memref<24x896xf32, #tpu.memory_space<vmem>>, vector<24x896xf32>
    tpu.vector_store %arg8[%c0_129, %c0_130], %99 {strides = array<i32>} : memref<24x896xf32, #tpu.memory_space<vmem>>, vector<24x896xf32>,
    %c0_131 = arith.constant 0 : index
    %c0_132 = arith.constant 0 : index
    %101 = vector.load %arg8[%c0_131, %c0_132] : memref<24x896xf32, #tpu.memory_space<vmem>>, vector<24x896xf32>
    %c8_133 = arith.constant 8 : index
    %c0_134 = arith.constant 0 : index
    %c0_135 = arith.constant 0 : index
    %102 = vector.load %arg2[%c8_133, %c0_134, %c0_135] : memref<9x24x36xf32, #tpu.memory_space<vmem>>, vector<1x24x36xf32>
    %103 = vector.shape_cast %102 : vector<1x24x36xf32> to vector<24x36xf32>
    %c0_136 = arith.constant 0 : index
    %c8_137 = arith.constant 8 : index
    %104 = vector.load %arg7[%c0_136, %c8_137] : memref<36x1024xf32, #tpu.memory_space<vmem>>, vector<36x896xf32>
    %cst_138 = arith.constant dense<0.000000e+00> : vector<24x896xf32>
    %105 = tpu.matmul %103, %104, %cst_138 {dimension_numbers = #tpu.dot_dimension_numbers<[1], [0], [0], [1], [0, 0, 1, 1], [], []>} : vector<24x36xf32>, vector<36x896xf32>, vector<24x896xf32> -> vector<24x896xf32>
    %106 = arith.addf %101, %105 : vector<24x896xf32>
    %c0_139 = arith.constant 0 : index
    %c0_140 = arith.constant 0 : index
    %107 = vector.load %arg8[%c0_139, %c0_140] : memref<24x896xf32, #tpu.memory_space<vmem>>, vector<24x896xf32>
    tpu.vector_store %arg8[%c0_139, %c0_140], %106 {strides = array<i32>} : memref<24x896xf32, #tpu.memory_space<vmem>>, vector<24x896xf32>,
    %c0_141 = arith.constant 0 : index
    %c0_142 = arith.constant 0 : index
    %108 = vector.load %arg8[%c0_141, %c0_142] : memref<24x896xf32, #tpu.memory_space<vmem>>, vector<24x896xf32>
    %c0_143 = arith.constant 0 : index
    %c0_144 = arith.constant 0 : index
    %109 = vector.load %arg3[%c0_143, %c0_144] : memref<24x1xf32, #tpu.memory_space<vmem>>, vector<24x1xf32>
    %110 = vector.broadcast %109 : vector<24x1xf32> to vector<24x896xf32>
    %111 = arith.addf %108, %110 : vector<24x896xf32>
    %cst_145 = arith.constant 0.000000e+00 : f32
    %112 = vector.broadcast %cst_145 : f32 to vector<24x896xf32>
    %113 = arith.maximumf %111, %112 : vector<24x896xf32>
    %c0_146 = arith.constant 0 : index
    %c0_147 = arith.constant 0 : index
    %114 = vector.load %arg4[%c0_146, %c0_147] : memref<896x128xf32, #tpu.memory_space<vmem>>, vector<896x128xf32>
    %cst_148 = arith.constant dense<0.000000e+00> : vector<24x128xf32>
    %115 = tpu.matmul %113, %114, %cst_148 {dimension_numbers = #tpu.dot_dimension_numbers<[1], [0], [0], [1], [0, 0, 1, 1], [], []>} : vector<24x896xf32>, vector<896x128xf32>, vector<24x128xf32> -> vector<24x128xf32>
    %c0_149 = arith.constant 0 : index
    %c0_150 = arith.constant 0 : index
    %c0_151 = arith.constant 0 : index
    %116 = vector.load %arg5[%c0_149, %c0_150, %c0_151] : memref<1x24x128xf32, #tpu.memory_space<vmem>>, vector<1x24x128xf32>
    %117 = vector.shape_cast %116 : vector<1x24x128xf32> to vector<24x128xf32>
    %118 = vector.shape_cast %115 : vector<24x128xf32> to vector<1x24x128xf32>
    tpu.vector_store %arg5[%c0_149, %c0_150, %c0_151], %118 {strides = array<i32>} : memref<1x24x128xf32, #tpu.memory_space<vmem>>, vector<1x24x128xf32>,
    return
  }
  func.func @transform_0(%arg0: i32) -> (i32, i32, i32) {
    %c0_i32 = arith.constant 0 : i32
    %c0_i32_0 = arith.constant 0 : i32
    %c0_i32_1 = arith.constant 0 : i32
    return %arg0, %c0_i32, %c0_i32_0 : i32, i32, i32
  }
  func.func @transform_1(%arg0: i32) -> (i32, i32, i32) {
    %c0_i32 = arith.constant 0 : i32
    %c0_i32_0 = arith.constant 0 : i32
    %c0_i32_1 = arith.constant 0 : i32
    %c0_i32_2 = arith.constant 0 : i32
    return %c0_i32, %c0_i32_0, %c0_i32_1 : i32, i32, i32
  }
  func.func @transform_2(%arg0: i32) -> (i32, i32) {
    %c0_i32 = arith.constant 0 : i32
    %c0_i32_0 = arith.constant 0 : i32
    %c0_i32_1 = arith.constant 0 : i32
    return %c0_i32, %c0_i32_0 : i32, i32
  }
  func.func @transform_3(%arg0: i32) -> (i32, i32) {
    %c0_i32 = arith.constant 0 : i32
    %c0_i32_0 = arith.constant 0 : i32
    %c0_i32_1 = arith.constant 0 : i32
    return %c0_i32, %c0_i32_0 : i32, i32
  }
  func.func @transform_4(%arg0: i32) -> (i32, i32, i32) {
    %c0_i32 = arith.constant 0 : i32
    %c0_i32_0 = arith.constant 0 : i32
    %c0_i32_1 = arith.constant 0 : i32
    return %arg0, %c0_i32, %c0_i32_0 : i32, i32, i32
  }
}

</mosaic_0001>

<bundles_post_ra>
// kernel: preprocessing_block.1
= control target key start
LH: loop header
LB: loop body
LE: loop exit
PB: predicated region body
PF: predicated region fallthrough
CT: control target
= control target key end

     0   :  { %v8529_v2 = vmov 0.0   ;;  %s8530_s23 = smov 100   ;;  %s8532_s24 = smov 52   ;;  %vm48_vm0 = vcmask 818176   ;;  %vm110_vm1 = vcmask 621568   ;;  %vm172_vm2 = vcmask 424960   ;;  %s11056_s0 = inlined_call_operand.vmem [shape: f32[2,4,384], index: 0, kind: input, shape index: {}]   ;;  %s11057_s1 = inlined_call_operand.vmem [shape: f32[9,24,36], index: 1, kind: input, shape index: {}]   ;;  %s11058_s2 = inlined_call_operand.vmem [shape: f32[24,1], index: 2, kind: input, shape index: {}]   ;;  %s11059_s3 = inlined_call_operand.vmem [shape: f32[896,128], index: 3, kind: input, shape index: {}]   ;;  %s11060_s4 = inlined_call_operand.vmem [shape: f32[1,24,128], index: 4, kind: output, shape index: {}]  }
   0x1   :  { %v8578_v0 = vld [vmem:[%s11056_s0] sm:$0xff]  ;;  %v20_v1 = vld [vmem:[%s11056_s0 + $0x8] sm:$0xf]  ;;  %18 = vst [vmem:[#allocation2 + $0x10] sm:$0xf] %v8529_v2  ;;  %v8590_v3 = vld [vmem:[%s11056_s0 + $0xc] sm:$0xff]  ;;  %720 = vmatprep.mubr.f32.mxu0 %v8529_v2  ;;  %803 = vmatprep.mubr.f32.mxu1 %v8529_v2 }
   0x2   :  { %23 = vst [vmem:[#allocation2 + $0x20] sm:$0xf] %v8529_v2  ;;  %17 = vst [vmem:[#allocation2] sm:$0xf] %v8529_v2  ;;  %v6671_v4 = vld [vmem:[%s11056_s0 + $0x14] sm:$0xf]  ;;  %v408_v27 = vcombine.high %v8578_v0, %v8578_v0  ;;  %v345_v30 = vcombine.low %v8578_v0, %v8578_v0  ;;  %v377_v34 = vcombine.low %v8590_v3, %v8590_v3 }
   0x3   :  { %29 = vst [vmem:[#allocation2 + $0x24] sm:$0xf] %v8529_v2  ;;  %21 = vst [vmem:[#allocation2 + $0x4] sm:$0xff] %v8578_v0  ;;  %s8531_s0 = smov 76   ;;  %s8533_s25 = smov 28   ;;  %v439_v37 = vcombine.high %v8590_v3, %v8590_v3  ;;  %vm234_vm3 = vcmask 228352  }
   0x4   :  { %22 = vst [vmem:[#allocation2 + $0xc] sm:$0xf] %v20_v1  ;;  %27 = vst [vmem:[#allocation2 + $0x14] sm:$0xff] %v8590_v3  ;;  %s8534_s26 = smov 4   ;;  %s8535_s27 = smov 108   ;;  %vm296_vm4 = vcmask 31744  }
   0x5   :  { %28 = vst [vmem:[#allocation2 + $0x1c] sm:$0xf] %v6671_v4  ;;  %s8536_s28 = smov 84   ;;  %s8537_s29 = smov 60   ;;  %vm358_vm5 = vcmask 883712   ;;  %vm420_vm6 = vcmask 687104  }
   0x6   :  { %s8538_s30 = smov 36   ;;  %s8539_s5 = smov 127   ;;  %vm482_vm7 = vcmask 490496   ;;  %vm544_vm8 = vcmask 293888   ;;  %vm634_vm9 = vcmask 1043456   ;;  %vm8541_vm10 = vmmov 0  }
   0x7   :  { %vm1191_vm11 = vcmask 1039360   ;;  %s8542_s12 = smov 126   ;;  %s8543_s13 = smov 125   ;;  %vm1834_vm12 = vcmask 1031168   ;;  %vm2477_vm13 = vcmask 1022976   ;;  %vm3120_vm14 = vcmask 1014784  }
   0x8   :  { %v32_v5 = vld [vmem:[#allocation2 + $0x10] sm:$0xf]  ;;  %s8544_s20 = smov 124   ;;  %s8547_s10 = smov 121   ;;  %vm3763_vm15 = vcmask 1006592  }
   0x9   :  { %v63_v6 = vld [vmem:[#allocation2 + $0x20] sm:$0xf]  ;;  %v8511_v18 = vld [vmem:[#allocation2 + $0x10] ss:$0 sps:$4 sm:$0xff]   ;;  %s8548_s17 = smov 120  }
   0xa   :  { %v7848_v8 = vpack.i.bf16 %v63_v6, %v32_v5  ;;  %v8601_v10 = vld [vmem:[#allocation2] sm:$0xff]  ;;  %v156_v22 = vld [vmem:[#allocation2 + $0x10] sm:$0xf] }
   0xb   :  { %v31_v7 = vld [vmem:[#allocation2 + $0x8] sm:$0xff]  ;;  %v8599_v9 = vld [vmem:[#allocation2 + $0x10] sm:$0xff]  ;;  %v36_v11 = vcombine.high %v8601_v10, %v8601_v10  ;;  %v97_v15 = vcombine.low %v8601_v10, %v8601_v10  ;;  %v8514_v21 = vld [vmem:[#allocation2 + $0x20] ss:$0 sps:$4 sm:$0xff]  }
   0xc   :  { %42 = vrot.lane.b32.xlu1 %v31_v7, %s8530_s23  ;;  %7849 = vrot.lane.b32.xlu0 %v7848_v8, %s8530_s23  ;;  %v8607_v12 = vld [vmem:[#allocation2 + $0x18] sm:$0xff]  ;;  %v37_v13 = vcombine.high %v31_v7, %v31_v7  ;;  %v8612_v14 = vcombine.high %v8599_v9, %v8599_v9  ;;  %v98_v17 = vcombine.low %v31_v7, %v31_v7  ;;  %v187_v23 = vld [vmem:[#allocation2 + $0x20] sm:$0xf]  ;;  %v340_v25 = vld [vmem:[#allocation2 + $0xc] sm:$0xff] }
   0xd   :  { %v8618_v16 = vcombine.high %v8607_v12, %v8607_v12  ;;  %v129_v19 = vcombine.low %v8599_v9, %v8599_v9  ;;  %v8628_v20 = vcombine.low %v8607_v12, %v8607_v12  ;;  %v7853_v24 = vpack.i.bf16 %v187_v23, %v156_v22  ;;  %v8519_v29 = vld [vmem:[#allocation2 + $0x10] ss:$0 sps:$4 sm:$0xff]   ;;  %v311_v32 = vld [vmem:[#allocation2 + $0x20] sm:$0xf]  ;;  %v8521_v35 = vld [vmem:[#allocation2 + $0x14] ss:$0 sps:$4 sm:$0xff]  }
   0xe   :  { %v346_v26 = vcombine.low %v340_v25, %v340_v25  ;;  %v409_v28 = vcombine.high %v340_v25, %v340_v25  ;;  %v280_v31 = vld [vmem:[#allocation2 + $0x10] sm:$0xf]  ;;  %v404_v36 = vld [vmem:[#allocation2 + $0x14] sm:$0xf]  ;;  %v8526_v22 = vld [vmem:[#allocation2 + $0x24] ss:$0 sps:$4 sm:$0xff]  }
   0xf   :  { %v7858_v33 = vpack.i.bf16 %v311_v32, %v280_v31  ;;  %v8523_v38 = vld [vmem:[#allocation2 + $0x14] ss:$0 sps:$4 sm:$0xff]   ;;  %v8527_v23 = vld [vmem:[#allocation2 + $0x20] ss:$0 sps:$4 sm:$0xff]   ;;  %v435_v31 = vld [vmem:[#allocation2 + $0x24] sm:$0xf] }
  0x10   :  { %69 = vrot.lane.b32.xlu1 %v8599_v9, %s8530_s23  ;;  %38 = vrot.lane.b32.xlu0 %v8601_v10, %s8530_s23  ;;  %v528_v59 = vld [vmem:[#allocation2 + $0x14] sm:$0xf] }
  0x14   :  { %73 = vrot.lane.b32.xlu1 %v8607_v12, %s8530_s23  ;;  %40 = vrot.lane.b32.xlu0 %v36_v11, %s8530_s23 }
  0x18   :  { %44 = vrot.lane.b32.xlu1 %v37_v13, %s8530_s23  ;;  %71 = vrot.lane.b32.xlu0 %v8612_v14, %s8530_s23 }
  0x1c   :  { %100 = vrot.lane.b32.xlu1 %v97_v15, %s8531_s0  ;;  %75 = vrot.lane.b32.xlu0 %v8618_v16, %s8530_s23  ;;  %s8545_s23 = smov 123  }
  0x20   :  { %104 = vrot.lane.b32.xlu1 %v98_v17, %s8531_s0  ;;  %102 = vrot.lane.b32.xlu0 %v8601_v10, %s8531_s0 }
  0x24   :  { %108 = vrot.lane.b32.xlu1 %v8511_v18, %s8531_s0  ;;  %106 = vrot.lane.b32.xlu0 %v31_v7, %s8531_s0 }
  0x28   :  { %134 = vrot.lane.b32.xlu1 %v8599_v9, %s8531_s0  ;;  %132 = vrot.lane.b32.xlu0 %v129_v19, %s8531_s0 }
  0x2c   :  { %138 = vrot.lane.b32.xlu1 %v8607_v12, %s8531_s0  ;;  %136 = vrot.lane.b32.xlu0 %v8628_v20, %s8531_s0 }
  0x30   :  { %162 = vrot.lane.b32.xlu1 %v8601_v10, %s8532_s24  ;;  %140 = vrot.lane.b32.xlu0 %v8514_v21, %s8531_s0 }
  0x34   :  { %166 = vrot.lane.b32.xlu1 %v31_v7, %s8532_s24  ;;  %164 = vrot.lane.b32.xlu0 %v36_v11, %s8532_s24 }
  0x38   :  { %7854 = vrot.lane.b32.xlu1 %v7853_v24, %s8532_s24  ;;  %168 = vrot.lane.b32.xlu0 %v37_v13, %s8532_s24 }
  0x3c   :  { %228 = vrot.lane.b32.xlu1 %v98_v17, %s8533_s25  ;;  %226 = vrot.lane.b32.xlu0 %v8601_v10, %s8533_s25 }
  0x40   :  { %224 = vrot.lane.b32.xlu1 %v97_v15, %s8533_s25  ;;  %230 = vrot.lane.b32.xlu0 %v31_v7, %s8533_s25 }
  0x44   :  { %290 = vrot.lane.b32.xlu1 %v31_v7, %s8534_s26  ;;  %288 = vrot.lane.b32.xlu0 %v36_v11, %s8534_s26  ;;  %v372_v7 = vld [vmem:[#allocation2 + $0x1c] sm:$0xff] }
  0x48   :  { %350 = vrot.lane.b32.xlu1 %v8578_v0, %s8535_s27  ;;  %292 = vrot.lane.b32.xlu0 %v37_v13, %s8534_s26 }
  0x4c   :  { %354 = vrot.lane.b32.xlu1 %v340_v25, %s8535_s27  ;;  %352 = vrot.lane.b32.xlu0 %v346_v26, %s8535_s27 }
  0x50   :  { %414 = vrot.lane.b32.xlu1 %v340_v25, %s8536_s28  ;;  %412 = vrot.lane.b32.xlu0 %v408_v27, %s8536_s28 }
  0x54   :  { %474 = vrot.lane.b32.xlu1 %v8578_v0, %s8537_s29  ;;  %416 = vrot.lane.b32.xlu0 %v409_v28, %s8536_s28 }
  0x58   :  { %478 = vrot.lane.b32.xlu1 %v340_v25, %s8537_s29  ;;  %476 = vrot.lane.b32.xlu0 %v346_v26, %s8537_s29 }
  0x5c   :  { %195 = vrot.lane.b32.xlu1 %v8612_v14, %s8532_s24  ;;  %193 = vrot.lane.b32.xlu0 %v8599_v9, %s8532_s24 }
  0x60   :  { %256 = vrot.lane.b32.xlu1 %v129_v19, %s8533_s25  ;;  %232 = vrot.lane.b32.xlu0 %v8519_v29, %s8533_s25 }
  0x64   :  { %286 = vrot.lane.b32.xlu1 %v8601_v10, %s8534_s26  ;;  %258 = vrot.lane.b32.xlu0 %v8599_v9, %s8533_s25  ;;  %v378_v10 = vcombine.low %v372_v7, %v372_v7 }
  0x68   :  { %410 = vrot.lane.b32.xlu1 %v8578_v0, %s8536_s28  ;;  %348 = vrot.lane.b32.xlu0 %v345_v30, %s8535_s27 }
  0x6c   :  { %7859 = vrot.lane.b32.xlu1 %v7858_v33, %s8534_s26  ;;  %472 = vrot.lane.b32.xlu0 %v345_v30, %s8537_s29 }
  0x70   :  { %319 = vrot.lane.b32.xlu1 %v8612_v14, %s8534_s26  ;;  %317 = vrot.lane.b32.xlu0 %v8599_v9, %s8534_s26 }
  0x74   :  { %380 = vrot.lane.b32.xlu1 %v377_v34, %s8535_s27  ;;  %356 = vrot.lane.b32.xlu0 %v8521_v35, %s8535_s27 }
  0x78   :  { %418 = vrot.lane.b32.xlu1 %v404_v36, %s8536_s28  ;;  %382 = vrot.lane.b32.xlu0 %v8590_v3, %s8535_s27 }
  0x7c   :  { %443 = vrot.lane.b32.xlu1 %v439_v37, %s8536_s28  ;;  %441 = vrot.lane.b32.xlu0 %v8590_v3, %s8536_s28 }
  0x7e   :  { %v43_v39 = vpop.permute.xlu1 %42  ;;  %v7850_v40 = vpop.permute.xlu0 %7849 }
  0x7f   :  { %v7851_v47 = vunpack.i.l.bf16 %v7850_v40  ;;  %v7852_v54 = vunpack.i.h.bf16 %v7850_v40 }
  0x80   :  { %504 = vrot.lane.b32.xlu1 %v377_v34, %s8537_s29  ;;  %480 = vrot.lane.b32.xlu0 %v8523_v38, %s8537_s29 }
  0x82   :  { %v70_v41 = vpop.permute.xlu1 %69  ;;  %v39_v42 = vpop.permute.xlu0 %38 }
  0x84   :  { %536 = vrot.lane.b32.xlu1 %v408_v27, %s8538_s30  ;;  %506 = vrot.lane.b32.xlu0 %v8590_v3, %s8537_s29 }
  0x86   :  { %v74_v43 = vpop.permute.xlu1 %73  ;;  %v41_v44 = vpop.permute.xlu0 %40 }
  0x87   :  { %v49_v45 = vsel %vm48_vm0, %v39_v42, %v41_v44  ;;  %v50_v46 = vsel %vm48_vm0, %v41_v44, %v43_v39  ;;  %v559_v42 = vld [vmem:[#allocation2 + $0x24] sm:$0xf] }
  0x88   :  { %540 = vrot.lane.b32.xlu1 %v409_v28, %s8538_s30  ;;  %57 = vst [vmem:[#allocation3] sm:$0xf] %v49_v45  ;;  %58 = vst [vmem:[#allocation3 + $0x8] sm:$0xf] %v50_v46  ;;  %538 = vrot.lane.b32.xlu0 %v340_v25, %s8538_s30  ;;  %v8528_v28 = vld [vmem:[#allocation2 + $0x24] ss:$0 sps:$4 sm:$0xff]  }
  0x8a   :  { %v45_v48 = vpop.permute.xlu1 %44  ;;  %v72_v51 = vpop.permute.xlu0 %71 }
  0x8b   :  { %v51_v49 = vsel %vm48_vm0, %v43_v39, %v45_v48  ;;  %v52_v50 = vsel %vm48_vm0, %v45_v48, %v7851_v47  ;;  %v79_v52 = vsel %vm48_vm0, %v70_v41, %v72_v51  ;;  %v80_v53 = vsel %vm48_vm0, %v72_v51, %v74_v43 }
  0x8c   :  { %59 = vst [vmem:[#allocation3 + $0x10] sm:$0xf] %v51_v49  ;;  %60 = vst [vmem:[#allocation3 + $0x18] sm:$0xf] %v52_v50  ;;  %197 = vrot.lane.b32.xlu1 %v8607_v12, %s8532_s24  ;;  %534 = vrot.lane.b32.xlu0 %v8578_v0, %s8538_s30 }
  0x8d   :  { %87 = vst [vmem:[#allocation3 + $0x20] sm:$0xf] %v79_v52  ;;  %88 = vst [vmem:[#allocation3 + $0x28] sm:$0xf] %v80_v53 }
  0x8e   :  { %v101_v55 = vpop.permute.xlu1 %100  ;;  %v76_v56 = vpop.permute.xlu0 %75 }
  0x8f   :  { %v81_v57 = vsel %vm48_vm0, %v74_v43, %v76_v56  ;;  %v82_v58 = vsel %vm48_vm0, %v76_v56, %v7852_v54  ;;  %vm4406_vm0 = vcmask 998400  }
  0x90   :  { %260 = vrot.lane.b32.xlu1 %v8628_v20, %s8533_s25  ;;  %89 = vst [vmem:[#allocation3 + $0x30] sm:$0xf] %v81_v57  ;;  %90 = vst [vmem:[#allocation3 + $0x38] sm:$0xf] %v82_v58  ;;  %199 = vrot.lane.b32.xlu0 %v8618_v16, %s8532_s24 }
  0x92   :  { %v105_v60 = vpop.permute.xlu1 %104  ;;  %v103_v61 = vpop.permute.xlu0 %102 }
  0x93   :  { %v111_v62 = vsel %vm110_vm1, %v101_v55, %v103_v61  ;;  %v112_v63 = vsel %vm110_vm1, %v103_v61, %v105_v60 }
  0x94   :  { %542 = vrot.lane.b32.xlu1 %v528_v59, %s8538_s30  ;;  %119 = vst [vmem:[#allocation3] sm:$0xf0] %v111_v62  ;;  %120 = vst [vmem:[#allocation3 + $0x8] sm:$0xf0] %v112_v63  ;;  %262 = vrot.lane.b32.xlu0 %v8607_v12, %s8533_s25 }
  0x96   :  { %v109_v0 = vpop.permute.xlu1 %108  ;;  %v107_v1 = vpop.permute.xlu0 %106 }
  0x97   :  { %v113_v4 = vsel %vm110_vm1, %v105_v60, %v107_v1  ;;  %v114_v5 = vsel %vm110_vm1, %v107_v1, %v109_v0 }
  0x98   :  { %567 = vrot.lane.b32.xlu1 %v439_v37, %s8538_s30  ;;  %121 = vst [vmem:[#allocation3 + $0x10] sm:$0xf0] %v113_v4  ;;  %122 = vst [vmem:[#allocation3 + $0x18] sm:$0xf0] %v114_v5  ;;  %565 = vrot.lane.b32.xlu0 %v8590_v3, %s8538_s30  ;;  %v440_v3 = vcombine.high %v372_v7, %v372_v7 }
  0x9a   :  { %v135_v6 = vpop.permute.xlu1 %134  ;;  %v133_v8 = vpop.permute.xlu0 %132 }
  0x9b   :  { %v142_v9 = vsel %vm110_vm1, %v133_v8, %v135_v6  ;;  %v1032_v39 = vld [vmem:[#allocation3 + $0x8] sm:$0xff]  ;;  %v1031_v49 = vld [vmem:[#allocation3] sm:$0xff] }
  0x9c   :  { %323 = vrot.lane.b32.xlu1 %v8618_v16, %s8534_s26  ;;  %150 = vst [vmem:[#allocation3 + $0x20] sm:$0xf0] %v142_v9  ;;  %321 = vrot.lane.b32.xlu0 %v8607_v12, %s8534_s26 }
  0x9e   :  { %v139_v11 = vpop.permute.xlu1 %138  ;;  %v137_v13 = vpop.permute.xlu0 %136 }
  0x9f   :  { %v143_v14 = vsel %vm110_vm1, %v135_v6, %v137_v13  ;;  %v144_v15 = vsel %vm110_vm1, %v137_v13, %v139_v11  ;;  %v8754_v37 = vld [vmem:[#allocation3 + $0x10] sm:$0xff]  ;;  %v1034_v13 = vld [vmem:[#allocation3 + $0x18] sm:$0xff] }
  0xa0   :  { %386 = vrot.lane.b32.xlu1 %v372_v7, %s8535_s27  ;;  %151 = vst [vmem:[#allocation3 + $0x28] sm:$0xf0] %v143_v14  ;;  %152 = vst [vmem:[#allocation3 + $0x30] sm:$0xf0] %v144_v15  ;;  %384 = vrot.lane.b32.xlu0 %v378_v10, %s8535_s27  ;;  %v8761_v41 = vpack.i.bf16 %v8754_v37, %v1032_v39 }
  0xa2   :  { %v163_v17 = vpop.permute.xlu1 %162  ;;  %v141_v16 = vpop.permute.xlu0 %140 }
  0xa3   :  { %v145_v18 = vsel %vm110_vm1, %v139_v11, %v141_v16  ;;  %v8805_v8 = vld [vmem:[#allocation3 + $0x20] sm:$0xff]  ;;  %vm5049_vm1 = vcmask 990208  }
  0xa4   :  { %447 = vrot.lane.b32.xlu1 %v440_v3, %s8536_s28  ;;  %153 = vst [vmem:[#allocation3 + $0x38] sm:$0xf0] %v145_v18  ;;  %445 = vrot.lane.b32.xlu0 %v372_v7, %s8536_s28  ;;  %v8813_v14 = vpack.i.bf16 %v8805_v8, %v1034_v13 }
  0xa6   :  { %v167_v12 = vpop.permute.xlu1 %166  ;;  %v165_v19 = vpop.permute.xlu0 %164 }
  0xa7   :  { %v173_v20 = vsel %vm172_vm2, %v163_v17, %v165_v19  ;;  %v174_v21 = vsel %vm172_vm2, %v165_v19, %v167_v12 }
  0xa8   :  { %510 = vrot.lane.b32.xlu1 %v372_v7, %s8537_s29  ;;  %181 = vst [vmem:[#allocation3 + $0x40] sm:$0xf] %v173_v20  ;;  %182 = vst [vmem:[#allocation3 + $0x48] sm:$0xf] %v174_v21  ;;  %508 = vrot.lane.b32.xlu0 %v378_v10, %s8537_s29 }
  0xaa   :  { %v8741_v24 = vpop.permute.xlu1 %7854  ;;  %v169_v26 = vpop.permute.xlu0 %168 }
  0xab   :  { %v7856_v25 = vunpack.i.l.bf16 %v8741_v24  ;;  %v175_v27 = vsel %vm172_vm2, %v167_v12, %v169_v26 }
  0xac   :  { %388 = vrot.lane.b32.xlu1 %v8526_v22, %s8535_s27  ;;  %183 = vst [vmem:[#allocation3 + $0x50] sm:$0xf] %v175_v27  ;;  %264 = vrot.lane.b32.xlu0 %v8527_v23, %s8533_s25 }
  0xad   :  { %v176_v29 = vsel %vm172_vm2, %v169_v26, %v7856_v25 }
  0xae   :  { %184 = vst [vmem:[#allocation3 + $0x58] sm:$0xf] %v176_v29  ;;  %v229_v30 = vpop.permute.xlu1 %228  ;;  %v227_v32 = vpop.permute.xlu0 %226 }
  0xaf   :  { %v236_v33 = vsel %vm234_vm3, %v227_v32, %v229_v30 }
  0xb0   :  { %512 = vrot.lane.b32.xlu1 %v8528_v28, %s8537_s29  ;;  %244 = vst [vmem:[#allocation3 + $0x48] sm:$0xf0] %v236_v33  ;;  %449 = vrot.lane.b32.xlu0 %v435_v31, %s8536_s28  ;;  %s8546_s29 = smov 122  }
  0xb2   :  { %v225_v34 = vpop.permute.xlu1 %224  ;;  %v8752_v36 = vpop.permute.xlu0 %230 }
  0xb3   :  { %v235_v35 = vsel %vm234_vm3, %v225_v34, %v227_v32  ;;  %v237_v38 = vsel %vm234_vm3, %v229_v30, %v8752_v36 }
  0xb4   :  { %243 = vst [vmem:[#allocation3 + $0x40] sm:$0xf0] %v235_v35  ;;  %571 = vrot.lane.b32.xlu1 %v440_v3, %s8538_s30  ;;  %245 = vst [vmem:[#allocation3 + $0x50] sm:$0xf0] %v237_v38  ;;  %569 = vrot.lane.b32.xlu0 %v372_v7, %s8538_s30 }
  0xb6   :  { %v291_v40 = vpop.permute.xlu1 %290  ;;  %v8763_v43 = vpop.permute.xlu0 %288 }
  0xb7   :  { %v298_v44 = vsel %vm296_vm4, %v8763_v43, %v291_v40  ;;  %v598_v45 = vld [vmem:[#allocation3 + $0x48] sm:$0xff] }
  0xb8   :  { %7864 = vrot.lane.b32.xlu1 %v8761_v41, %s8539_s5  ;;  %306 = vst [vmem:[#allocation3 + $0x88] sm:$0xf] %v298_v44  ;;  %573 = vrot.lane.b32.xlu0 %v559_v42, %s8538_s30  ;;  %v7293_v46 = vpack.c.bf16 %v598_v45, %v1032_v39 }
  0xba   :  { %v8770_v47 = vpop.permute.xlu1 %350  ;;  %7294 = vmatprep.subr.bf16.mxu0 %v7293_v46  ;;  %v8772_v48 = vpop.permute.xlu0 %292 }
  0xbb   :  { %v1039_v50 = vld [vmem:[#allocation3 + $0x40] sm:$0xff]  ;;  %v299_v51 = vsel %vm296_vm4, %v291_v40, %v8772_v48  ;;  %v8778_v54 = vld [vmem:[#allocation3 + $0x50] sm:$0xff] }
  0xbc   :  { %v8776_v52 = vpack.i.bf16 %v1039_v50, %v1031_v49  ;;  %v7295_v53 = vpack.c.bf16 %v1039_v50, %v1031_v49  ;;  %307 = vst [vmem:[#allocation3 + $0x90] sm:$0xf] %v299_v51  ;;  %v8781_v55 = vpack.i.bf16 %v8778_v54, %v598_v45  ;;  %v7303_v35 = vpack.c.bf16 %v8778_v54, %v8754_v37 }
  0xbe   :  { %v8783_v56 = vpop.permute.xlu1 %354  ;;  %7874 = vrot.lane.b32.xlu1 %v8776_v52, %s8539_s5  ;;  %7296 = vmatpush1.bf16.msra.mxu0 %v7295_v53  ;;  %v353_v57 = vpop.permute.xlu0 %352 }
  0xbf   :  { %7869 = vrot.lane.b32.xlu0 %v8781_v55, %s8539_s5  ;;  %v360_v58 = vsel %vm358_vm5, %v8770_v47, %v353_v57  ;;  %v361_v59 = vsel %vm358_vm5, %v353_v57, %v8783_v56 }
  0xc0   :  { %368 = vst [vmem:[#allocation3 + $0x88] sm:$0xf0] %v360_v58  ;;  %369 = vst [vmem:[#allocation3 + $0x90] sm:$0xf0] %v361_v59 }
  0xc2   :  { %v415_v60 = vpop.permute.xlu1 %414  ;;  %v413_v61 = vpop.permute.xlu0 %412 }
  0xc3   :  { %v422_v62 = vsel %vm420_vm6, %v413_v61, %v415_v60 }
  0xc4   :  { %430 = vst [vmem:[#allocation3 + $0xc8] sm:$0xf] %v422_v62 }
  0xc6   :  { %v475_v63 = vpop.permute.xlu1 %474  ;;  %v8794_v0 = vpop.permute.xlu0 %416 }
  0xc7   :  { %v423_v1 = vsel %vm420_vm6, %v415_v60, %v8794_v0  ;;  %v1048_v4 = vld [vmem:[#allocation3 + $0x88] sm:$0xff]  ;;  %v8798_v5 = vld [vmem:[#allocation3 + $0x90] sm:$0xff] }
  0xc8   :  { %431 = vst [vmem:[#allocation3 + $0xd0] sm:$0xf] %v423_v1  ;;  %v8801_v6 = vpack.i.bf16 %v8798_v5, %v1048_v4 }
  0xca   :  { %v8803_v7 = vpop.permute.xlu1 %478  ;;  %7879 = vrot.lane.b32.xlu0 %v8801_v6, %s8539_s5  ;;  %v477_v9 = vpop.permute.xlu0 %476 }
  0xcb   :  { %v484_v10 = vsel %vm482_vm7, %v475_v63, %v477_v9  ;;  %v485_v11 = vsel %vm482_vm7, %v477_v9, %v8803_v7 }
  0xcc   :  { %492 = vst [vmem:[#allocation3 + $0xc8] sm:$0xf0] %v484_v10  ;;  %493 = vst [vmem:[#allocation3 + $0xd0] sm:$0xf0] %v485_v11 }
  0xce   :  { %v8815_v15 = vpop.permute.xlu1 %195  ;;  %7889 = vrot.lane.b32.xlu0 %v8813_v14, %s8539_s5  ;;  %v194_v3 = vpop.permute.xlu0 %193 }
  0xcf   :  { %v203_v17 = vsel %vm172_vm2, %v194_v3, %v8815_v15 }
  0xd0   :  { %211 = vst [vmem:[#allocation3 + $0x60] sm:$0xf] %v203_v17 }
  0xd2   :  { %v257_v16 = vpop.permute.xlu1 %256  ;;  %v233_v18 = vpop.permute.xlu0 %232 }
  0xd3   :  { %v238_v12 = vsel %vm234_vm3, %v8752_v36, %v233_v18  ;;  %v1056_v19 = vld [vmem:[#allocation3 + $0xc8] sm:$0xff]  ;;  %v8823_v20 = vld [vmem:[#allocation3 + $0xd0] sm:$0xff] }
  0xd4   :  { %246 = vst [vmem:[#allocation3 + $0x58] sm:$0xf0] %v238_v12  ;;  %v8826_v21 = vpack.i.bf16 %v8823_v20, %v1056_v19  ;;  %v7297_v22 = vpack.c.bf16 %v1056_v19, %v1048_v4 }
  0xd6   :  { %v287_v23 = vpop.permute.xlu1 %286  ;;  %7884 = vrot.lane.b32.xlu1 %v8826_v21, %s8539_s5  ;;  %7298 = vmatprep.subr.bf16.mxu0 %v7297_v22  ;;  %v8832_v26 = vpop.permute.xlu0 %258  ;;  %v7307_v22 = vpack.c.bf16 %v8823_v20, %v8798_v5 }
  0xd7   :  { %v297_v25 = vsel %vm296_vm4, %v287_v23, %v8763_v43  ;;  %v266_v27 = vsel %vm234_vm3, %v257_v16, %v8832_v26 }
  0xd8   :  { %305 = vst [vmem:[#allocation3 + $0x80] sm:$0xf] %v297_v25  ;;  %274 = vst [vmem:[#allocation3 + $0x60] sm:$0xf0] %v266_v27 }
  0xda   :  { %v411_v28 = vpop.permute.xlu1 %410  ;;  %v349_v30 = vpop.permute.xlu0 %348 }
  0xdb   :  { %v421_v29 = vsel %vm420_vm6, %v411_v28, %v413_v61  ;;  %v359_v31 = vsel %vm358_vm5, %v349_v30, %v8770_v47  ;;  %v600_v32 = vld [vmem:[#allocation3 + $0x58] sm:$0xff]  ;;  %v7857_v30 = vunpack.i.h.bf16 %v8741_v24 }
  0xdc   :  { %429 = vst [vmem:[#allocation3 + $0xc0] sm:$0xf] %v421_v29  ;;  %367 = vst [vmem:[#allocation3 + $0x80] sm:$0xf0] %v359_v31  ;;  %v7301_v33 = vpack.c.bf16 %v600_v32, %v1034_v13 }
  0xde   :  { %v8839_v34 = vpop.permute.xlu1 %7859  ;;  %7302 = vmatprep.subr.bf16.mxu1 %v7301_v33  ;;  %v473_v38 = vpop.permute.xlu0 %472 }
  0xdf   :  { %v7861_v36 = vunpack.i.l.bf16 %v8839_v34  ;;  %v483_v39 = vsel %vm482_vm7, %v473_v38, %v475_v63  ;;  %7304 = vmatpush1.bf16.msra.mxu1 %v7303_v35  ;;  %v8845_v40 = vld [vmem:[#allocation3 + $0x60] sm:$0xff]  ;;  %v1037_v38 = vld [vmem:[#allocation3 + $0x30] sm:$0xff] }
  0xe0   :  { %491 = vst [vmem:[#allocation3 + $0xc0] sm:$0xf0] %v483_v39  ;;  %v8850_v43 = vpack.i.bf16 %v8845_v40, %v600_v32 }
  0xe1   :  { %v300_v42 = vsel %vm296_vm4, %v8772_v48, %v7861_v36 }
  0xe2   :  { %308 = vst [vmem:[#allocation3 + $0x98] sm:$0xf] %v300_v42  ;;  %v8852_v44 = vpop.permute.xlu1 %319  ;;  %7894 = vrot.lane.b32.xlu1 %v8850_v43, %s8539_s5  ;;  %v318_v37 = vpop.permute.xlu0 %317 }
  0xe3   :  { %v327_v45 = vsel %vm296_vm4, %v318_v37, %v8852_v44  ;;  %v1047_v49 = vld [vmem:[#allocation3 + $0x80] sm:$0xff]  ;;  %v8915_v37 = vld [vmem:[%s11057_s1] sm:$0xff] }
  0xe4   :  { %335 = vst [vmem:[#allocation3 + $0xa0] sm:$0xf] %v327_v45 }
  0xe6   :  { %v381_v46 = vpop.permute.xlu1 %380  ;;  %v357_v47 = vpop.permute.xlu0 %356 }
  0xe7   :  { %v362_v48 = vsel %vm358_vm5, %v8783_v56, %v357_v47  ;;  %v1055_v50 = vld [vmem:[#allocation3 + $0xc0] sm:$0xff] }
  0xe8   :  { %370 = vst [vmem:[#allocation3 + $0x98] sm:$0xf0] %v362_v48  ;;  %v8860_v51 = vpack.i.bf16 %v1055_v50, %v1047_v49  ;;  %v7299_v53 = vpack.c.bf16 %v1055_v50, %v1047_v49 }
  0xea   :  { %v419_v54 = vpop.permute.xlu1 %418  ;;  %7899 = vrot.lane.b32.xlu0 %v8860_v51, %s8539_s5  ;;  %7300 = vmatpush1.bf16.msra.mxu0 %v7299_v53  ;;  %v8866_v58 = vpop.permute.xlu0 %382 }
  0xeb   :  { %v424_v57 = vsel %vm420_vm6, %v8794_v0, %v419_v54  ;;  %v390_v56 = vsel %vm358_vm5, %v381_v46, %v8866_v58  ;;  %v8933_v54 = vld [vmem:[%s11057_s1 + $0x8] sm:$0xff] }
  0xec   :  { %432 = vst [vmem:[#allocation3 + $0xd8] sm:$0xf] %v424_v57  ;;  %398 = vst [vmem:[#allocation3 + $0xa0] sm:$0xf0] %v390_v56 }
  0xee   :  { %v8870_v59 = vpop.permute.xlu1 %443  ;;  %v442_v60 = vpop.permute.xlu0 %441 }
  0xef   :  { %v451_v61 = vsel %vm420_vm6, %v442_v60, %v8870_v59  ;;  %v1050_v1 = vld [vmem:[#allocation3 + $0x98] sm:$0xff]  ;;  %v7862_v60 = vunpack.i.h.bf16 %v8839_v34 }
  0xf0   :  { %459 = vst [vmem:[#allocation3 + $0xe0] sm:$0xf] %v451_v61  ;;  %v7311_v61 = vpack.c.bf16 %v8845_v40, %v8805_v8 }
  0xf2   :  { %v505_v62 = vpop.permute.xlu1 %504  ;;  %v481_v63 = vpop.permute.xlu0 %480 }
  0xf3   :  { %v486_v0 = vsel %vm482_vm7, %v8803_v7, %v481_v63  ;;  %v8876_v4 = vld [vmem:[#allocation3 + $0xa0] sm:$0xff] }
  0xf4   :  { %494 = vst [vmem:[#allocation3 + $0xd8] sm:$0xf0] %v486_v0  ;;  %v8879_v9 = vpack.i.bf16 %v8876_v4, %v1050_v1 }
  0xf6   :  { %v537_v10 = vpop.permute.xlu1 %536  ;;  %7904 = vrot.lane.b32.xlu1 %v8879_v9, %s8539_s5  ;;  %v8883_v11 = vpop.permute.xlu0 %506 }
  0xf7   :  { %v514_v13 = vsel %vm482_vm7, %v505_v62, %v8883_v11 }
  0xf8   :  { %522 = vst [vmem:[#allocation3 + $0xe0] sm:$0xf0] %v514_v13 }
  0xfa   :  { %v541_v3 = vpop.permute.xlu1 %540  ;;  %v539_v7 = vpop.permute.xlu0 %538 }
  0xfb   :  { %v546_v17 = vsel %vm544_vm8, %v537_v10, %v539_v7  ;;  %v547_v16 = vsel %vm544_vm8, %v539_v7, %v541_v3  ;;  %v614_v18 = vld [vmem:[#allocation3 + $0xd8] sm:$0xff] }
  0xfc   :  { %554 = vst [vmem:[#allocation3 + $0x108] sm:$0xf] %v546_v17  ;;  %555 = vst [vmem:[#allocation3 + $0x110] sm:$0xf] %v547_v16  ;;  %v7305_v12 = vpack.c.bf16 %v614_v18, %v1050_v1  ;;  %v8540_v16 = vmov 0.0|0.0  }
  0xfe   :  { %v198_v19 = vpop.permute.xlu1 %197  ;;  %7306 = vmatprep.subr.bf16.mxu1 %v7305_v12  ;;  %v535_v25 = vpop.permute.xlu0 %534 }
  0xff   :  { %v204_v23 = vsel %vm172_vm2, %v8815_v15, %v198_v19  ;;  %v545_v27 = vsel %vm544_vm8, %v535_v25, %v537_v10  ;;  %7308 = vmatpush1.bf16.msra.mxu1 %v7307_v22  ;;  %v8894_v28 = vld [vmem:[#allocation3 + $0xe0] sm:$0xff] }
 0x100   :  { %212 = vst [vmem:[#allocation3 + $0x68] sm:$0xf] %v204_v23  ;;  %553 = vst [vmem:[#allocation3 + $0x100] sm:$0xf] %v545_v27  ;;  %v8897_v29 = vpack.i.bf16 %v8894_v28, %v614_v18 }
 0x102   :  { %v261_v31 = vpop.permute.xlu1 %260  ;;  %7909 = vrot.lane.b32.xlu0 %v8897_v29, %s8539_s5  ;;  %v200_v15 = vpop.permute.xlu0 %199 }
 0x103   :  { %v267_v5 = vsel %vm234_vm3, %v8832_v26, %v261_v31  ;;  %v205_v20 = vsel %vm172_vm2, %v198_v19, %v200_v15  ;;  %v206_v32 = vsel %vm172_vm2, %v200_v15, %v7857_v30  ;;  %v1064_v33 = vld [vmem:[#allocation3 + $0x108] sm:$0xf]  ;;  %v1065_v36 = vld [vmem:[#allocation3 + $0x110] sm:$0xf]  ;;  %vm5692_vm2 = vcmask 982016  }
 0x104   :  { %275 = vst [vmem:[#allocation3 + $0x68] sm:$0xf0] %v267_v5  ;;  %v619_v35 = vld [vmem:[#allocation3 + $0x108] sm:$0xf]  ;;  %213 = vst [vmem:[#allocation3 + $0x70] sm:$0xf] %v205_v20  ;;  %1177 = vrot.lane.b32.xlu1 %v1064_v33, %s8539_s5 }
 0x105   :  { %214 = vst [vmem:[#allocation3 + $0x78] sm:$0xf] %v206_v32  ;;  %6672 = vmatprep.subr.msk.mxu0 %vm634_vm9, %v619_v35  ;;  %v1036_v26 = vld [vmem:[#allocation3 + $0x28] sm:$0xff]  ;;  %v620_v8 = vld [vmem:[#allocation3 + $0x110] sm:$0xf] }
 0x106   :  { %v543_v24 = vpop.permute.xlu1 %542  ;;  %1179 = vrot.lane.b32.xlu0 %v1065_v36, %s8539_s5  ;;  %v8910_v42 = vpop.permute.xlu0 %262  ;;  %v8921_v48 = vpack.i.bf16 %v1037_v38, %v1036_v26 }
 0x107   :  { %v548_v39 = vsel %vm544_vm8, %v541_v3, %v543_v24  ;;  %v268_v45 = vsel %vm234_vm3, %v261_v31, %v8910_v42  ;;  %v1063_v46 = vld [vmem:[#allocation3 + $0x100] sm:$0xf] }
 0x108   :  { %556 = vst [vmem:[#allocation3 + $0x118] sm:$0xf] %v548_v39  ;;  %v618_v47 = vld [vmem:[#allocation3 + $0x100] sm:$0xf]  ;;  %276 = vst [vmem:[#allocation3 + $0x70] sm:$0xf0] %v268_v45  ;;  %1175 = vrot.lane.b32.xlu1 %v1063_v46, %s8539_s5 }
 0x109   :  { %6673 = vmatpush1.msk.msra.mxu0 %vm634_vm9, %v618_v47 }
 0x10a   :  { %v8923_v49 = vpop.permute.xlu1 %567  ;;  %6674 = vmatmul.mubr.msk.f32.vlgmr.msra.gmra.mrb[0].mxu0 %vm544_vm8, %v8915_v37  ;;  %7914 = vrot.lane.b32.xlu0 %v8921_v48, %s8539_s5  ;;  %v566_v50 = vpop.permute.xlu0 %565 }
 0x10b   :  { %v602_v53 = vld [vmem:[#allocation3 + $0x68] sm:$0xff]  ;;  %726 = vmatprep.mubr.f32.mxu0 %v8529_v2  ;;  %v575_v57 = vsel %vm544_vm8, %v566_v50, %v8923_v49 }
 0x10c   :  { %v7309_v56 = vpack.c.bf16 %v602_v53, %v1036_v26  ;;  %583 = vst [vmem:[#allocation3 + $0x120] sm:$0xf] %v575_v57 }
 0x10e   :  { %v324_v62 = vpop.permute.xlu1 %323  ;;  %7310 = vmatprep.subr.bf16.mxu0 %v7309_v56  ;;  %6675 = vmatmul.mubr.msk.f32.gmra.mrb[2].mxu0 %vm544_vm8, %v8933_v54  ;;  %v322_v0 = vpop.permute.xlu0 %321  ;;  %v7315_v56 = vpack.c.bf16 %v8894_v28, %v8876_v4 }
 0x10f   :  { %v330_v63 = vsel %vm296_vm4, %v324_v62, %v7862_v60  ;;  %7312 = vmatpush1.bf16.msra.mxu0 %v7311_v61  ;;  %v621_v1 = vld [vmem:[#allocation3 + $0x118] sm:$0xf]  ;;  %732 = vmatprep.mubr.f32.mxu0 %v8529_v2  ;;  %v328_v34 = vsel %vm296_vm4, %v8852_v44, %v322_v0  ;;  %v329_v13 = vsel %vm296_vm4, %v322_v0, %v324_v62  ;;  %v8949_v40 = vld [vmem:[#allocation3 + $0x70] sm:$0xff]  ;;  %v8959_v44 = vld [vmem:[%s11057_s1 + $0x10] sm:$0xff] }
 0x110   :  { %v1066_v10 = vld [vmem:[#allocation3 + $0x118] sm:$0xf]  ;;  %338 = vst [vmem:[#allocation3 + $0xb8] sm:$0xf] %v330_v63  ;;  %6677 = vmatprep.subr.msk.mxu1 %vm634_vm9, %v621_v1  ;;  %336 = vst [vmem:[#allocation3 + $0xa8] sm:$0xf] %v328_v34  ;;  %v8953_v3 = vpack.i.bf16 %v8949_v40, %v602_v53  ;;  %v7318_v7 = vpack.c.bf16 %v8949_v40, %v1037_v38 }
 0x111   :  { %1181 = vrot.lane.b32.xlu0 %v1066_v10, %s8539_s5  ;;  %337 = vst [vmem:[#allocation3 + $0xb0] sm:$0xf] %v329_v13  ;;  %6678 = vmatpush1.msk.msra.mxu1 %vm634_vm9, %v620_v8  ;;  %v1038_v62 = vld [vmem:[#allocation3 + $0x38] sm:$0xff] }
 0x112   :  { %v387_v17 = vpop.permute.xlu1 %386  ;;  %7317 = vmatprep.subr.bf16.mxu1 %v8540_v16  ;;  %6679 = vmatmul.mubr.msk.f32.vlgmr.msra.gmra.mrb[0].mxu1 %vm544_vm8, %v8915_v37  ;;  %v385_v18 = vpop.permute.xlu0 %384 }
 0x113   :  { %7919 = vrot.lane.b32.xlu1 %v8953_v3, %s8539_s5  ;;  %7319 = vmatpush3.bf16.msra.mxu1 %v7318_v7  ;;  %v391_v12 = vsel %vm358_vm5, %v8866_v58, %v385_v18  ;;  %v392_v19 = vsel %vm358_vm5, %v385_v18, %v387_v17  ;;  %v1067_v23 = vld [vmem:[#allocation3 + $0x120] sm:$0xf] }
 0x114   :  { %7320 = vmatprep.subr.bf16.mxu1 %v8540_v16  ;;  %6676 = vmatmul.mubr.msk.f32.gmra.mrb[4].mxu0 %vm544_vm8, %v8959_v44  ;;  %399 = vst [vmem:[#allocation3 + $0xa8] sm:$0xf0] %v391_v12  ;;  %400 = vst [vmem:[#allocation3 + $0xb0] sm:$0xf0] %v392_v19 }
 0x115   :  { %886 = vmatprep.mubr.f32.mxu0 %v8529_v2  ;;  %809 = vmatprep.mubr.f32.mxu1 %v8529_v2 }
 0x116   :  { %v448_v22 = vpop.permute.xlu1 %447  ;;  %6680 = vmatmul.mubr.msk.f32.gmra.mrb[2].mxu1 %vm544_vm8, %v8933_v54  ;;  %v446_v58 = vpop.permute.xlu0 %445 }
 0x117   :  { %1183 = vrot.lane.b32.xlu1 %v1067_v23, %s8539_s5  ;;  %815 = vmatprep.mubr.f32.mxu1 %v8529_v2  ;;  %v452_v25 = vsel %vm420_vm6, %v8870_v59, %v446_v58  ;;  %v453_v27 = vsel %vm420_vm6, %v446_v58, %v448_v22  ;;  %v622_v58 = vld [vmem:[#allocation3 + $0x120] sm:$0xf] }
 0x118   :  { %460 = vst [vmem:[#allocation3 + $0xe8] sm:$0xf] %v452_v25  ;;  %461 = vst [vmem:[#allocation3 + $0xf0] sm:$0xf] %v453_v27 }
 0x11a   :  { %v511_v30 = vpop.permute.xlu1 %510  ;;  %6681 = vmatmul.mubr.msk.f32.gmra.mrb[4].mxu1 %vm544_vm8, %v8959_v44  ;;  %v509_v31 = vpop.permute.xlu0 %508 }
 0x11b   :  { %7091 = vmatprep.mubr.msk.f32.mxu1 %vm8541_vm10, %v8529_v2  ;;  %v515_v5 = vsel %vm482_vm7, %v8883_v11, %v509_v31  ;;  %v516_v15 = vsel %vm482_vm7, %v509_v31, %v511_v30  ;;  %v1052_v20 = vld [vmem:[#allocation3 + $0xa8] sm:$0xff]  ;;  %v1053_v59 = vld [vmem:[#allocation3 + $0xb0] sm:$0xff] }
 0x11c   :  { %523 = vst [vmem:[#allocation3 + $0xe8] sm:$0xf0] %v515_v5  ;;  %524 = vst [vmem:[#allocation3 + $0xf0] sm:$0xf0] %v516_v15  ;;  %v8988_v32 = vpack.i.bf16 %v1053_v59, %v1052_v20 }
 0x11e   :  { %v389_v33 = vpop.permute.xlu1 %388  ;;  %7924 = vrot.lane.b32.xlu0 %v8988_v32, %s8539_s5  ;;  %v265_v24 = vpop.permute.xlu0 %264 }
 0x11f   :  { %v393_v35 = vsel %vm358_vm5, %v387_v17, %v389_v33  ;;  %v269_v36 = vsel %vm234_vm3, %v8910_v42, %v265_v24 }
 0x120   :  { %401 = vst [vmem:[#allocation3 + $0xb8] sm:$0xf0] %v393_v35  ;;  %277 = vst [vmem:[#allocation3 + $0x78] sm:$0xf0] %v269_v36 }
 0x122   :  { %v513_v11 = vpop.permute.xlu1 %512  ;;  %v450_v38 = vpop.permute.xlu0 %449 }
 0x123   :  { %v517_v26 = vsel %vm482_vm7, %v511_v30, %v513_v11  ;;  %v454_v39 = vsel %vm420_vm6, %v448_v22, %v450_v38  ;;  %v617_v45 = vld [vmem:[#allocation3 + $0xf0] sm:$0xff]  ;;  %v1060_v46 = vld [vmem:[#allocation3 + $0xe8] sm:$0xff] }
 0x124   :  { %525 = vst [vmem:[#allocation3 + $0xf8] sm:$0xf0] %v517_v26  ;;  %462 = vst [vmem:[#allocation3 + $0xf8] sm:$0xf] %v454_v39  ;;  %v7321_v47 = vpack.c.bf16 %v617_v45, %v1053_v59  ;;  %v8997_v50 = vpack.i.bf16 %v617_v45, %v1060_v46  ;;  %v7313_v53 = vpack.c.bf16 %v1060_v46, %v1052_v20  ;;  %v1707_v26 = vld [vmem:[#allocation3 + $0x108] sm:$0xf] }
 0x125   :  { %v1708_v38 = vld [vmem:[#allocation3 + $0x110] sm:$0xf] }
 0x126   :  { %v572_v57 = vpop.permute.xlu1 %571  ;;  %7322 = vmatpush3.bf16.msra.mxu1 %v7321_v47  ;;  %7929 = vrot.lane.b32.xlu1 %v8997_v50, %s8539_s5  ;;  %v570_v42 = vpop.permute.xlu0 %569  ;;  %v1706_v47 = vld [vmem:[#allocation3 + $0x100] sm:$0xf] }
 0x127   :  { %7314 = vmatprep.subr.bf16.mxu0 %v7313_v53  ;;  %v576_v60 = vsel %vm544_vm8, %v8923_v49, %v570_v42  ;;  %v577_v61 = vsel %vm544_vm8, %v570_v42, %v572_v57  ;;  %v1046_v63 = vld [vmem:[#allocation3 + $0x78] sm:$0xff]  ;;  %7089 = vmatprep.subr.mxu1 %v8529_v2 }
 0x128   :  { %584 = vst [vmem:[#allocation3 + $0x128] sm:$0xf] %v576_v60  ;;  %585 = vst [vmem:[#allocation3 + $0x130] sm:$0xf] %v577_v61  ;;  %7316 = vmatpush1.bf16.msra.mxu0 %v7315_v56  ;;  %v9007_v0 = vpack.i.bf16 %v1046_v63, %v1038_v62  ;;  %v1054_v49 = vld [vmem:[#allocation3 + $0xb8] sm:$0xff] }
 0x129   :  { %v1709_v56 = vld [vmem:[#allocation3 + $0x118] sm:$0xf]  ;;  %v1710_v63 = vld [vmem:[#allocation3 + $0x120] sm:$0xf] }
 0x12a   :  { %7934 = vrot.lane.b32.xlu0 %v9007_v0, %s8539_s5  ;;  %v574_v1 = vpop.permute.xlu0 %573  ;;  %v9011_v4 = vpop.permute.xlu1 %7864 }
 0x12b   :  { %v578_v28 = vsel %vm544_vm8, %v572_v57, %v574_v1  ;;  %v1062_v10 = vld [vmem:[#allocation3 + $0xf8] sm:$0xff]  ;;  %v7867_v13 = vunpack.i.h.bf16 %v9011_v4  ;;  %v7866_v8 = vunpack.i.l.bf16 %v9011_v4 }
 0x12c   :  { %586 = vst [vmem:[#allocation3 + $0x138] sm:$0xf] %v578_v28  ;;  %v9014_v34 = vpack.i.bf16 %v1062_v10, %v1054_v49 }
 0x12d   :  { %v1193_v15 = vsel %vm1191_vm11, %v7866_v8, %v7867_v13 }
 0x12e   :  { %7939 = vrot.lane.b32.xlu1 %v9014_v34, %s8539_s5 }
 0x12f   :  { %v1068_v17 = vld [vmem:[#allocation3 + $0x128] sm:$0xf]  ;;  %v624_v12 = vld [vmem:[#allocation3 + $0x130] sm:$0xf] }
 0x130   :  { %v7875_v7 = vpop.permute.xlu1 %7874  ;;  %v623_v18 = vld [vmem:[#allocation3 + $0x128] sm:$0xf]  ;;  %1185 = vrot.lane.b32.xlu0 %v1068_v17, %s8539_s5  ;;  %v1069_v25 = vld [vmem:[#allocation3 + $0x130] sm:$0xf]  ;;  %7090 = vmatpush3.msk.msra.mxu1 %vm634_vm9, %v624_v12 }
 0x131   :  { %v7877_v19 = vunpack.i.h.bf16 %v7875_v7  ;;  %v7876_v22 = vunpack.i.l.bf16 %v7875_v7  ;;  %6682 = vmatprep.subr.msk.mxu0 %vm634_vm9, %v623_v18  ;;  %v9022_v23 = vpop.permute.xlu0 %7869  ;;  %7092 = vmatmul.mubr.msk.f32.vlgmr.msra.gmra.mrb[6].mxu1 %vm544_vm8, %v8915_v37 }
 0x132   :  { %v7872_v27 = vunpack.i.h.bf16 %v9022_v23  ;;  %v7871_v30 = vunpack.i.l.bf16 %v9022_v23  ;;  %6683 = vmatpush1.msk.msra.mxu0 %vm634_vm9, %v622_v58  ;;  %1187 = vrot.lane.b32.xlu1 %v1069_v25, %s8539_s5  ;;  %v1712_v23 = vld [vmem:[#allocation3 + $0x130] sm:$0xf] }
 0x133   :  { %v1192_v31 = vsel %vm1191_vm11, %v7876_v22, %v7866_v8  ;;  %6684 = vmatmul.mubr.msk.f32.vlgmr.msra.gmra.mrb[6].mxu0 %vm544_vm8, %v8915_v37  ;;  %7094 = vmatprep.mubr.msk.f32.mxu1 %vm8541_vm10, %v8529_v2  ;;  %v1070_v37 = vld [vmem:[#allocation3 + $0x138] sm:$0xf] }
 0x134   :  { %v1199_v5 = vsel %vm1191_vm11, %v7877_v19, %v7871_v30  ;;  %v1200_v20 = vsel %vm1191_vm11, %v7871_v30, %v7872_v27  ;;  %892 = vmatprep.mubr.f32.mxu0 %v8529_v2  ;;  %7944 = vrot.lane.b32.xlu0 %v8761_v41, %s8542_s12  ;;  %v1711_v19 = vld [vmem:[#allocation3 + $0x128] sm:$0xf]  ;;  %v1713_v58 = vld [vmem:[#allocation3 + $0x138] sm:$0xf] }
 0x135   :  { %v7323_v59 = vpack.c.bf16 %v1200_v20, %v1193_v15  ;;  %v7325_v33 = vpack.c.bf16 %v1199_v5, %v1192_v31  ;;  %7095 = vmatmul.mubr.msk.f32.gmra.mrb[8].mxu1 %vm544_vm8, %v8933_v54  ;;  %v2350_v15 = vld [vmem:[#allocation3 + $0x108] sm:$0xf] }
 0x136   :  { %7949 = vrot.lane.b32.xlu1 %v8781_v55, %s8542_s12  ;;  %7097 = vmatprep.mubr.msk.f32.mxu1 %vm8541_vm10, %v8529_v2 }
 0x137   :  { %7324 = vmatprep.subr.bf16.mxu0 %v7323_v59  ;;  %6685 = vmatmul.mubr.msk.f32.gmra.mrb[8].mxu0 %vm544_vm8, %v8933_v54 }
 0x138   :  { %7326 = vmatpush1.bf16.msra.mxu0 %v7325_v33  ;;  %7954 = vrot.lane.b32.xlu0 %v8776_v52, %s8542_s12 }
 0x139   :  { %898 = vmatprep.mubr.f32.mxu0 %v8529_v2  ;;  %7098 = vmatmul.mubr.msk.f32.gmra.mrb[10].mxu1 %vm544_vm8, %v8959_v44 }
 0x13a   :  { %1189 = vrot.lane.b32.xlu1 %v1070_v37, %s8539_s5  ;;  %1425 = vmatprep.mubr.f32.mxu1 %v8529_v2  ;;  %v2351_v37 = vld [vmem:[#allocation3 + $0x110] sm:$0xf] }
 0x13b   :  { %6686 = vmatmul.mubr.msk.f32.gmra.mrb[10].mxu0 %vm544_vm8, %v8959_v44 }
 0x13c   :  { %7959 = vrot.lane.b32.xlu0 %v8801_v6, %s8542_s12  ;;  %1342 = vmatprep.mubr.f32.mxu0 %v8529_v2  ;;  %v9072_v54 = vpop.permute.xlu0 %7879 }
 0x13d   :  { %v7882_v44 = vunpack.i.h.bf16 %v9072_v54  ;;  %v7881_v35 = vunpack.i.l.bf16 %v9072_v54  ;;  %v9181_v54 = vld [vmem:[%s11057_s1 + $0x18] sm:$0xff] }
 0x13e   :  { %7964 = vrot.lane.b32.xlu1 %v8826_v21, %s8542_s12 }
 0x13f   :  { %v1207_v39 = vsel %vm1191_vm11, %v7881_v35, %v7882_v44 }
 0x140   :  { %7969 = vrot.lane.b32.xlu0 %v8813_v14, %s8542_s12  ;;  %v9095_v53 = vpop.permute.xlu0 %7889 }
 0x141   :  { %v7892_v57 = vunpack.i.h.bf16 %v9095_v53  ;;  %v7891_v42 = vunpack.i.l.bf16 %v9095_v53 }
 0x142   :  { %7974 = vrot.lane.b32.xlu1 %v8850_v43, %s8542_s12 }
 0x143   :  { %v1194_v1 = vsel %vm1191_vm11, %v7867_v13, %v7891_v42  ;;  %v1195_v49 = vsel %vm1191_vm11, %v7891_v42, %v7892_v57 }
 0x144   :  { %7979 = vrot.lane.b32.xlu0 %v8860_v51, %s8542_s12 }
 0x146   :  { %7984 = vrot.lane.b32.xlu1 %v8879_v9, %s8542_s12 }
 0x148   :  { %v9080_v24 = vpop.permute.xlu1 %7884  ;;  %7989 = vrot.lane.b32.xlu0 %v8897_v29, %s8542_s12 }
 0x149   :  { %v7887_v36 = vunpack.i.h.bf16 %v9080_v24  ;;  %v7886_v11 = vunpack.i.l.bf16 %v9080_v24 }
 0x14a   :  { %1820 = vrot.lane.b32.xlu1 %v1707_v26, %s8542_s12  ;;  %v9208_v26 = vld [vmem:[%s11057_s1 + $0x28] sm:$0xff] }
 0x14b   :  { %v1214_v45 = vsel %vm1191_vm11, %v7886_v11, %v7887_v36 }
 0x14c   :  { %1822 = vrot.lane.b32.xlu0 %v1708_v38, %s8542_s12  ;;  %v7327_v46 = vpack.c.bf16 %v1214_v45, %v1207_v39  ;;  %v2353_v39 = vld [vmem:[#allocation3 + $0x120] sm:$0xf] }
 0x14e   :  { %1818 = vrot.lane.b32.xlu1 %v1706_v47, %s8542_s12  ;;  %7328 = vmatprep.subr.bf16.mxu0 %v7327_v46 }
 0x150   :  { %7994 = vrot.lane.b32.xlu0 %v8921_v48, %s8542_s12 }
 0x152   :  { %7999 = vrot.lane.b32.xlu1 %v8953_v3, %s8542_s12 }
 0x154   :  { %v9103_v60 = vpop.permute.xlu1 %7894  ;;  %1824 = vrot.lane.b32.xlu0 %v1709_v56, %s8542_s12 }
 0x155   :  { %v7897_v61 = vunpack.i.h.bf16 %v9103_v60  ;;  %v7896_v62 = vunpack.i.l.bf16 %v9103_v60 }
 0x156   :  { %1826 = vrot.lane.b32.xlu1 %v1710_v63, %s8542_s12  ;;  %v2354_v63 = vld [vmem:[#allocation3 + $0x128] sm:$0xf] }
 0x157   :  { %v1201_v28 = vsel %vm1191_vm11, %v7872_v27, %v7896_v62  ;;  %v1202_v10 = vsel %vm1191_vm11, %v7896_v62, %v7897_v61 }
 0x158   :  { %8004 = vrot.lane.b32.xlu0 %v8988_v32, %s8542_s12  ;;  %v7331_v8 = vpack.c.bf16 %v1202_v10, %v1195_v49  ;;  %v7333_v7 = vpack.c.bf16 %v1201_v28, %v1194_v1  ;;  %v2962_v1 = vld [vmem:[#allocation3 + $0x10] sm:$0xff]  ;;  %v2961_v49 = vld [vmem:[#allocation3 + $0x8] sm:$0xff] }
 0x159   :  { %v2355_v28 = vld [vmem:[#allocation3 + $0x130] sm:$0xf] }
 0x15a   :  { %8009 = vrot.lane.b32.xlu1 %v8997_v50, %s8542_s12  ;;  %7332 = vmatprep.subr.bf16.mxu1 %v7331_v8  ;;  %v2970_v10 = vld [vmem:[#allocation3 + $0x50] sm:$0xff]  ;;  %v9254_v8 = vpack.i.bf16 %v2962_v1, %v2961_v49 }
 0x15b   :  { %7334 = vmatpush1.bf16.msra.mxu1 %v7333_v7  ;;  %v2969_v7 = vld [vmem:[#allocation3 + $0x48] sm:$0xff] }
 0x15c   :  { %8014 = vrot.lane.b32.xlu0 %v9007_v0, %s8542_s12  ;;  %v7900_v4 = vpop.permute.xlu0 %7899 }
 0x15d   :  { %v7902_v13 = vunpack.i.h.bf16 %v7900_v4  ;;  %v7901_v17 = vunpack.i.l.bf16 %v7900_v4  ;;  %v2968_v4 = vld [vmem:[#allocation3 + $0x40] sm:$0xff] }
 0x15e   :  { %8019 = vrot.lane.b32.xlu1 %v9014_v34, %s8542_s12 }
 0x15f   :  { %v1213_v18 = vsel %vm1191_vm11, %v7902_v13, %v7886_v11  ;;  %v1206_v12 = vsel %vm1191_vm11, %v7901_v17, %v7881_v35  ;;  %v2352_v11 = vld [vmem:[#allocation3 + $0x118] sm:$0xf]  ;;  %v9259_v17 = vpack.i.bf16 %v2970_v10, %v2969_v7 }
 0x160   :  { %1828 = vrot.lane.b32.xlu0 %v1711_v19, %s8542_s12  ;;  %v7329_v22 = vpack.c.bf16 %v1213_v18, %v1206_v12  ;;  %v2960_v18 = vld [vmem:[#allocation3] sm:$0xff]  ;;  %v2987_v7 = vld [vmem:[#allocation3 + $0xd8] sm:$0xff] }
 0x161   :  { %v9265_v12 = vpack.i.bf16 %v2968_v4, %v2960_v18 }
 0x162   :  { %1830 = vrot.lane.b32.xlu1 %v1712_v23, %s8542_s12  ;;  %7330 = vmatpush1.bf16.msra.mxu0 %v7329_v22  ;;  %v2977_v23 = vld [vmem:[#allocation3 + $0x88] sm:$0xff] }
 0x164   :  { %8024 = vrot.lane.b32.xlu0 %v8761_v41, %s8543_s13 }
 0x166   :  { %8029 = vrot.lane.b32.xlu1 %v8781_v55, %s8543_s13 }
 0x168   :  { %8034 = vrot.lane.b32.xlu0 %v8776_v52, %s8543_s13  ;;  %v9144_v25 = vpop.permute.xlu1 %7904 }
 0x169   :  { %v7907_v41 = vunpack.i.h.bf16 %v9144_v25  ;;  %v7906_v52 = vunpack.i.l.bf16 %v9144_v25 }
 0x16a   :  { %1832 = vrot.lane.b32.xlu1 %v1713_v58, %s8542_s12  ;;  %v2978_v58 = vld [vmem:[#allocation3 + $0x90] sm:$0xff] }
 0x16c   :  { %8039 = vrot.lane.b32.xlu0 %v8801_v6, %s8543_s13 }
 0x16e   :  { %8044 = vrot.lane.b32.xlu1 %v8826_v21, %s8543_s13 }
 0x170   :  { %8049 = vrot.lane.b32.xlu0 %v8813_v14, %s8543_s13  ;;  %v1208_v14 = vsel %vm1191_vm11, %v7882_v44, %v7906_v52  ;;  %v9192_v44 = vld [vmem:[%s11057_s1 + $0x20] sm:$0xff] }
 0x172   :  { %8054 = vrot.lane.b32.xlu1 %v8850_v43, %s8543_s13 }
 0x174   :  { %8059 = vrot.lane.b32.xlu0 %v8860_v51, %s8543_s13  ;;  %v9154_v55 = vpop.permute.xlu0 %7909  ;;  %v1209_v51 = vsel %vm1191_vm11, %v7906_v52, %v7907_v41 }
 0x175   :  { %v7912_v6 = vunpack.i.h.bf16 %v9154_v55  ;;  %v7911_v21 = vunpack.i.l.bf16 %v9154_v55 }
 0x176   :  { %v1178_v27 = vpop.permute.xlu1 %1177  ;;  %8064 = vrot.lane.b32.xlu1 %v8879_v9, %s8543_s13 }
 0x177   :  { %v1215_v43 = vsel %vm1191_vm11, %v7887_v36, %v7911_v21  ;;  %v1216_v30 = vsel %vm1191_vm11, %v7911_v21, %v7912_v6 }
 0x178   :  { %8069 = vrot.lane.b32.xlu0 %v8897_v29, %s8543_s13  ;;  %v1180_v9 = vpop.permute.xlu0 %1179  ;;  %v7335_v31 = vpack.c.bf16 %v1216_v30, %v1209_v51  ;;  %v7337_v5 = vpack.c.bf16 %v1215_v43, %v1208_v14  ;;  %v2349_v29 = vld [vmem:[#allocation3 + $0x100] sm:$0xf]  ;;  %v2356_v14 = vld [vmem:[#allocation3 + $0x138] sm:$0xf]  ;;  %v2985_v43 = vld [vmem:[#allocation3 + $0xc8] sm:$0xff]  ;;  %v9272_v30 = vpack.i.bf16 %v2978_v58, %v2977_v23 }
 0x179   :  { %v1221_v20 = vsel %vm1191_vm11, %v1178_v27, %v1180_v9  ;;  %v2986_v51 = vld [vmem:[#allocation3 + $0xd0] sm:$0xff] }
 0x17a   :  { %v1176_v59 = vpop.permute.xlu1 %1175  ;;  %2463 = vrot.lane.b32.xlu1 %v2350_v15, %s8543_s13  ;;  %6694 = vmatprep.subr.msk.mxu0 %vm634_vm9, %v1221_v20  ;;  %v2964_v20 = vld [vmem:[#allocation3 + $0x20] sm:$0xff] }
 0x17b   :  { %v1220_v33 = vsel %vm1191_vm11, %v1176_v59, %v1178_v27  ;;  %7336 = vmatprep.subr.bf16.mxu1 %v7335_v31 }
 0x17c   :  { %7338 = vmatpush1.bf16.msra.mxu1 %v7337_v5  ;;  %2465 = vrot.lane.b32.xlu0 %v2351_v37, %s8543_s13  ;;  %v9194_v35 = vpop.permute.xlu0 %7914 }
 0x17d   :  { %6695 = vmatpush1.msk.msra.mxu0 %vm634_vm9, %v1220_v33  ;;  %v7917_v24 = vunpack.i.h.bf16 %v9194_v35  ;;  %v7916_v36 = vunpack.i.l.bf16 %v9194_v35  ;;  %v9284_v33 = vpack.i.bf16 %v2986_v51, %v2985_v43  ;;  %v2994_v43 = vld [vmem:[#allocation3 + $0x110] sm:$0xf] }
 0x17e   :  { %2461 = vrot.lane.b32.xlu1 %v2349_v29, %s8543_s13  ;;  %6696 = vmatmul.mubr.msk.f32.vlgmr.msra.gmra.mrb[0].mxu0 %vm544_vm8, %v9181_v54 }
 0x17f   :  { %1348 = vmatprep.mubr.f32.mxu0 %v8529_v2  ;;  %v1196_v45 = vsel %vm1191_vm11, %v7892_v57, %v7916_v36  ;;  %v1197_v42 = vsel %vm1191_vm11, %v7916_v36, %v7917_v24 }
 0x180   :  { %8074 = vrot.lane.b32.xlu0 %v8921_v48, %s8543_s13 }
 0x182   :  { %8079 = vrot.lane.b32.xlu1 %v8953_v3, %s8543_s13  ;;  %6697 = vmatmul.mubr.msk.f32.gmra.mrb[2].mxu0 %vm544_vm8, %v9192_v44 }
 0x183   :  { %1354 = vmatprep.mubr.f32.mxu0 %v8529_v2  ;;  %v1182_v46 = vpop.permute.xlu0 %1181 }
 0x184   :  { %2467 = vrot.lane.b32.xlu0 %v2352_v11, %s8543_s13  ;;  %v2972_v11 = vld [vmem:[#allocation3 + $0x60] sm:$0xff] }
 0x185   :  { %v9210_v38 = vpop.permute.xlu1 %7919 }
 0x186   :  { %v7922_v48 = vunpack.i.h.bf16 %v9210_v38  ;;  %v7921_v3 = vunpack.i.l.bf16 %v9210_v38  ;;  %2469 = vrot.lane.b32.xlu1 %v2353_v39, %s8543_s13  ;;  %6698 = vmatmul.mubr.msk.f32.gmra.mrb[4].mxu0 %vm544_vm8, %v9208_v26  ;;  %v2971_v39 = vld [vmem:[#allocation3 + $0x58] sm:$0xff]  ;;  %v2980_v38 = vld [vmem:[#allocation3 + $0xa0] sm:$0xff] }
 0x187   :  { %1508 = vmatprep.mubr.f32.mxu0 %v8529_v2 }
 0x188   :  { %v1203_v47 = vsel %vm1191_vm11, %v7897_v61, %v7921_v3  ;;  %v1204_v56 = vsel %vm1191_vm11, %v7921_v3, %v7922_v48  ;;  %8084 = vrot.lane.b32.xlu0 %v8988_v32, %s8543_s13  ;;  %v1222_v61 = vsel %vm1191_vm11, %v1180_v9, %v1182_v46 }
 0x189   :  { %v9231_v62 = vpop.permute.xlu1 %1183  ;;  %v7339_v53 = vpack.c.bf16 %v1204_v56, %v1197_v42  ;;  %v7341_v57 = vpack.c.bf16 %v1203_v47, %v1196_v45  ;;  %v2984_v45 = vld [vmem:[#allocation3 + $0xc0] sm:$0xff]  ;;  %v9298_v47 = vpack.i.bf16 %v2972_v11, %v2971_v39  ;;  %v9355_v39 = vld [vmem:[#allocation3 + $0x68] sm:$0xff] }
 0x18a   :  { %v1223_v60 = vsel %vm1191_vm11, %v1182_v46, %v9231_v62  ;;  %8089 = vrot.lane.b32.xlu1 %v8997_v50, %s8543_s13 }
 0x18b   :  { %6699 = vmatprep.subr.msk.mxu1 %vm634_vm9, %v1223_v60  ;;  %7340 = vmatprep.subr.bf16.mxu0 %v7339_v53 }
 0x18c   :  { %6700 = vmatpush1.msk.msra.mxu1 %vm634_vm9, %v1222_v61  ;;  %7342 = vmatpush1.bf16.msra.mxu0 %v7341_v57  ;;  %v2976_v57 = vld [vmem:[#allocation3 + $0x80] sm:$0xff]  ;;  %v2979_v61 = vld [vmem:[#allocation3 + $0x98] sm:$0xff] }
 0x18d   :  { %8094 = vrot.lane.b32.xlu0 %v9007_v0, %s8543_s13  ;;  %7347 = vmatprep.subr.bf16.mxu1 %v8540_v16 }
 0x18e   :  { %6701 = vmatmul.mubr.msk.f32.vlgmr.msra.gmra.mrb[0].mxu1 %vm544_vm8, %v9181_v54  ;;  %8099 = vrot.lane.b32.xlu1 %v9014_v34, %s8543_s13 }
 0x18f   :  { %1431 = vmatprep.mubr.f32.mxu1 %v8529_v2 }
 0x190   :  { %v7925_v13 = vpop.permute.xlu0 %7924 }
 0x191   :  { %2471 = vrot.lane.b32.xlu0 %v2354_v63, %s8543_s13  ;;  %v7927_v19 = vunpack.i.h.bf16 %v7925_v13  ;;  %v7926_v22 = vunpack.i.l.bf16 %v7925_v13  ;;  %v2988_v63 = vld [vmem:[#allocation3 + $0xe0] sm:$0xff] }
 0x192   :  { %6702 = vmatmul.mubr.msk.f32.gmra.mrb[2].mxu1 %vm544_vm8, %v9192_v44  ;;  %2473 = vrot.lane.b32.xlu1 %v2355_v28, %s8543_s13  ;;  %v9309_v28 = vpack.i.bf16 %v2980_v38, %v2979_v61  ;;  %v9319_v18 = vpack.i.bf16 %v2988_v63, %v2987_v7  ;;  %v2995_v38 = vld [vmem:[#allocation3 + $0x118] sm:$0xf] }
 0x193   :  { %1437 = vmatprep.mubr.f32.mxu1 %v8529_v2  ;;  %v1210_v9 = vsel %vm1191_vm11, %v7907_v41, %v7926_v22  ;;  %v1211_v5 = vsel %vm1191_vm11, %v7926_v22, %v7927_v19  ;;  %v2963_v41 = vld [vmem:[#allocation3 + $0x18] sm:$0xff] }
 0x194   :  { %v9288_v55 = vpack.i.bf16 %v2964_v20, %v2963_v41 }
 0x195   :  { %8104 = vrot.lane.b32.xlu0 %v9254_v8, %s8544_s20 }
 0x196   :  { %6703 = vmatmul.mubr.msk.f32.gmra.mrb[4].mxu1 %vm544_vm8, %v9208_v26  ;;  %8109 = vrot.lane.b32.xlu1 %v9259_v17, %s8544_s20 }
 0x197   :  { %7110 = vmatprep.mubr.msk.f32.mxu1 %vm8541_vm10, %v8529_v2 }
 0x198   :  { %v7930_v52 = vpop.permute.xlu1 %7929 }
 0x199   :  { %8114 = vrot.lane.b32.xlu0 %v9265_v12, %s8544_s20  ;;  %v7932_v21 = vunpack.i.h.bf16 %v7930_v52  ;;  %v7931_v27 = vunpack.i.l.bf16 %v7930_v52  ;;  %v2993_v52 = vld [vmem:[#allocation3 + $0x108] sm:$0xf] }
 0x19a   :  { %2475 = vrot.lane.b32.xlu1 %v2356_v14, %s8543_s13 }
 0x19b   :  { %v1217_v31 = vsel %vm1191_vm11, %v7912_v6, %v7931_v27  ;;  %v1218_v15 = vsel %vm1191_vm11, %v7931_v27, %v7932_v21 }
 0x19c   :  { %v7935_v59 = vpop.permute.xlu0 %7934  ;;  %v7343_v37 = vpack.c.bf16 %v1218_v15, %v1211_v5  ;;  %v7345_v29 = vpack.c.bf16 %v1217_v31, %v1210_v9  ;;  %v2965_v31 = vld [vmem:[#allocation3 + $0x28] sm:$0xff]  ;;  %v2966_v5 = vld [vmem:[#allocation3 + $0x30] sm:$0xff] }
 0x19d   :  { %8119 = vrot.lane.b32.xlu0 %v9272_v30, %s8544_s20  ;;  %v7937_v25 = vunpack.i.h.bf16 %v7935_v59  ;;  %v7936_v36 = vunpack.i.l.bf16 %v7935_v59  ;;  %v9351_v41 = vpack.i.bf16 %v2966_v5, %v2965_v31 }
 0x19e   :  { %8124 = vrot.lane.b32.xlu1 %v9284_v33, %s8544_s20  ;;  %7344 = vmatprep.subr.bf16.mxu0 %v7343_v37 }
 0x19f   :  { %v1205_v6 = vsel %vm1191_vm11, %v7922_v48, %v7937_v25  ;;  %v1198_v3 = vsel %vm1191_vm11, %v7917_v24, %v7936_v36  ;;  %7346 = vmatpush1.bf16.msra.mxu0 %v7345_v29  ;;  %v9302_v24 = vpack.i.bf16 %v2984_v45, %v2976_v57  ;;  %v2992_v25 = vld [vmem:[#allocation3 + $0x100] sm:$0xf] }
 0x1a0   :  { %v7940_v46 = vpop.permute.xlu1 %7939  ;;  %v7348_v42 = vpack.c.bf16 %v1205_v6, %v1198_v3 }
 0x1a1   :  { %8129 = vrot.lane.b32.xlu0 %v9288_v55, %s8544_s20  ;;  %v7942_v56 = vunpack.i.h.bf16 %v7940_v46  ;;  %v7941_v53 = vunpack.i.l.bf16 %v7940_v46  ;;  %v8158_v46 = vpack.i.bf16 %v8949_v40, %v9355_v39 }
 0x1a2   :  { %8134 = vrot.lane.b32.xlu1 %v9298_v47, %s8544_s20  ;;  %v1186_v35 = vpop.permute.xlu0 %1185  ;;  %7349 = vmatpush3.bf16.msra.mxu1 %v7348_v42 }
 0x1a3   :  { %v1219_v48 = vsel %vm1191_vm11, %v7932_v21, %v7942_v56  ;;  %v1212_v60 = vsel %vm1191_vm11, %v7927_v19, %v7941_v53  ;;  %7350 = vmatprep.subr.bf16.mxu1 %v8540_v16  ;;  %v1224_v4 = vsel %vm1191_vm11, %v9231_v62, %v1186_v35 }
 0x1a4   :  { %v1188_v1 = vpop.permute.xlu1 %1187  ;;  %v7351_v49 = vpack.c.bf16 %v1219_v48, %v1212_v60 }
 0x1a5   :  { %8139 = vrot.lane.b32.xlu0 %v9302_v24, %s8544_s20  ;;  %v1225_v10 = vsel %vm1191_vm11, %v1186_v35, %v1188_v1 }
 0x1a6   :  { %8144 = vrot.lane.b32.xlu1 %v9309_v28, %s8544_s20  ;;  %v9316_v13 = vpop.permute.xlu0 %7944  ;;  %6704 = vmatprep.subr.msk.mxu0 %vm634_vm9, %v1225_v10 }
 0x1a7   :  { %v7947_v19 = vunpack.i.h.bf16 %v9316_v13  ;;  %v7946_v22 = vunpack.i.l.bf16 %v9316_v13  ;;  %7352 = vmatpush3.bf16.msra.mxu1 %v7351_v49  ;;  %6705 = vmatpush1.msk.msra.mxu0 %vm634_vm9, %v1224_v4 }
 0x1a8   :  { %v9324_v23 = vpop.permute.xlu1 %7949  ;;  %7108 = vmatprep.subr.mxu1 %v8529_v2  ;;  %6706 = vmatmul.mubr.msk.f32.vlgmr.msra.gmra.mrb[6].mxu0 %vm544_vm8, %v9181_v54 }
 0x1a9   :  { %8149 = vrot.lane.b32.xlu0 %v9319_v18, %s8544_s20  ;;  %v7952_v62 = vunpack.i.h.bf16 %v9324_v23  ;;  %v7951_v58 = vunpack.i.l.bf16 %v9324_v23  ;;  %1514 = vmatprep.mubr.f32.mxu0 %v8529_v2  ;;  %v1836_v51 = vsel %vm1834_vm12, %v7946_v22, %v7947_v19 }
 0x1aa   :  { %3106 = vrot.lane.b32.xlu1 %v2993_v52, %s8544_s20  ;;  %v7955_v21 = vpop.permute.xlu0 %7954 }
 0x1ab   :  { %v7957_v27 = vunpack.i.h.bf16 %v7955_v21  ;;  %v7956_v14 = vunpack.i.l.bf16 %v7955_v21  ;;  %v1843_v9 = vsel %vm1834_vm12, %v7951_v58, %v7952_v62 }
 0x1ac   :  { %v1190_v15 = vpop.permute.xlu1 %1189  ;;  %v7353_v20 = vpack.c.bf16 %v1843_v9, %v1836_v51  ;;  %6707 = vmatmul.mubr.msk.f32.gmra.mrb[8].mxu0 %vm544_vm8, %v9192_v44 }
 0x1ad   :  { %3108 = vrot.lane.b32.xlu0 %v2994_v43, %s8544_s20  ;;  %v1842_v59 = vsel %vm1834_vm12, %v7957_v27, %v7951_v58  ;;  %v1835_v37 = vsel %vm1834_vm12, %v7956_v14, %v7946_v22  ;;  %v1226_v29 = vsel %vm1191_vm11, %v1188_v1, %v1190_v15  ;;  %1520 = vmatprep.mubr.f32.mxu0 %v8529_v2  ;;  %v2996_v1 = vld [vmem:[#allocation3 + $0x120] sm:$0xf] }
 0x1ae   :  { %3104 = vrot.lane.b32.xlu1 %v2992_v25, %s8544_s20  ;;  %v9348_v36 = vpop.permute.xlu0 %7959  ;;  %7109 = vmatpush3.msk.msra.mxu1 %vm634_vm9, %v1226_v29  ;;  %v7355_v11 = vpack.c.bf16 %v1842_v59, %v1835_v37  ;;  %v2997_v59 = vld [vmem:[#allocation3 + $0x128] sm:$0xf] }
 0x1af   :  { %v7962_v6 = vunpack.i.h.bf16 %v9348_v36  ;;  %v7961_v3 = vunpack.i.l.bf16 %v9348_v36  ;;  %7354 = vmatprep.subr.bf16.mxu0 %v7353_v20  ;;  %7111 = vmatmul.mubr.msk.f32.vlgmr.msra.gmra.mrb[12].mxu1 %vm544_vm8, %v9181_v54  ;;  %v2998_v36 = vld [vmem:[#allocation3 + $0x130] sm:$0xf] }
 0x1b0   :  { %v7965_v45 = vpop.permute.xlu1 %7964  ;;  %7356 = vmatpush1.bf16.msra.mxu0 %v7355_v11  ;;  %7113 = vmatprep.mubr.msk.f32.mxu1 %vm8541_vm10, %v8529_v2  ;;  %v9434_v11 = vld [vmem:[%s11057_s1 + $0x30] sm:$0xff] }
 0x1b1   :  { %8154 = vrot.lane.b32.xlu0 %v9351_v41, %s8544_s20  ;;  %v7967_v42 = vunpack.i.h.bf16 %v7965_v45  ;;  %v7966_v56 = vunpack.i.l.bf16 %v7965_v45  ;;  %6708 = vmatmul.mubr.msk.f32.gmra.mrb[10].mxu0 %vm544_vm8, %v9208_v26  ;;  %v1850_v40 = vsel %vm1834_vm12, %v7961_v3, %v7962_v6 }
 0x1b2   :  { %8159 = vrot.lane.b32.xlu1 %v8158_v46, %s8544_s20  ;;  %v9367_v53 = vpop.permute.xlu0 %7969  ;;  %1985 = vmatprep.mubr.f32.mxu0 %v8529_v2 }
 0x1b3   :  { %v7972_v54 = vunpack.i.h.bf16 %v9367_v53  ;;  %v7971_v57 = vunpack.i.l.bf16 %v9367_v53  ;;  %v1857_v35 = vsel %vm1834_vm12, %v7966_v56, %v7967_v42  ;;  %7114 = vmatmul.mubr.msk.f32.gmra.mrb[14].mxu1 %vm544_vm8, %v9192_v44  ;;  %v2999_v53 = vld [vmem:[#allocation3 + $0x138] sm:$0xf] }
 0x1b4   :  { %v9379_v48 = vpop.permute.xlu1 %7974  ;;  %v7357_v60 = vpack.c.bf16 %v1857_v35, %v1850_v40  ;;  %7116 = vmatprep.mubr.msk.f32.mxu1 %vm8541_vm10, %v8529_v2 }
 0x1b5   :  { %3110 = vrot.lane.b32.xlu0 %v2995_v38, %s8544_s20  ;;  %v7977_v61 = vunpack.i.h.bf16 %v9379_v48  ;;  %v7976_v63 = vunpack.i.l.bf16 %v9379_v48  ;;  %v1837_v49 = vsel %vm1834_vm12, %v7947_v19, %v7971_v57  ;;  %v1838_v10 = vsel %vm1834_vm12, %v7971_v57, %v7972_v54 }
 0x1b6   :  { %3112 = vrot.lane.b32.xlu1 %v2996_v1, %s8544_s20  ;;  %v7980_v44 = vpop.permute.xlu0 %7979  ;;  %7358 = vmatprep.subr.bf16.mxu0 %v7357_v60 }
 0x1b7   :  { %v1844_v7 = vsel %vm1834_vm12, %v7952_v62, %v7976_v63  ;;  %v7982_v4 = vunpack.i.h.bf16 %v7980_v44  ;;  %v7981_v22 = vunpack.i.l.bf16 %v7980_v44  ;;  %v1845_v13 = vsel %vm1834_vm12, %v7976_v63, %v7977_v61  ;;  %7117 = vmatmul.mubr.msk.f32.gmra.mrb[16].mxu1 %vm544_vm8, %v9208_v26 }
 0x1b8   :  { %v9402_v19 = vpop.permute.xlu1 %7984  ;;  %v7361_v58 = vpack.c.bf16 %v1845_v13, %v1838_v10  ;;  %v7363_v52 = vpack.c.bf16 %v1844_v7, %v1837_v49  ;;  %2068 = vmatprep.mubr.f32.mxu1 %v8529_v2  ;;  %v9471_v7 = vld [vmem:[%s11057_s1 + $0x40] sm:$0xff] }
 0x1b9   :  { %8164 = vrot.lane.b32.xlu0 %v8988_v32, %s8544_s20  ;;  %v1856_v23 = vsel %vm1834_vm12, %v7982_v4, %v7966_v56  ;;  %v1849_v62 = vsel %vm1834_vm12, %v7981_v22, %v7961_v3  ;;  %v7987_v21 = vunpack.i.h.bf16 %v9402_v19  ;;  %v7986_v27 = vunpack.i.l.bf16 %v9402_v19  ;;  %v9446_v56 = vld [vmem:[%s11057_s1 + $0x38] sm:$0xff] }
 0x1ba   :  { %8169 = vrot.lane.b32.xlu1 %v8997_v50, %s8544_s20  ;;  %v9411_v26 = vpop.permute.xlu0 %7989  ;;  %7362 = vmatprep.subr.bf16.mxu1 %v7361_v58  ;;  %v7359_v32 = vpack.c.bf16 %v1856_v23, %v1849_v62 }
 0x1bb   :  { %v7992_v14 = vunpack.i.h.bf16 %v9411_v26  ;;  %v7991_v43 = vunpack.i.l.bf16 %v9411_v26  ;;  %7364 = vmatpush1.bf16.msra.mxu1 %v7363_v52  ;;  %v1851_v9 = vsel %vm1834_vm12, %v7962_v6, %v7986_v27  ;;  %v1852_v50 = vsel %vm1834_vm12, %v7986_v27, %v7987_v21 }
 0x1bc   :  { %v1821_v51 = vpop.permute.xlu1 %1820  ;;  %7360 = vmatpush1.bf16.msra.mxu0 %v7359_v32 }
 0x1bd   :  { %8174 = vrot.lane.b32.xlu0 %v9007_v0, %s8544_s20  ;;  %v1858_v31 = vsel %vm1834_vm12, %v7967_v42, %v7991_v43  ;;  %v1859_v5 = vsel %vm1834_vm12, %v7991_v43, %v7992_v14 }
 0x1be   :  { %8179 = vrot.lane.b32.xlu1 %v9014_v34, %s8544_s20  ;;  %v1823_v15 = vpop.permute.xlu0 %1822  ;;  %v7365_v20 = vpack.c.bf16 %v1859_v5, %v1852_v50  ;;  %v7367_v0 = vpack.c.bf16 %v1858_v31, %v1851_v9 }
 0x1bf   :  { %v1864_v37 = vsel %vm1834_vm12, %v1821_v51, %v1823_v15 }
 0x1c0   :  { %v1819_v29 = vpop.permute.xlu1 %1818  ;;  %6716 = vmatprep.subr.msk.mxu0 %vm634_vm9, %v1864_v37  ;;  %7366 = vmatprep.subr.bf16.mxu1 %v7365_v20 }
 0x1c1   :  { %3114 = vrot.lane.b32.xlu0 %v2997_v59, %s8544_s20  ;;  %v1863_v25 = vsel %vm1834_vm12, %v1819_v29, %v1821_v51  ;;  %7368 = vmatpush1.bf16.msra.mxu1 %v7367_v0 }
 0x1c2   :  { %3116 = vrot.lane.b32.xlu1 %v2998_v36, %s8544_s20  ;;  %v7995_v34 = vpop.permute.xlu0 %7994  ;;  %6717 = vmatpush1.msk.msra.mxu0 %vm634_vm9, %v1863_v25 }
 0x1c3   :  { %v7997_v6 = vunpack.i.h.bf16 %v7995_v34  ;;  %v7996_v3 = vunpack.i.l.bf16 %v7995_v34  ;;  %6718 = vmatmul.mubr.msk.f32.vlgmr.msra.gmra.mrb[0].mxu0 %vm544_vm8, %v9434_v11 }
 0x1c4   :  { %v8000_v45 = vpop.permute.xlu1 %7999  ;;  %1991 = vmatprep.mubr.f32.mxu0 %v8529_v2 }
 0x1c5   :  { %8184 = vrot.lane.b32.xlu0 %v9254_v8, %s8545_s23  ;;  %v8002_v46 = vunpack.i.h.bf16 %v8000_v45  ;;  %v8001_v42 = vunpack.i.l.bf16 %v8000_v45  ;;  %v1839_v38 = vsel %vm1834_vm12, %v7972_v54, %v7996_v3  ;;  %v1840_v35 = vsel %vm1834_vm12, %v7996_v3, %v7997_v6 }
 0x1c6   :  { %8189 = vrot.lane.b32.xlu1 %v9259_v17, %s8545_s23  ;;  %v1825_v57 = vpop.permute.xlu0 %1824 }
 0x1c7   :  { %v1846_v40 = vsel %vm1834_vm12, %v7977_v61, %v8001_v42  ;;  %v1847_v60 = vsel %vm1834_vm12, %v8001_v42, %v8002_v46  ;;  %6719 = vmatmul.mubr.msk.f32.gmra.mrb[2].mxu0 %vm544_vm8, %v9446_v56  ;;  %v1865_v48 = vsel %vm1834_vm12, %v1823_v15, %v1825_v57 }
 0x1c8   :  { %v1827_v63 = vpop.permute.xlu1 %1826  ;;  %v7369_v1 = vpack.c.bf16 %v1847_v60, %v1840_v35  ;;  %v7371_v49 = vpack.c.bf16 %v1846_v40, %v1839_v38  ;;  %1997 = vmatprep.mubr.f32.mxu0 %v8529_v2  ;;  %v3637_v40 = vld [vmem:[#allocation3 + $0x110] sm:$0xf] }
 0x1c9   :  { %8194 = vrot.lane.b32.xlu0 %v9265_v12, %s8545_s23  ;;  %v1866_v54 = vsel %vm1834_vm12, %v1825_v57, %v1827_v63 }
 0x1ca   :  { %3118 = vrot.lane.b32.xlu1 %v2999_v53, %s8544_s20  ;;  %v8005_v61 = vpop.permute.xlu0 %8004  ;;  %6721 = vmatprep.subr.msk.mxu1 %vm634_vm9, %v1866_v54 }
 0x1cb   :  { %v8007_v44 = vunpack.i.h.bf16 %v8005_v61  ;;  %v8006_v10 = vunpack.i.l.bf16 %v8005_v61  ;;  %7370 = vmatprep.subr.bf16.mxu0 %v7369_v1  ;;  %6722 = vmatpush1.msk.msra.mxu1 %vm634_vm9, %v1865_v48  ;;  %v3635_v48 = vld [vmem:[#allocation3 + $0x100] sm:$0xf]  ;;  %v9541_v61 = vld [vmem:[#allocation3 + $0x70] sm:$0xff] }
 0x1cc   :  { %7372 = vmatpush1.bf16.msra.mxu0 %v7371_v49  ;;  %v8010_v4 = vpop.permute.xlu1 %8009  ;;  %7377 = vmatprep.subr.bf16.mxu1 %v8540_v16 }
 0x1cd   :  { %8199 = vrot.lane.b32.xlu0 %v9272_v30, %s8545_s23  ;;  %v8012_v22 = vunpack.i.h.bf16 %v8010_v4  ;;  %v8011_v13 = vunpack.i.l.bf16 %v8010_v4  ;;  %6723 = vmatmul.mubr.msk.f32.vlgmr.msra.gmra.mrb[0].mxu1 %vm544_vm8, %v9434_v11  ;;  %v1853_v58 = vsel %vm1834_vm12, %v7987_v21, %v8006_v10  ;;  %v1854_v23 = vsel %vm1834_vm12, %v8006_v10, %v8007_v44 }
 0x1ce   :  { %8204 = vrot.lane.b32.xlu1 %v9284_v33, %s8545_s23  ;;  %v8015_v52 = vpop.permute.xlu0 %8014  ;;  %6720 = vmatmul.mubr.msk.f32.gmra.mrb[4].mxu0 %vm544_vm8, %v9471_v7 }
 0x1cf   :  { %v1860_v62 = vsel %vm1834_vm12, %v7992_v14, %v8011_v13  ;;  %v8017_v27 = vunpack.i.h.bf16 %v8015_v52  ;;  %v8016_v32 = vunpack.i.l.bf16 %v8015_v52  ;;  %v1861_v43 = vsel %vm1834_vm12, %v8011_v13, %v8012_v22  ;;  %2151 = vmatprep.mubr.f32.mxu0 %v8529_v2  ;;  %2074 = vmatprep.mubr.f32.mxu1 %v8529_v2 }
 0x1d0   :  { %v8020_v19 = vpop.permute.xlu1 %8019  ;;  %v7373_v21 = vpack.c.bf16 %v1861_v43, %v1854_v23  ;;  %v7375_v51 = vpack.c.bf16 %v1860_v62, %v1853_v58  ;;  %v9559_v58 = vpack.i.bf16 %v9541_v61, %v9355_v39 }
 0x1d1   :  { %8209 = vrot.lane.b32.xlu0 %v9288_v55, %s8545_s23  ;;  %v1848_v9 = vsel %vm1834_vm12, %v8002_v46, %v8017_v27  ;;  %v1841_v26 = vsel %vm1834_vm12, %v7997_v6, %v8016_v32  ;;  %v8022_v31 = vunpack.i.h.bf16 %v8020_v19  ;;  %v8021_v14 = vunpack.i.l.bf16 %v8020_v19  ;;  %6724 = vmatmul.mubr.msk.f32.gmra.mrb[2].mxu1 %vm544_vm8, %v9446_v56  ;;  %v3636_v46 = vld [vmem:[#allocation3 + $0x108] sm:$0xf]  ;;  %v3638_v27 = vld [vmem:[#allocation3 + $0x118] sm:$0xf] }
 0x1d2   :  { %8214 = vrot.lane.b32.xlu1 %v9298_v47, %s8545_s23  ;;  %v1829_v50 = vpop.permute.xlu0 %1828  ;;  %7374 = vmatprep.subr.bf16.mxu0 %v7373_v21  ;;  %v7378_v5 = vpack.c.bf16 %v1848_v9, %v1841_v26  ;;  %v3624_v19 = vld [vmem:[#allocation3 + $0xa8] sm:$0xff]  ;;  %v3625_v21 = vld [vmem:[#allocation3 + $0xb0] sm:$0xff] }
 0x1d3   :  { %v1855_v15 = vsel %vm1834_vm12, %v8007_v44, %v8021_v14  ;;  %v1862_v20 = vsel %vm1834_vm12, %v8012_v22, %v8022_v31  ;;  %7376 = vmatpush1.bf16.msra.mxu0 %v7375_v51  ;;  %2080 = vmatprep.mubr.f32.mxu1 %v8529_v2  ;;  %v1867_v37 = vsel %vm1834_vm12, %v1827_v63, %v1829_v50  ;;  %v3639_v14 = vld [vmem:[#allocation3 + $0x120] sm:$0xf] }
 0x1d4   :  { %v1831_v0 = vpop.permute.xlu1 %1830  ;;  %7379 = vmatpush3.bf16.msra.mxu1 %v7378_v5  ;;  %v7381_v25 = vpack.c.bf16 %v1862_v20, %v1855_v15  ;;  %v3633_v5 = vld [vmem:[#allocation3 + $0xf0] sm:$0xff]  ;;  %v9594_v20 = vpack.i.bf16 %v3625_v21, %v3624_v19  ;;  %v9651_v21 = vld [vmem:[%s11057_s1 + $0x48] sm:$0xff] }
 0x1d5   :  { %8219 = vrot.lane.b32.xlu0 %v9302_v24, %s8545_s23  ;;  %v1868_v59 = vsel %vm1834_vm12, %v1829_v50, %v1831_v0  ;;  %7380 = vmatprep.subr.bf16.mxu1 %v8540_v16  ;;  %v3632_v50 = vld [vmem:[#allocation3 + $0xe8] sm:$0xff]  ;;  %v3641_v19 = vld [vmem:[#allocation3 + $0x130] sm:$0xf] }
 0x1d6   :  { %6725 = vmatmul.mubr.msk.f32.gmra.mrb[4].mxu1 %vm544_vm8, %v9471_v7  ;;  %8224 = vrot.lane.b32.xlu1 %v9309_v28, %s8545_s23  ;;  %v9512_v29 = vpop.permute.xlu0 %8024 }
 0x1d7   :  { %6726 = vmatprep.subr.msk.mxu0 %vm634_vm9, %v1868_v59  ;;  %v8027_v36 = vunpack.i.h.bf16 %v9512_v29  ;;  %v8026_v34 = vunpack.i.l.bf16 %v9512_v29  ;;  %7129 = vmatprep.mubr.msk.f32.mxu1 %vm8541_vm10, %v8529_v2 }
 0x1d8   :  { %6727 = vmatpush1.msk.msra.mxu0 %vm634_vm9, %v1867_v37  ;;  %v9520_v6 = vpop.permute.xlu1 %8029  ;;  %7382 = vmatpush3.bf16.msra.mxu1 %v7381_v25 }
 0x1d9   :  { %8229 = vrot.lane.b32.xlu0 %v9319_v18, %s8545_s23  ;;  %v8032_v3 = vunpack.i.h.bf16 %v9520_v6  ;;  %v8031_v45 = vunpack.i.l.bf16 %v9520_v6  ;;  %7127 = vmatprep.subr.mxu1 %v8529_v2  ;;  %v2479_v35 = vsel %vm2477_vm13, %v8026_v34, %v8027_v36 }
 0x1da   :  { %6728 = vmatmul.mubr.msk.f32.vlgmr.msra.gmra.mrb[6].mxu0 %vm544_vm8, %v9434_v11  ;;  %3749 = vrot.lane.b32.xlu1 %v3636_v46, %s8545_s23  ;;  %v8035_v42 = vpop.permute.xlu0 %8034 }
 0x1db   :  { %2157 = vmatprep.mubr.f32.mxu0 %v8529_v2  ;;  %v8037_v57 = vunpack.i.h.bf16 %v8035_v42  ;;  %v8036_v38 = vunpack.i.l.bf16 %v8035_v42  ;;  %v2486_v60 = vsel %vm2477_vm13, %v8031_v45, %v8032_v3 }
 0x1dc   :  { %v1833_v63 = vpop.permute.xlu1 %1832  ;;  %v7383_v1 = vpack.c.bf16 %v2486_v60, %v2479_v35 }
 0x1dd   :  { %3751 = vrot.lane.b32.xlu0 %v3637_v40, %s8545_s23  ;;  %v2485_v49 = vsel %vm2477_vm13, %v8037_v57, %v8031_v45  ;;  %v2478_v53 = vsel %vm2477_vm13, %v8036_v38, %v8026_v34  ;;  %v1869_v54 = vsel %vm1834_vm12, %v1831_v0, %v1833_v63  ;;  %v9611_v45 = vpack.i.bf16 %v3633_v5, %v3632_v50  ;;  %v3634_v40 = vld [vmem:[#allocation3 + $0xf8] sm:$0xff] }
 0x1de   :  { %6729 = vmatmul.mubr.msk.f32.gmra.mrb[8].mxu0 %vm544_vm8, %v9446_v56  ;;  %3747 = vrot.lane.b32.xlu1 %v3635_v48, %s8545_s23  ;;  %v9546_v44 = vpop.permute.xlu0 %8039  ;;  %v7385_v10 = vpack.c.bf16 %v2485_v49, %v2478_v53  ;;  %v3626_v53 = vld [vmem:[#allocation3 + $0xb8] sm:$0xff] }
 0x1df   :  { %7128 = vmatpush3.msk.msra.mxu1 %vm634_vm9, %v1869_v54  ;;  %v8042_v4 = vunpack.i.h.bf16 %v9546_v44  ;;  %v8041_v22 = vunpack.i.l.bf16 %v9546_v44  ;;  %7384 = vmatprep.subr.bf16.mxu0 %v7383_v1  ;;  %v9628_v48 = vpack.i.bf16 %v3634_v40, %v3626_v53 }
 0x1e0   :  { %7130 = vmatmul.mubr.msk.f32.vlgmr.msra.gmra.mrb[18].mxu1 %vm544_vm8, %v9434_v11  ;;  %v9553_v13 = vpop.permute.xlu1 %8044  ;;  %7386 = vmatpush1.bf16.msra.mxu0 %v7385_v10 }
 0x1e1   :  { %8234 = vrot.lane.b32.xlu0 %v9351_v41, %s8545_s23  ;;  %v8047_v52 = vunpack.i.h.bf16 %v9553_v13  ;;  %v8046_v23 = vunpack.i.l.bf16 %v9553_v13  ;;  %2163 = vmatprep.mubr.f32.mxu0 %v8529_v2  ;;  %v2493_v32 = vsel %vm2477_vm13, %v8041_v22, %v8042_v4 }
 0x1e2   :  { %7132 = vmatprep.mubr.msk.f32.mxu1 %vm8541_vm10, %v8529_v2  ;;  %8239 = vrot.lane.b32.xlu1 %v9559_v58, %s8545_s23  ;;  %v9568_v11 = vpop.permute.xlu0 %8049 }
 0x1e3   :  { %6730 = vmatmul.mubr.msk.f32.gmra.mrb[10].mxu0 %vm544_vm8, %v9471_v7  ;;  %v8052_v39 = vunpack.i.h.bf16 %v9568_v11  ;;  %v8051_v62 = vunpack.i.l.bf16 %v9568_v11  ;;  %v2500_v43 = vsel %vm2477_vm13, %v8046_v23, %v8047_v52 }
 0x1e4   :  { %2628 = vmatprep.mubr.f32.mxu0 %v8529_v2  ;;  %7133 = vmatmul.mubr.msk.f32.gmra.mrb[20].mxu1 %vm544_vm8, %v9446_v56  ;;  %v9583_v51 = vpop.permute.xlu1 %8054  ;;  %v7387_v9 = vpack.c.bf16 %v2500_v43, %v2493_v32  ;;  %v3640_v43 = vld [vmem:[#allocation3 + $0x128] sm:$0xf] }
 0x1e5   :  { %3753 = vrot.lane.b32.xlu0 %v3638_v27, %s8545_s23  ;;  %7135 = vmatprep.mubr.msk.f32.mxu1 %vm8541_vm10, %v8529_v2  ;;  %v8057_v26 = vunpack.i.h.bf16 %v9583_v51  ;;  %v8056_v31 = vunpack.i.l.bf16 %v9583_v51  ;;  %v2480_v15 = vsel %vm2477_vm13, %v8027_v36, %v8051_v62  ;;  %v2481_v0 = vsel %vm2477_vm13, %v8051_v62, %v8052_v39  ;;  %v3618_v36 = vld [vmem:[#allocation3 + $0x78] sm:$0xff] }
 0x1e6   :  { %3755 = vrot.lane.b32.xlu1 %v3639_v14, %s8545_s23  ;;  %v8060_v56 = vpop.permute.xlu0 %8059  ;;  %7388 = vmatprep.subr.bf16.mxu0 %v7387_v9 }
 0x1e7   :  { %v2487_v59 = vsel %vm2477_vm13, %v8032_v3, %v8056_v31  ;;  %v8062_v37 = vunpack.i.h.bf16 %v8060_v56  ;;  %v8061_v25 = vunpack.i.l.bf16 %v8060_v56  ;;  %v2488_v29 = vsel %vm2477_vm13, %v8056_v31, %v8057_v26  ;;  %v9663_v56 = vld [vmem:[%s11057_s1 + $0x50] sm:$0xff] }
 0x1e8   :  { %7136 = vmatmul.mubr.msk.f32.gmra.mrb[22].mxu1 %vm544_vm8, %v9471_v7  ;;  %v9607_v34 = vpop.permute.xlu1 %8064  ;;  %v7391_v6 = vpack.c.bf16 %v2488_v29, %v2481_v0  ;;  %v7393_v46 = vpack.c.bf16 %v2487_v59, %v2480_v15  ;;  %v3610_v7 = vld [vmem:[#allocation3 + $0x38] sm:$0xff] }
 0x1e9   :  { %8244 = vrot.lane.b32.xlu0 %v9594_v20, %s8545_s23  ;;  %2711 = vmatprep.mubr.f32.mxu1 %v8529_v2  ;;  %v2499_v3 = vsel %vm2477_vm13, %v8062_v37, %v8046_v23  ;;  %v2492_v42 = vsel %vm2477_vm13, %v8061_v25, %v8041_v22  ;;  %v8067_v57 = vunpack.i.h.bf16 %v9607_v34  ;;  %v8066_v38 = vunpack.i.l.bf16 %v9607_v34 }
 0x1ea   :  { %8249 = vrot.lane.b32.xlu1 %v9611_v45, %s8545_s23  ;;  %v9620_v35 = vpop.permute.xlu0 %8069  ;;  %7392 = vmatprep.subr.bf16.mxu1 %v7391_v6  ;;  %v9622_v60 = vpack.i.bf16 %v3618_v36, %v3610_v7  ;;  %v7389_v63 = vpack.c.bf16 %v2499_v3, %v2492_v42 }
 0x1eb   :  { %v8072_v1 = vunpack.i.h.bf16 %v9620_v35  ;;  %v8071_v49 = vunpack.i.l.bf16 %v9620_v35  ;;  %7394 = vmatpush1.bf16.msra.mxu1 %v7393_v46  ;;  %v2494_v10 = vsel %vm2477_vm13, %v8042_v4, %v8066_v38  ;;  %v2495_v23 = vsel %vm2477_vm13, %v8066_v38, %v8067_v57 }
 0x1ec   :  { %v2464_v54 = vpop.permute.xlu1 %2463  ;;  %7390 = vmatpush1.bf16.msra.mxu0 %v7389_v63 }
 0x1ed   :  { %8254 = vrot.lane.b32.xlu0 %v9622_v60, %s8545_s23  ;;  %v2501_v22 = vsel %vm2477_vm13, %v8047_v52, %v8071_v49  ;;  %v2502_v62 = vsel %vm2477_vm13, %v8071_v49, %v8072_v1 }
 0x1ee   :  { %8259 = vrot.lane.b32.xlu1 %v9628_v48, %s8545_s23  ;;  %v2466_v27 = vpop.permute.xlu0 %2465  ;;  %v7395_v32 = vpack.c.bf16 %v2502_v62, %v2495_v23  ;;  %v7397_v44 = vpack.c.bf16 %v2501_v22, %v2494_v10 }
 0x1ef   :  { %v2507_v4 = vsel %vm2477_vm13, %v2464_v54, %v2466_v27 }
 0x1f0   :  { %v2462_v13 = vpop.permute.xlu1 %2461  ;;  %6738 = vmatprep.subr.msk.mxu0 %vm634_vm9, %v2507_v4  ;;  %7396 = vmatprep.subr.bf16.mxu1 %v7395_v32 }
 0x1f1   :  { %3757 = vrot.lane.b32.xlu0 %v3640_v43, %s8545_s23  ;;  %v2506_v52 = vsel %vm2477_vm13, %v2462_v13, %v2464_v54  ;;  %7398 = vmatpush1.bf16.msra.mxu1 %v7397_v44 }
 0x1f2   :  { %3759 = vrot.lane.b32.xlu1 %v3641_v19, %s8545_s23  ;;  %v8075_v9 = vpop.permute.xlu0 %8074  ;;  %6739 = vmatpush1.msk.msra.mxu0 %vm634_vm9, %v2506_v52 }
 0x1f3   :  { %v8077_v31 = vunpack.i.h.bf16 %v8075_v9  ;;  %v8076_v14 = vunpack.i.l.bf16 %v8075_v9  ;;  %6740 = vmatmul.mubr.msk.f32.vlgmr.msra.gmra.mrb[0].mxu0 %vm544_vm8, %v9651_v21  ;;  %v4279_v9 = vld [vmem:[#allocation3 + $0x108] sm:$0xf] }
 0x1f4   :  { %v8080_v50 = vpop.permute.xlu1 %8079  ;;  %2634 = vmatprep.mubr.f32.mxu0 %v8529_v2 }
 0x1f5   :  { %8264 = vrot.lane.b32.xlu0 %v9254_v8, %s8546_s29  ;;  %v8082_v5 = vunpack.i.h.bf16 %v8080_v50  ;;  %v8081_v15 = vunpack.i.l.bf16 %v8080_v50  ;;  %v2482_v8 = vsel %vm2477_vm13, %v8052_v39, %v8076_v14  ;;  %v2483_v37 = vsel %vm2477_vm13, %v8076_v14, %v8077_v31 }
 0x1f6   :  { %8269 = vrot.lane.b32.xlu1 %v9259_v17, %s8546_s29  ;;  %v2468_v0 = vpop.permute.xlu0 %2467  ;;  %v3642_v17 = vld [vmem:[#allocation3 + $0x138] sm:$0xf] }
 0x1f7   :  { %v2489_v59 = vsel %vm2477_vm13, %v8057_v26, %v8081_v15  ;;  %v2490_v25 = vsel %vm2477_vm13, %v8081_v15, %v8082_v5  ;;  %6741 = vmatmul.mubr.msk.f32.gmra.mrb[2].mxu0 %vm544_vm8, %v9663_v56  ;;  %v2508_v39 = vsel %vm2477_vm13, %v2466_v27, %v2468_v0 }
 0x1f8   :  { %v2470_v29 = vpop.permute.xlu1 %2469  ;;  %v7399_v36 = vpack.c.bf16 %v2490_v25, %v2483_v37  ;;  %v7401_v6 = vpack.c.bf16 %v2489_v59, %v2482_v8  ;;  %2640 = vmatprep.mubr.f32.mxu0 %v8529_v2 }
 0x1f9   :  { %8274 = vrot.lane.b32.xlu0 %v9265_v12, %s8546_s29  ;;  %v2509_v11 = vsel %vm2477_vm13, %v2468_v0, %v2470_v29  ;;  %v9688_v12 = vld [vmem:[%s11057_s1 + $0x58] sm:$0xff] }
 0x1fa   :  { %3761 = vrot.lane.b32.xlu1 %v3642_v17, %s8545_s23  ;;  %v8085_v51 = vpop.permute.xlu0 %8084  ;;  %6743 = vmatprep.subr.msk.mxu1 %vm634_vm9, %v2509_v11 }
 0x1fb   :  { %v8087_v26 = vunpack.i.h.bf16 %v8085_v51  ;;  %v8086_v46 = vunpack.i.l.bf16 %v8085_v51  ;;  %7400 = vmatprep.subr.bf16.mxu0 %v7399_v36  ;;  %6744 = vmatpush1.msk.msra.mxu1 %vm634_vm9, %v2508_v39 }
 0x1fc   :  { %7402 = vmatpush1.bf16.msra.mxu0 %v7401_v6  ;;  %v8090_v3 = vpop.permute.xlu1 %8089  ;;  %7407 = vmatprep.subr.bf16.mxu1 %v8540_v16 }
 0x1fd   :  { %8279 = vrot.lane.b32.xlu0 %v9272_v30, %s8546_s29  ;;  %v8092_v42 = vunpack.i.h.bf16 %v8090_v3  ;;  %v8091_v38 = vunpack.i.l.bf16 %v8090_v3  ;;  %6745 = vmatmul.mubr.msk.f32.vlgmr.msra.gmra.mrb[0].mxu1 %vm544_vm8, %v9651_v21  ;;  %v2496_v7 = vsel %vm2477_vm13, %v8067_v57, %v8086_v46  ;;  %v2497_v63 = vsel %vm2477_vm13, %v8086_v46, %v8087_v26  ;;  %v4281_v3 = vld [vmem:[#allocation3 + $0x118] sm:$0xf] }
 0x1fe   :  { %8284 = vrot.lane.b32.xlu1 %v9284_v33, %s8546_s29  ;;  %6742 = vmatmul.mubr.msk.f32.gmra.mrb[4].mxu0 %vm544_vm8, %v9688_v12 }
 0x1ff   :  { %v8095_v40 = vpop.permute.xlu0 %8094  ;;  %v2503_v30 = vsel %vm2477_vm13, %v8072_v1, %v8091_v38  ;;  %v2504_v54 = vsel %vm2477_vm13, %v8091_v38, %v8092_v42  ;;  %2794 = vmatprep.mubr.f32.mxu0 %v8529_v2  ;;  %2717 = vmatprep.mubr.f32.mxu1 %v8529_v2 }
 0x200   :  { %v8097_v49 = vunpack.i.h.bf16 %v8095_v40  ;;  %v8096_v53 = vunpack.i.l.bf16 %v8095_v40  ;;  %v8100_v34 = vpop.permute.xlu1 %8099  ;;  %v7403_v33 = vpack.c.bf16 %v2504_v54, %v2497_v63  ;;  %v7405_v57 = vpack.c.bf16 %v2503_v30, %v2496_v7  ;;  %v4282_v30 = vld [vmem:[#allocation3 + $0x120] sm:$0xf] }
 0x201   :  { %8289 = vrot.lane.b32.xlu0 %v9288_v55, %s8546_s29  ;;  %v8102_v22 = vunpack.i.h.bf16 %v8100_v34  ;;  %v8101_v1 = vunpack.i.l.bf16 %v8100_v34  ;;  %6746 = vmatmul.mubr.msk.f32.gmra.mrb[2].mxu1 %vm544_vm8, %v9663_v56 }
 0x202   :  { %v2491_v10 = vsel %vm2477_vm13, %v8082_v5, %v8097_v49  ;;  %v2484_v35 = vsel %vm2477_vm13, %v8077_v31, %v8096_v53  ;;  %8294 = vrot.lane.b32.xlu1 %v9298_v47, %s8546_s29  ;;  %7404 = vmatprep.subr.bf16.mxu0 %v7403_v33 }
 0x203   :  { %v2472_v23 = vpop.permute.xlu0 %2471  ;;  %v7408_v62 = vpack.c.bf16 %v2491_v10, %v2484_v35  ;;  %v2498_v27 = vsel %vm2477_vm13, %v8087_v26, %v8101_v1  ;;  %v2505_v55 = vsel %vm2477_vm13, %v8092_v42, %v8102_v22  ;;  %7406 = vmatpush1.bf16.msra.mxu0 %v7405_v57  ;;  %2723 = vmatprep.mubr.f32.mxu1 %v8529_v2 }
 0x204   :  { %v2474_v32 = vpop.permute.xlu1 %2473  ;;  %v2510_v47 = vsel %vm2477_vm13, %v2470_v29, %v2472_v23  ;;  %v7411_v4 = vpack.c.bf16 %v2505_v55, %v2498_v27  ;;  %v4278_v29 = vld [vmem:[#allocation3 + $0x100] sm:$0xf] }
 0x205   :  { %8299 = vrot.lane.b32.xlu0 %v9302_v24, %s8546_s29  ;;  %7409 = vmatpush3.bf16.msra.mxu1 %v7408_v62  ;;  %v2511_v44 = vsel %vm2477_vm13, %v2472_v23, %v2474_v32 }
 0x206   :  { %7410 = vmatprep.subr.bf16.mxu1 %v8540_v16  ;;  %6747 = vmatmul.mubr.msk.f32.gmra.mrb[4].mxu1 %vm544_vm8, %v9688_v12 }
 0x207   :  { %8304 = vrot.lane.b32.xlu1 %v9309_v28, %s8546_s29  ;;  %v9729_v43 = vpop.permute.xlu0 %8104  ;;  %6748 = vmatprep.subr.msk.mxu0 %vm634_vm9, %v2511_v44 }
 0x208   :  { %v8107_v24 = vunpack.i.h.bf16 %v9729_v43  ;;  %v8106_v13 = vunpack.i.l.bf16 %v9729_v43  ;;  %6749 = vmatpush1.msk.msra.mxu0 %vm634_vm9, %v2510_v47  ;;  %7148 = vmatprep.mubr.msk.f32.mxu1 %vm8541_vm10, %v8529_v2  ;;  %v9737_v52 = vpop.permute.xlu1 %8109 }
 0x209   :  { %8309 = vrot.lane.b32.xlu0 %v9319_v18, %s8546_s29  ;;  %7412 = vmatpush3.bf16.msra.mxu1 %v7411_v4  ;;  %v8112_v28 = vunpack.i.h.bf16 %v9737_v52  ;;  %v8111_v19 = vunpack.i.l.bf16 %v9737_v52  ;;  %v4280_v18 = vld [vmem:[#allocation3 + $0x110] sm:$0xf] }
 0x20a   :  { %7146 = vmatprep.subr.mxu1 %v8529_v2  ;;  %6750 = vmatmul.mubr.msk.f32.vlgmr.msra.gmra.mrb[6].mxu0 %vm544_vm8, %v9651_v21  ;;  %v3122_v5 = vsel %vm3120_vm14, %v8106_v13, %v8107_v24 }
 0x20b   :  { %4392 = vrot.lane.b32.xlu1 %v4279_v9, %s8546_s29  ;;  %v8115_v31 = vpop.permute.xlu0 %8114  ;;  %2800 = vmatprep.mubr.f32.mxu0 %v8529_v2  ;;  %v3129_v15 = vsel %vm3120_vm14, %v8111_v19, %v8112_v28  ;;  %v4283_v9 = vld [vmem:[#allocation3 + $0x128] sm:$0xf] }
 0x20c   :  { %v8117_v14 = vunpack.i.h.bf16 %v8115_v31  ;;  %v8116_v50 = vunpack.i.l.bf16 %v8115_v31  ;;  %v2476_v0 = vpop.permute.xlu1 %2475  ;;  %v7413_v8 = vpack.c.bf16 %v3129_v15, %v3122_v5  ;;  %v4284_v15 = vld [vmem:[#allocation3 + $0x130] sm:$0xf] }
 0x20d   :  { %4394 = vrot.lane.b32.xlu0 %v4280_v18, %s8546_s29  ;;  %v2512_v25 = vsel %vm2477_vm13, %v2474_v32, %v2476_v0  ;;  %v4890_v18 = vld [vmem:[#allocation3 + $0x8] sm:$0xff]  ;;  %v4899_v0 = vld [vmem:[#allocation3 + $0x50] sm:$0xff] }
 0x20e   :  { %v3128_v59 = vsel %vm3120_vm14, %v8117_v14, %v8111_v19  ;;  %v3121_v37 = vsel %vm3120_vm14, %v8116_v50, %v8106_v13  ;;  %6751 = vmatmul.mubr.msk.f32.gmra.mrb[8].mxu0 %vm544_vm8, %v9663_v56  ;;  %7147 = vmatpush3.msk.msra.mxu1 %vm634_vm9, %v2512_v25  ;;  %v4891_v14 = vld [vmem:[#allocation3 + $0x10] sm:$0xff] }
 0x20f   :  { %4390 = vrot.lane.b32.xlu1 %v4278_v29, %s8546_s29  ;;  %v8120_v36 = vpop.permute.xlu0 %8119  ;;  %v7415_v6 = vpack.c.bf16 %v3128_v59, %v3121_v37  ;;  %7414 = vmatprep.subr.bf16.mxu0 %v7413_v8  ;;  %v9830_v8 = vld [vmem:[%s11057_s1 + $0x60] sm:$0xff]  ;;  %v9835_v37 = vpack.i.bf16 %v4891_v14, %v4890_v18 }
 0x210   :  { %v8122_v17 = vunpack.i.h.bf16 %v8120_v36  ;;  %v8121_v11 = vunpack.i.l.bf16 %v8120_v36  ;;  %7149 = vmatmul.mubr.msk.f32.vlgmr.msra.gmra.mrb[24].mxu1 %vm544_vm8, %v9651_v21  ;;  %v8125_v39 = vpop.permute.xlu1 %8124  ;;  %2806 = vmatprep.mubr.f32.mxu0 %v8529_v2  ;;  %v4898_v36 = vld [vmem:[#allocation3 + $0x48] sm:$0xff] }
 0x211   :  { %8314 = vrot.lane.b32.xlu0 %v9351_v41, %s8546_s29  ;;  %7416 = vmatpush1.bf16.msra.mxu0 %v7415_v6  ;;  %v8127_v51 = vunpack.i.h.bf16 %v8125_v39  ;;  %v8126_v26 = vunpack.i.l.bf16 %v8125_v39  ;;  %v4897_v6 = vld [vmem:[#allocation3 + $0x40] sm:$0xff] }
 0x212   :  { %7151 = vmatprep.mubr.msk.f32.mxu1 %vm8541_vm10, %v8529_v2  ;;  %6752 = vmatmul.mubr.msk.f32.gmra.mrb[10].mxu0 %vm544_vm8, %v9688_v12  ;;  %v3136_v42 = vsel %vm3120_vm14, %v8121_v11, %v8122_v17 }
 0x213   :  { %8319 = vrot.lane.b32.xlu1 %v9559_v58, %s8546_s29  ;;  %v9767_v46 = vpop.permute.xlu0 %8129  ;;  %v3143_v38 = vsel %vm3120_vm14, %v8126_v26, %v8127_v51  ;;  %3271 = vmatprep.mubr.f32.mxu0 %v8529_v2 }
 0x214   :  { %v8132_v21 = vunpack.i.h.bf16 %v9767_v46  ;;  %v8131_v41 = vunpack.i.l.bf16 %v9767_v46  ;;  %7152 = vmatmul.mubr.msk.f32.gmra.mrb[26].mxu1 %vm544_vm8, %v9663_v56  ;;  %v9778_v58 = vpop.permute.xlu1 %8134  ;;  %v7417_v7 = vpack.c.bf16 %v3143_v38, %v3136_v42 }
 0x215   :  { %4396 = vrot.lane.b32.xlu0 %v4281_v3, %s8546_s29  ;;  %7154 = vmatprep.mubr.msk.f32.mxu1 %vm8541_vm10, %v8529_v2  ;;  %v8137_v40 = vunpack.i.h.bf16 %v9778_v58  ;;  %v8136_v63 = vunpack.i.l.bf16 %v9778_v58  ;;  %v4285_v58 = vld [vmem:[#allocation3 + $0x138] sm:$0xf] }
 0x216   :  { %v3123_v49 = vsel %vm3120_vm14, %v8107_v24, %v8131_v41  ;;  %7418 = vmatprep.subr.bf16.mxu0 %v7417_v7  ;;  %v3124_v56 = vsel %vm3120_vm14, %v8131_v41, %v8132_v21  ;;  %v9854_v41 = vld [vmem:[%s11057_s1 + $0x68] sm:$0xff] }
 0x217   :  { %4398 = vrot.lane.b32.xlu1 %v4282_v30, %s8546_s29  ;;  %v8140_v53 = vpop.permute.xlu0 %8139  ;;  %v3130_v54 = vsel %vm3120_vm14, %v8112_v28, %v8136_v63  ;;  %v3131_v57 = vsel %vm3120_vm14, %v8136_v63, %v8137_v40 }
 0x218   :  { %v8142_v34 = vunpack.i.h.bf16 %v8140_v53  ;;  %v8141_v33 = vunpack.i.l.bf16 %v8140_v53  ;;  %7155 = vmatmul.mubr.msk.f32.gmra.mrb[28].mxu1 %vm544_vm8, %v9688_v12  ;;  %v9796_v10 = vpop.permute.xlu1 %8144  ;;  %v7421_v35 = vpack.c.bf16 %v3131_v57, %v3124_v56  ;;  %v7423_v22 = vpack.c.bf16 %v3130_v54, %v3123_v49  ;;  %v4906_v49 = vld [vmem:[#allocation3 + $0x88] sm:$0xff]  ;;  %v4907_v53 = vld [vmem:[#allocation3 + $0x90] sm:$0xff] }
 0x219   :  { %8324 = vrot.lane.b32.xlu0 %v9594_v20, %s8546_s29  ;;  %3354 = vmatprep.mubr.f32.mxu1 %v8529_v2  ;;  %v8147_v62 = vunpack.i.h.bf16 %v9796_v10  ;;  %v8146_v27 = vunpack.i.l.bf16 %v9796_v10  ;;  %v4914_v54 = vld [vmem:[#allocation3 + $0xc8] sm:$0xff] }
 0x21a   :  { %v3142_v1 = vsel %vm3120_vm14, %v8142_v34, %v8126_v26  ;;  %v3135_v23 = vsel %vm3120_vm14, %v8141_v33, %v8121_v11  ;;  %7422 = vmatprep.subr.bf16.mxu1 %v7421_v35  ;;  %v9844_v11 = vpack.i.bf16 %v4899_v0, %v4898_v36  ;;  %v4889_v26 = vld [vmem:[#allocation3] sm:$0xff]  ;;  %v4915_v34 = vld [vmem:[#allocation3 + $0xd0] sm:$0xff]  ;;  %v9884_v35 = vpack.i.bf16 %v4907_v53, %v4906_v49  ;;  %v4916_v49 = vld [vmem:[#allocation3 + $0xd8] sm:$0xff] }
 0x21b   :  { %8329 = vrot.lane.b32.xlu1 %v9611_v45, %s8546_s29  ;;  %v9807_v12 = vpop.permute.xlu0 %8149  ;;  %v7419_v55 = vpack.c.bf16 %v3142_v1, %v3135_v23  ;;  %7424 = vmatpush1.bf16.msra.mxu1 %v7423_v22  ;;  %v3137_v43 = vsel %vm3120_vm14, %v8122_v17, %v8146_v27  ;;  %v3138_v24 = vsel %vm3120_vm14, %v8146_v27, %v8147_v62  ;;  %v4893_v23 = vld [vmem:[#allocation3 + $0x20] sm:$0xff] }
 0x21c   :  { %v8152_v32 = vunpack.i.h.bf16 %v9807_v12  ;;  %v8151_v44 = vunpack.i.l.bf16 %v9807_v12  ;;  %v3107_v47 = vpop.permute.xlu1 %3106  ;;  %v9858_v42 = vpack.i.bf16 %v4897_v6, %v4889_v26  ;;  %v4905_v6 = vld [vmem:[#allocation3 + $0x80] sm:$0xff] }
 0x21d   :  { %8334 = vrot.lane.b32.xlu0 %v9622_v60, %s8546_s29  ;;  %7420 = vmatpush1.bf16.msra.mxu0 %v7419_v55  ;;  %v9889_v55 = vpack.i.bf16 %v4915_v34, %v4914_v54 }
 0x21e   :  { %v3144_v4 = vsel %vm3120_vm14, %v8127_v51, %v8151_v44  ;;  %v3145_v13 = vsel %vm3120_vm14, %v8151_v44, %v8152_v32  ;;  %v9894_v44 = vld [vmem:[%s11057_s1 + $0x70] sm:$0xff] }
 0x21f   :  { %8339 = vrot.lane.b32.xlu1 %v9628_v48, %s8546_s29  ;;  %v3109_v52 = vpop.permute.xlu0 %3108  ;;  %v7425_v28 = vpack.c.bf16 %v3145_v13, %v3138_v24  ;;  %v7427_v19 = vpack.c.bf16 %v3144_v4, %v3137_v43  ;;  %v4892_v4 = vld [vmem:[#allocation3 + $0x18] sm:$0xff]  ;;  %v4901_v24 = vld [vmem:[#allocation3 + $0x60] sm:$0xff] }
 0x220   :  { %v3150_v31 = vsel %vm3120_vm14, %v3107_v47, %v3109_v52  ;;  %v3105_v50 = vpop.permute.xlu1 %3104 }
 0x221   :  { %4400 = vrot.lane.b32.xlu0 %v4283_v9, %s8546_s29  ;;  %6760 = vmatprep.subr.msk.mxu0 %vm634_vm9, %v3150_v31  ;;  %v3149_v5 = vsel %vm3120_vm14, %v3105_v50, %v3107_v47  ;;  %v4900_v50 = vld [vmem:[#allocation3 + $0x58] sm:$0xff] }
 0x222   :  { %7426 = vmatprep.subr.bf16.mxu1 %v7425_v28  ;;  %6761 = vmatpush1.msk.msra.mxu0 %vm634_vm9, %v3149_v5  ;;  %v9904_v28 = vpack.i.bf16 %v4893_v23, %v4892_v4  ;;  %v9916_v5 = vpack.i.bf16 %v4901_v24, %v4900_v50  ;;  %v4894_v4 = vld [vmem:[#allocation3 + $0x28] sm:$0xff]  ;;  %v4895_v24 = vld [vmem:[#allocation3 + $0x30] sm:$0xff] }
 0x223   :  { %7428 = vmatpush1.bf16.msra.mxu1 %v7427_v19  ;;  %4402 = vrot.lane.b32.xlu1 %v4284_v15, %s8546_s29  ;;  %v9833_v59 = vpop.permute.xlu0 %8154 }
 0x224   :  { %v8157_v25 = vunpack.i.h.bf16 %v9833_v59  ;;  %v8156_v29 = vunpack.i.l.bf16 %v9833_v59  ;;  %v9840_v17 = vpop.permute.xlu1 %8159  ;;  %6762 = vmatmul.mubr.msk.f32.vlgmr.msra.gmra.mrb[0].mxu0 %vm544_vm8, %v9830_v8 }
 0x225   :  { %8344 = vrot.lane.b32.xlu0 %v9835_v37, %s8547_s10  ;;  %v8162_v39 = vunpack.i.h.bf16 %v9840_v17  ;;  %v8161_v51 = vunpack.i.l.bf16 %v9840_v17  ;;  %3277 = vmatprep.mubr.f32.mxu0 %v8529_v2 }
 0x226   :  { %v3125_v38 = vsel %vm3120_vm14, %v8132_v21, %v8156_v29  ;;  %v3126_v63 = vsel %vm3120_vm14, %v8156_v29, %v8157_v25 }
 0x227   :  { %8349 = vrot.lane.b32.xlu1 %v9844_v11, %s8547_s10  ;;  %v3111_v3 = vpop.permute.xlu0 %3110  ;;  %v3132_v7 = vsel %vm3120_vm14, %v8137_v40, %v8161_v51  ;;  %v3133_v30 = vsel %vm3120_vm14, %v8161_v51, %v8162_v39  ;;  %v4909_v51 = vld [vmem:[#allocation3 + $0xa0] sm:$0xff] }
 0x228   :  { %v9872_v56 = vpop.permute.xlu1 %3112  ;;  %v7429_v46 = vpack.c.bf16 %v3133_v30, %v3126_v63  ;;  %v7431_v21 = vpack.c.bf16 %v3132_v7, %v3125_v38  ;;  %6763 = vmatmul.mubr.msk.f32.gmra.mrb[2].mxu0 %vm544_vm8, %v9854_v41  ;;  %v3151_v33 = vsel %vm3120_vm14, %v3109_v52, %v3111_v3  ;;  %v4917_v38 = vld [vmem:[#allocation3 + $0xe0] sm:$0xff] }
 0x229   :  { %8354 = vrot.lane.b32.xlu0 %v9858_v42, %s8547_s10  ;;  %v3152_v40 = vsel %vm3120_vm14, %v3111_v3, %v9872_v56  ;;  %3283 = vmatprep.mubr.f32.mxu0 %v8529_v2 }
 0x22a   :  { %6765 = vmatprep.subr.msk.mxu1 %vm634_vm9, %v3152_v40  ;;  %7430 = vmatprep.subr.bf16.mxu0 %v7429_v46 }
 0x22b   :  { %4404 = vrot.lane.b32.xlu1 %v4285_v58, %s8546_s29  ;;  %v8165_v57 = vpop.permute.xlu0 %8164  ;;  %6766 = vmatpush1.msk.msra.mxu1 %vm634_vm9, %v3151_v33 }
 0x22c   :  { %v8167_v22 = vunpack.i.h.bf16 %v8165_v57  ;;  %v8166_v1 = vunpack.i.l.bf16 %v8165_v57  ;;  %7432 = vmatpush1.bf16.msra.mxu0 %v7431_v21  ;;  %v8170_v27 = vpop.permute.xlu1 %8169  ;;  %6767 = vmatmul.mubr.msk.f32.vlgmr.msra.gmra.mrb[0].mxu1 %vm544_vm8, %v9830_v8  ;;  %v9949_v21 = vpack.i.bf16 %v4917_v38, %v4916_v49  ;;  %v4922_v57 = vld [vmem:[#allocation3 + $0x108] sm:$0xf] }
 0x22d   :  { %8359 = vrot.lane.b32.xlu0 %v9884_v35, %s8547_s10  ;;  %v8172_v47 = vunpack.i.h.bf16 %v8170_v27  ;;  %v8171_v43 = vunpack.i.l.bf16 %v8170_v27  ;;  %7437 = vmatprep.subr.bf16.mxu1 %v8540_v16  ;;  %v4923_v27 = vld [vmem:[#allocation3 + $0x110] sm:$0xf] }
 0x22e   :  { %v3139_v13 = vsel %vm3120_vm14, %v8147_v62, %v8166_v1  ;;  %v3140_v19 = vsel %vm3120_vm14, %v8166_v1, %v8167_v22  ;;  %3360 = vmatprep.mubr.f32.mxu1 %v8529_v2  ;;  %v4913_v62 = vld [vmem:[#allocation3 + $0xc0] sm:$0xff]  ;;  %6764 = vmatmul.mubr.msk.f32.gmra.mrb[4].mxu0 %vm544_vm8, %v9894_v44 }
 0x22f   :  { %8364 = vrot.lane.b32.xlu1 %v9889_v55, %s8547_s10  ;;  %v8175_v52 = vpop.permute.xlu0 %8174  ;;  %v3146_v9 = vsel %vm3120_vm14, %v8152_v32, %v8171_v43  ;;  %v3147_v10 = vsel %vm3120_vm14, %v8171_v43, %v8172_v47  ;;  %3437 = vmatprep.mubr.f32.mxu0 %v8529_v2  ;;  %v9929_v3 = vpack.i.bf16 %v4913_v62, %v4905_v6 }
 0x230   :  { %v8177_v31 = vunpack.i.h.bf16 %v8175_v52  ;;  %v8176_v14 = vunpack.i.l.bf16 %v8175_v52  ;;  %v8180_v18 = vpop.permute.xlu1 %8179  ;;  %v7433_v15 = vpack.c.bf16 %v3147_v10, %v3140_v19  ;;  %v7435_v0 = vpack.c.bf16 %v3146_v9, %v3139_v13  ;;  %6768 = vmatmul.mubr.msk.f32.gmra.mrb[2].mxu1 %vm544_vm8, %v9854_v41 }
 0x231   :  { %8369 = vrot.lane.b32.xlu0 %v9904_v28, %s8547_s10  ;;  %v8182_v29 = vunpack.i.h.bf16 %v8180_v18  ;;  %v8181_v36 = vunpack.i.l.bf16 %v8180_v18  ;;  %3366 = vmatprep.mubr.f32.mxu1 %v8529_v2  ;;  %v9983_v62 = vpack.i.bf16 %v4895_v24, %v4894_v4 }
 0x232   :  { %v3134_v12 = vsel %vm3120_vm14, %v8162_v39, %v8177_v31  ;;  %v3127_v32 = vsel %vm3120_vm14, %v8157_v25, %v8176_v14  ;;  %7434 = vmatprep.subr.bf16.mxu0 %v7433_v15  ;;  %v4908_v25 = vld [vmem:[#allocation3 + $0x98] sm:$0xff]  ;;  %v4921_v14 = vld [vmem:[#allocation3 + $0x100] sm:$0xf] }
 0x233   :  { %8374 = vrot.lane.b32.xlu1 %v9916_v5, %s8547_s10  ;;  %v3115_v26 = vpop.permute.xlu0 %3114  ;;  %v7438_v17 = vpack.c.bf16 %v3134_v12, %v3127_v32  ;;  %v3141_v39 = vsel %vm3120_vm14, %v8167_v22, %v8181_v36  ;;  %v3148_v59 = vsel %vm3120_vm14, %v8172_v47, %v8182_v29  ;;  %7436 = vmatpush1.bf16.msra.mxu0 %v7435_v0  ;;  %v9989_v0 = vld [vmem:[#allocation3 + $0x68] sm:$0xff] }
 0x234   :  { %v3117_v7 = vpop.permute.xlu1 %3116  ;;  %v9936_v63 = vpack.i.bf16 %v4909_v51, %v4908_v25  ;;  %6769 = vmatmul.mubr.msk.f32.gmra.mrb[4].mxu1 %vm544_vm8, %v9894_v44  ;;  %v3153_v53 = vsel %vm3120_vm14, %v9872_v56, %v3115_v26  ;;  %v7441_v58 = vpack.c.bf16 %v3148_v59, %v3141_v39  ;;  %v8398_v32 = vpack.i.bf16 %v9541_v61, %v9989_v0  ;;  %v4924_v61 = vld [vmem:[#allocation3 + $0x118] sm:$0xf] }
 0x235   :  { %8379 = vrot.lane.b32.xlu0 %v9929_v3, %s8547_s10  ;;  %7439 = vmatpush3.bf16.msra.mxu1 %v7438_v17  ;;  %v3154_v30 = vsel %vm3120_vm14, %v3115_v26, %v3117_v7 }
 0x236   :  { %7440 = vmatprep.subr.bf16.mxu1 %v8540_v16  ;;  %6770 = vmatprep.subr.msk.mxu0 %vm634_vm9, %v3154_v30 }
 0x237   :  { %8384 = vrot.lane.b32.xlu1 %v9936_v63, %s8547_s10  ;;  %v9946_v46 = vpop.permute.xlu0 %8184  ;;  %6771 = vmatpush1.msk.msra.mxu0 %vm634_vm9, %v3153_v53 }
 0x238   :  { %v8187_v40 = vunpack.i.h.bf16 %v9946_v46  ;;  %v8186_v54 = vunpack.i.l.bf16 %v9946_v46  ;;  %7167 = vmatprep.mubr.msk.f32.mxu1 %vm8541_vm10, %v8529_v2  ;;  %v9956_v56 = vpop.permute.xlu1 %8189  ;;  %6772 = vmatmul.mubr.msk.f32.vlgmr.msra.gmra.mrb[6].mxu0 %vm544_vm8, %v9830_v8 }
 0x239   :  { %8389 = vrot.lane.b32.xlu0 %v9949_v21, %s8547_s10  ;;  %7442 = vmatpush3.bf16.msra.mxu1 %v7441_v58  ;;  %v8192_v34 = vunpack.i.h.bf16 %v9956_v56  ;;  %v8191_v33 = vunpack.i.l.bf16 %v9956_v56 }
 0x23a   :  { %7165 = vmatprep.subr.mxu1 %v8529_v2  ;;  %3443 = vmatprep.mubr.f32.mxu0 %v8529_v2  ;;  %v3765_v47 = vsel %vm3763_vm15, %v8186_v54, %v8187_v40 }
 0x23b   :  { %5035 = vrot.lane.b32.xlu1 %v4922_v57, %s8547_s10  ;;  %v8195_v22 = vpop.permute.xlu0 %8194  ;;  %v3772_v43 = vsel %vm3763_vm15, %v8191_v33, %v8192_v34 }
 0x23c   :  { %v8197_v1 = vunpack.i.h.bf16 %v8195_v22  ;;  %v8196_v23 = vunpack.i.l.bf16 %v8195_v22  ;;  %v3119_v13 = vpop.permute.xlu1 %3118  ;;  %v7443_v52 = vpack.c.bf16 %v3772_v43, %v3765_v47  ;;  %6773 = vmatmul.mubr.msk.f32.gmra.mrb[8].mxu0 %vm544_vm8, %v9854_v41 }
 0x23d   :  { %5037 = vrot.lane.b32.xlu0 %v4923_v27, %s8547_s10  ;;  %v3155_v31 = vsel %vm3120_vm14, %v3117_v7, %v3119_v13  ;;  %3449 = vmatprep.mubr.f32.mxu0 %v8529_v2 }
 0x23e   :  { %v3771_v19 = vsel %vm3763_vm15, %v8197_v1, %v8191_v33  ;;  %v3764_v9 = vsel %vm3763_vm15, %v8196_v23, %v8186_v54  ;;  %7166 = vmatpush3.msk.msra.mxu1 %vm634_vm9, %v3155_v31  ;;  %7444 = vmatprep.subr.bf16.mxu0 %v7443_v52 }
 0x23f   :  { %v7445_v50 = vpack.c.bf16 %v3771_v19, %v3764_v9  ;;  %5033 = vrot.lane.b32.xlu1 %v4921_v14, %s8547_s10  ;;  %v9980_v10 = vpop.permute.xlu0 %8199  ;;  %7168 = vmatmul.mubr.msk.f32.vlgmr.msra.gmra.mrb[30].mxu1 %vm544_vm8, %v9830_v8  ;;  %v4926_v9 = vld [vmem:[#allocation3 + $0x128] sm:$0xf] }
 0x240   :  { %v8202_v18 = vunpack.i.h.bf16 %v9980_v10  ;;  %v8201_v15 = vunpack.i.l.bf16 %v9980_v10  ;;  %v8205_v12 = vpop.permute.xlu1 %8204  ;;  %7170 = vmatprep.mubr.msk.f32.mxu1 %vm8541_vm10, %v8529_v2  ;;  %6774 = vmatmul.mubr.msk.f32.gmra.mrb[10].mxu0 %vm544_vm8, %v9894_v44  ;;  %v10066_v10 = vld [vmem:[%s11057_s1 + $0x78] sm:$0xff] }
 0x241   :  { %8394 = vrot.lane.b32.xlu0 %v9983_v62, %s8547_s10  ;;  %7446 = vmatpush1.bf16.msra.mxu0 %v7445_v50  ;;  %v8207_v29 = vunpack.i.h.bf16 %v8205_v12  ;;  %v8206_v36 = vunpack.i.l.bf16 %v8205_v12  ;;  %v4927_v50 = vld [vmem:[#allocation3 + $0x130] sm:$0xf] }
 0x242   :  { %v3779_v26 = vsel %vm3763_vm15, %v8201_v15, %v8202_v18  ;;  %3914 = vmatprep.mubr.f32.mxu0 %v8529_v2 }
 0x243   :  { %8399 = vrot.lane.b32.xlu1 %v8398_v32, %s8547_s10  ;;  %v9999_v8 = vpop.permute.xlu0 %8209  ;;  %7171 = vmatmul.mubr.msk.f32.gmra.mrb[32].mxu1 %vm544_vm8, %v9854_v41  ;;  %v3786_v17 = vsel %vm3763_vm15, %v8206_v36, %v8207_v29  ;;  %v4925_v41 = vld [vmem:[#allocation3 + $0x120] sm:$0xf] }
 0x244   :  { %v8212_v6 = vunpack.i.h.bf16 %v9999_v8  ;;  %v8211_v51 = vunpack.i.l.bf16 %v9999_v8  ;;  %v10010_v39 = vpop.permute.xlu1 %8214  ;;  %7173 = vmatprep.mubr.msk.f32.mxu1 %vm8541_vm10, %v8529_v2  ;;  %v7447_v59 = vpack.c.bf16 %v3786_v17, %v3779_v26  ;;  %v4928_v8 = vld [vmem:[#allocation3 + $0x138] sm:$0xf] }
 0x245   :  { %5039 = vrot.lane.b32.xlu0 %v4924_v61, %s8547_s10  ;;  %v8217_v25 = vunpack.i.h.bf16 %v10010_v39  ;;  %v8216_v38 = vunpack.i.l.bf16 %v10010_v39 }
 0x246   :  { %v3766_v7 = vsel %vm3763_vm15, %v8187_v40, %v8211_v51  ;;  %7448 = vmatprep.subr.bf16.mxu0 %v7447_v59  ;;  %v3767_v49 = vsel %vm3763_vm15, %v8211_v51, %v8212_v6 }
 0x247   :  { %5041 = vrot.lane.b32.xlu1 %v4925_v41, %s8547_s10  ;;  %v8220_v30 = vpop.permute.xlu0 %8219  ;;  %v3773_v53 = vsel %vm3763_vm15, %v8192_v34, %v8216_v38  ;;  %7174 = vmatmul.mubr.msk.f32.gmra.mrb[34].mxu1 %vm544_vm8, %v9894_v44  ;;  %v3774_v46 = vsel %vm3763_vm15, %v8216_v38, %v8217_v25 }
 0x248   :  { %v8222_v58 = vunpack.i.h.bf16 %v8220_v30  ;;  %v8221_v54 = vunpack.i.l.bf16 %v8220_v30  ;;  %v7453_v40 = vpack.c.bf16 %v3773_v53, %v3766_v7  ;;  %v10032_v33 = vpop.permute.xlu1 %8224  ;;  %v7451_v57 = vpack.c.bf16 %v3774_v46, %v3767_v49  ;;  %3997 = vmatprep.mubr.f32.mxu1 %v8529_v2  ;;  %v10105_v30 = vld [vmem:[%s11057_s1 + $0x88] sm:$0xff] }
 0x249   :  { %8404 = vrot.lane.b32.xlu0 %v9594_v20, %s8547_s10  ;;  %v8227_v22 = vunpack.i.h.bf16 %v10032_v33  ;;  %v8226_v44 = vunpack.i.l.bf16 %v10032_v33 }
 0x24a   :  { %v3785_v56 = vsel %vm3763_vm15, %v8222_v58, %v8206_v36  ;;  %v3778_v34 = vsel %vm3763_vm15, %v8221_v54, %v8201_v15  ;;  %7452 = vmatprep.subr.bf16.mxu1 %v7451_v57  ;;  %v10078_v36 = vld [vmem:[%s11057_s1 + $0x80] sm:$0xff] }
 0x24b   :  { %v7449_v1 = vpack.c.bf16 %v3785_v56, %v3778_v34  ;;  %8409 = vrot.lane.b32.xlu1 %v9611_v45, %s8547_s10  ;;  %v10043_v23 = vpop.permute.xlu0 %8229  ;;  %7454 = vmatpush1.bf16.msra.mxu1 %v7453_v40  ;;  %v3780_v43 = vsel %vm3763_vm15, %v8202_v18, %v8226_v44  ;;  %v3781_v45 = vsel %vm3763_vm15, %v8226_v44, %v8227_v22 }
 0x24c   :  { %v8232_v20 = vunpack.i.h.bf16 %v10043_v23  ;;  %v8231_v27 = vunpack.i.l.bf16 %v10043_v23  ;;  %v3750_v47 = vpop.permute.xlu1 %3749 }
 0x24d   :  { %8414 = vrot.lane.b32.xlu0 %v9622_v60, %s8547_s10  ;;  %7450 = vmatpush1.bf16.msra.mxu0 %v7449_v1 }
 0x24e   :  { %v3787_v4 = vsel %vm3763_vm15, %v8207_v29, %v8231_v27  ;;  %v3788_v24 = vsel %vm3763_vm15, %v8231_v27, %v8232_v20 }
 0x24f   :  { %v7457_v13 = vpack.c.bf16 %v3787_v4, %v3780_v43  ;;  %8419 = vrot.lane.b32.xlu1 %v9628_v48, %s8547_s10  ;;  %v3752_v52 = vpop.permute.xlu0 %3751  ;;  %v7455_v19 = vpack.c.bf16 %v3788_v24, %v3781_v45 }
 0x250   :  { %v3793_v60 = vsel %vm3763_vm15, %v3750_v47, %v3752_v52  ;;  %v3748_v31 = vpop.permute.xlu1 %3747 }
 0x251   :  { %5043 = vrot.lane.b32.xlu0 %v4926_v9, %s8547_s10  ;;  %6782 = vmatprep.subr.msk.mxu0 %vm634_vm9, %v3793_v60  ;;  %v3792_v14 = vsel %vm3763_vm15, %v3748_v31, %v3750_v47  ;;  %v5565_v60 = vld [vmem:[#allocation3 + $0x108] sm:$0xf] }
 0x252   :  { %7456 = vmatprep.subr.bf16.mxu1 %v7455_v19  ;;  %6783 = vmatpush1.msk.msra.mxu0 %vm634_vm9, %v3792_v14 }
 0x253   :  { %7458 = vmatpush1.bf16.msra.mxu1 %v7457_v13  ;;  %5045 = vrot.lane.b32.xlu1 %v4927_v50, %s8547_s10  ;;  %v8235_v48 = vpop.permute.xlu0 %8234 }
 0x254   :  { %v8237_v18 = vunpack.i.h.bf16 %v8235_v48  ;;  %v8236_v15 = vunpack.i.l.bf16 %v8235_v48  ;;  %v8240_v12 = vpop.permute.xlu1 %8239  ;;  %6784 = vmatmul.mubr.msk.f32.vlgmr.msra.gmra.mrb[0].mxu0 %vm544_vm8, %v10066_v10 }
 0x255   :  { %8424 = vrot.lane.b32.xlu0 %v9835_v37, %s8548_s17  ;;  %v8242_v32 = vunpack.i.h.bf16 %v8240_v12  ;;  %v8241_v29 = vunpack.i.l.bf16 %v8240_v12  ;;  %3920 = vmatprep.mubr.f32.mxu0 %v8529_v2 }
 0x256   :  { %v3768_v37 = vsel %vm3763_vm15, %v8212_v6, %v8236_v15  ;;  %v3769_v26 = vsel %vm3763_vm15, %v8236_v15, %v8237_v18 }
 0x257   :  { %8429 = vrot.lane.b32.xlu1 %v9844_v11, %s8548_s17  ;;  %v3754_v51 = vpop.permute.xlu0 %3753  ;;  %v3775_v61 = vsel %vm3763_vm15, %v8217_v25, %v8241_v29  ;;  %v3776_v17 = vsel %vm3763_vm15, %v8241_v29, %v8242_v32 }
 0x258   :  { %v7461_v59 = vpack.c.bf16 %v3775_v61, %v3768_v37  ;;  %v3756_v38 = vpop.permute.xlu1 %3755  ;;  %v7459_v41 = vpack.c.bf16 %v3776_v17, %v3769_v26  ;;  %6785 = vmatmul.mubr.msk.f32.gmra.mrb[2].mxu0 %vm544_vm8, %v10078_v36  ;;  %v3794_v6 = vsel %vm3763_vm15, %v3752_v52, %v3754_v51 }
 0x259   :  { %8434 = vrot.lane.b32.xlu0 %v9858_v42, %s8548_s17  ;;  %v3795_v11 = vsel %vm3763_vm15, %v3754_v51, %v3756_v38  ;;  %3926 = vmatprep.mubr.f32.mxu0 %v8529_v2  ;;  %v5564_v51 = vld [vmem:[#allocation3 + $0x100] sm:$0xf] }
 0x25a   :  { %6787 = vmatprep.subr.msk.mxu1 %vm634_vm9, %v3795_v11  ;;  %7460 = vmatprep.subr.bf16.mxu0 %v7459_v41 }
 0x25b   :  { %5047 = vrot.lane.b32.xlu1 %v4928_v8, %s8547_s10  ;;  %v8245_v39 = vpop.permute.xlu0 %8244  ;;  %6788 = vmatpush1.msk.msra.mxu1 %vm634_vm9, %v3794_v6  ;;  %v5568_v8 = vld [vmem:[#allocation3 + $0x120] sm:$0xf]  ;;  %v5546_v6 = vld [vmem:[#allocation3 + $0x70] sm:$0xff] }
 0x25c   :  { %v8247_v25 = vunpack.i.h.bf16 %v8245_v39  ;;  %v8246_v7 = vunpack.i.l.bf16 %v8245_v39  ;;  %7462 = vmatpush1.bf16.msra.mxu0 %v7461_v59  ;;  %v8250_v42 = vpop.permute.xlu1 %8249  ;;  %6789 = vmatmul.mubr.msk.f32.vlgmr.msra.gmra.mrb[0].mxu1 %vm544_vm8, %v10066_v10  ;;  %v5567_v59 = vld [vmem:[#allocation3 + $0x118] sm:$0xf] }
 0x25d   :  { %8439 = vrot.lane.b32.xlu0 %v9884_v35, %s8548_s17  ;;  %v8252_v49 = vunpack.i.h.bf16 %v8250_v42  ;;  %v8251_v53 = vunpack.i.l.bf16 %v8250_v42  ;;  %7467 = vmatprep.subr.bf16.mxu1 %v8540_v16 }
 0x25e   :  { %v3782_v58 = vsel %vm3763_vm15, %v8227_v22, %v8246_v7  ;;  %v3783_v54 = vsel %vm3763_vm15, %v8246_v7, %v8247_v25  ;;  %4003 = vmatprep.mubr.f32.mxu1 %v8529_v2  ;;  %6786 = vmatmul.mubr.msk.f32.gmra.mrb[4].mxu0 %vm544_vm8, %v10105_v30 }
 0x25f   :  { %8444 = vrot.lane.b32.xlu1 %v9889_v55, %s8548_s17  ;;  %v8255_v35 = vpop.permute.xlu0 %8254  ;;  %v3789_v46 = vsel %vm3763_vm15, %v8232_v20, %v8251_v53  ;;  %v3790_v56 = vsel %vm3763_vm15, %v8251_v53, %v8252_v49  ;;  %4080 = vmatprep.mubr.f32.mxu0 %v8529_v2  ;;  %v5554_v53 = vld [vmem:[#allocation3 + $0xb0] sm:$0xff] }
 0x260   :  { %v8257_v40 = vunpack.i.h.bf16 %v8255_v35  ;;  %v8256_v57 = vunpack.i.l.bf16 %v8255_v35  ;;  %v7465_v33 = vpack.c.bf16 %v3789_v46, %v3782_v58  ;;  %v8260_v34 = vpop.permute.xlu1 %8259  ;;  %v7463_v55 = vpack.c.bf16 %v3790_v56, %v3783_v54  ;;  %6790 = vmatmul.mubr.msk.f32.gmra.mrb[2].mxu1 %vm544_vm8, %v10078_v36 }
 0x261   :  { %8449 = vrot.lane.b32.xlu0 %v9904_v28, %s8548_s17  ;;  %v8262_v1 = vunpack.i.h.bf16 %v8260_v34  ;;  %v8261_v23 = vunpack.i.l.bf16 %v8260_v34  ;;  %4009 = vmatprep.mubr.f32.mxu1 %v8529_v2  ;;  %v8478_v35 = vpack.i.bf16 %v5546_v6, %v9989_v0 }
 0x262   :  { %v3777_v22 = vsel %vm3763_vm15, %v8242_v32, %v8257_v40  ;;  %v3770_v44 = vsel %vm3763_vm15, %v8237_v18, %v8256_v57  ;;  %7464 = vmatprep.subr.bf16.mxu0 %v7463_v55  ;;  %v5561_v40 = vld [vmem:[#allocation3 + $0xe8] sm:$0xff]  ;;  %v5562_v57 = vld [vmem:[#allocation3 + $0xf0] sm:$0xff] }
 0x263   :  { %v7468_v20 = vpack.c.bf16 %v3777_v22, %v3770_v44  ;;  %8454 = vrot.lane.b32.xlu1 %v9916_v5, %s8548_s17  ;;  %v3758_v27 = vpop.permute.xlu0 %3757  ;;  %v3784_v28 = vsel %vm3763_vm15, %v8247_v25, %v8261_v23  ;;  %v3791_v47 = vsel %vm3763_vm15, %v8252_v49, %v8262_v1  ;;  %7466 = vmatpush1.bf16.msra.mxu0 %v7465_v33  ;;  %v5553_v49 = vld [vmem:[#allocation3 + $0xa8] sm:$0xff]  ;;  %v5547_v1 = vld [vmem:[#allocation3 + $0x78] sm:$0xff] }
 0x264   :  { %v3760_v43 = vpop.permute.xlu1 %3759  ;;  %6791 = vmatmul.mubr.msk.f32.gmra.mrb[4].mxu1 %vm544_vm8, %v10105_v30  ;;  %v7471_v5 = vpack.c.bf16 %v3791_v47, %v3784_v28  ;;  %v3796_v45 = vsel %vm3763_vm15, %v3756_v38, %v3758_v27  ;;  %v971_v47 = vpop.f32.mrb[6].mxu1 }
 0x265   :  { %8459 = vrot.lane.b32.xlu0 %v9929_v3, %s8548_s17  ;;  %7469 = vmatpush3.bf16.msra.mxu1 %v7468_v20  ;;  %v3797_v4 = vsel %vm3763_vm15, %v3758_v27, %v3760_v43  ;;  %v8488_v27 = vpack.i.bf16 %v5562_v57, %v5561_v40  ;;  %v10282_v40 = vld [vmem:[%s11057_s1 + $0x98] sm:$0xff] }
 0x266   :  { %7470 = vmatprep.subr.bf16.mxu1 %v8540_v16  ;;  %6792 = vmatprep.subr.msk.mxu0 %vm634_vm9, %v3797_v4 }
 0x267   :  { %8464 = vrot.lane.b32.xlu1 %v9936_v63, %s8548_s17  ;;  %v10144_v24 = vpop.permute.xlu0 %8264  ;;  %6793 = vmatpush1.msk.msra.mxu0 %vm634_vm9, %v3796_v45  ;;  %v5539_v45 = vld [vmem:[#allocation3 + $0x38] sm:$0xff] }
 0x268   :  { %v8267_v3 = vunpack.i.h.bf16 %v10144_v24  ;;  %v8266_v13 = vunpack.i.l.bf16 %v10144_v24  ;;  %7186 = vmatprep.mubr.msk.f32.mxu1 %vm8541_vm10, %v8529_v2  ;;  %v10152_v52 = vpop.permute.xlu1 %8269  ;;  %6794 = vmatmul.mubr.msk.f32.vlgmr.msra.gmra.mrb[6].mxu0 %vm544_vm8, %v10066_v10  ;;  %v5563_v24 = vld [vmem:[#allocation3 + $0xf8] sm:$0xff] }
 0x269   :  { %8469 = vrot.lane.b32.xlu0 %v9949_v21, %s8548_s17  ;;  %7472 = vmatpush3.bf16.msra.mxu1 %v7471_v5  ;;  %v8272_v63 = vunpack.i.h.bf16 %v10152_v52  ;;  %v8271_v19 = vunpack.i.l.bf16 %v10152_v52  ;;  %v5566_v21 = vld [vmem:[#allocation3 + $0x110] sm:$0xf] }
 0x26a   :  { %7184 = vmatprep.subr.mxu1 %v8529_v2  ;;  %4086 = vmatprep.mubr.f32.mxu0 %v8529_v2  ;;  %v4408_v50 = vsel %vm4406_vm0, %v8266_v13, %v8267_v3 }
 0x26b   :  { %5678 = vrot.lane.b32.xlu1 %v5565_v60, %s8548_s17  ;;  %v8275_v9 = vpop.permute.xlu0 %8274  ;;  %v4415_v48 = vsel %vm4406_vm0, %v8271_v19, %v8272_v63 }
 0x26c   :  { %v8277_v31 = vunpack.i.h.bf16 %v8275_v9  ;;  %v8276_v14 = vunpack.i.l.bf16 %v8275_v9  ;;  %v3762_v18 = vpop.permute.xlu1 %3761  ;;  %v7473_v15 = vpack.c.bf16 %v4415_v48, %v4408_v50  ;;  %6795 = vmatmul.mubr.msk.f32.gmra.mrb[8].mxu0 %vm544_vm8, %v10078_v36 }
 0x26d   :  { %5680 = vrot.lane.b32.xlu0 %v5566_v21, %s8548_s17  ;;  %v3798_v29 = vsel %vm3763_vm15, %v3760_v43, %v3762_v18  ;;  %4092 = vmatprep.mubr.f32.mxu0 %v8529_v2 }
 0x26e   :  { %v4414_v12 = vsel %vm4406_vm0, %v8277_v31, %v8271_v19  ;;  %v4407_v32 = vsel %vm4406_vm0, %v8276_v14, %v8266_v13  ;;  %7185 = vmatpush3.msk.msra.mxu1 %vm634_vm9, %v3798_v29  ;;  %7474 = vmatprep.subr.bf16.mxu0 %v7473_v15  ;;  %v5555_v31 = vld [vmem:[#allocation3 + $0xb8] sm:$0xff] }
 0x26f   :  { %v7475_v37 = vpack.c.bf16 %v4414_v12, %v4407_v32  ;;  %5676 = vrot.lane.b32.xlu1 %v5564_v51, %s8548_s17  ;;  %v10176_v61 = vpop.permute.xlu0 %8279  ;;  %7187 = vmatmul.mubr.msk.f32.vlgmr.msra.gmra.mrb[36].mxu1 %vm544_vm8, %v10066_v10  ;;  %v8498_v50 = vpack.i.bf16 %v5563_v24, %v5555_v31 }
 0x270   :  { %v8282_v26 = vunpack.i.h.bf16 %v10176_v61  ;;  %v8281_v17 = vunpack.i.l.bf16 %v10176_v61  ;;  %v10183_v38 = vpop.permute.xlu1 %8284  ;;  %7189 = vmatprep.mubr.msk.f32.mxu1 %vm8541_vm10, %v8529_v2  ;;  %6796 = vmatmul.mubr.msk.f32.gmra.mrb[10].mxu0 %vm544_vm8, %v10105_v30 }
 0x271   :  { %5682 = vrot.lane.b32.xlu0 %v5567_v59, %s8548_s17  ;;  %7476 = vmatpush1.bf16.msra.mxu0 %v7475_v37  ;;  %v8287_v41 = vunpack.i.h.bf16 %v10183_v38  ;;  %v8286_v11 = vunpack.i.l.bf16 %v10183_v38 }
 0x272   :  { %v4422_v7 = vsel %vm4406_vm0, %v8281_v17, %v8282_v26  ;;  %4557 = vmatprep.mubr.f32.mxu0 %v8529_v2 }
 0x273   :  { %5684 = vrot.lane.b32.xlu1 %v5568_v8, %s8548_s17  ;;  %v10192_v10 = vpop.permute.xlu0 %8289  ;;  %7190 = vmatmul.mubr.msk.f32.gmra.mrb[38].mxu1 %vm544_vm8, %v10078_v36  ;;  %v4429_v42 = vsel %vm4406_vm0, %v8286_v11, %v8287_v41 }
 0x274   :  { %v8292_v39 = vunpack.i.h.bf16 %v10192_v10  ;;  %v8291_v25 = vunpack.i.l.bf16 %v10192_v10  ;;  %v10207_v58 = vpop.permute.xlu1 %8294  ;;  %7192 = vmatprep.mubr.msk.f32.mxu1 %vm8541_vm10, %v8529_v2  ;;  %v7477_v36 = vpack.c.bf16 %v4429_v42, %v4422_v7  ;;  %v5571_v42 = vld [vmem:[#allocation3 + $0x138] sm:$0xf] }
 0x275   :  { %8474 = vrot.lane.b32.xlu0 %v9983_v62, %s8548_s17  ;;  %v8297_v54 = vunpack.i.h.bf16 %v10207_v58  ;;  %v8296_v46 = vunpack.i.l.bf16 %v10207_v58  ;;  %v8483_v62 = vpack.i.bf16 %v5554_v53, %v5553_v49 }
 0x276   :  { %v4409_v56 = vsel %vm4406_vm0, %v8267_v3, %v8291_v25  ;;  %7478 = vmatprep.subr.bf16.mxu0 %v7477_v36  ;;  %v4410_v0 = vsel %vm4406_vm0, %v8291_v25, %v8292_v39  ;;  %v7093_v3 = vpop.f32.mrb[7].mxu1 }
 0x277   :  { %8479 = vrot.lane.b32.xlu1 %v8478_v35, %s8548_s17  ;;  %v8300_v33 = vpop.permute.xlu0 %8299  ;;  %v4416_v34 = vsel %vm4406_vm0, %v8272_v63, %v8296_v46  ;;  %7193 = vmatmul.mubr.msk.f32.gmra.mrb[40].mxu1 %vm544_vm8, %v10105_v30  ;;  %v4417_v44 = vsel %vm4406_vm0, %v8296_v46, %v8297_v54  ;;  %v8493_v63 = vpack.i.bf16 %v5547_v1, %v5539_v45  ;;  %v976_v19 = vpop.f32.mrb[8].mxu1 }
 0x278   :  { %v8302_v55 = vunpack.i.h.bf16 %v8300_v33  ;;  %v8301_v22 = vunpack.i.l.bf16 %v8300_v33  ;;  %v7483_v23 = vpack.c.bf16 %v4416_v34, %v4409_v56  ;;  %v7481_v28 = vpack.c.bf16 %v4417_v44, %v4410_v0  ;;  %4640 = vmatprep.mubr.f32.mxu1 %v8529_v2  ;;  %v7096_v14 = vpop.f32.mrb[9].mxu1 }
 0x279   :  { %v10231_v20 = vpop.permute.xlu1 %8304  ;;  %8484 = vrot.lane.b32.xlu0 %v8483_v62, %s8548_s17  ;;  %v981_v32 = vpop.f32.mrb[10].mxu1 }
 0x27a   :  { %v4428_v43 = vsel %vm4406_vm0, %v8302_v55, %v8286_v11  ;;  %v4421_v4 = vsel %vm4406_vm0, %v8301_v22, %v8281_v17  ;;  %v8307_v30 = vunpack.i.h.bf16 %v10231_v20  ;;  %v8306_v5 = vunpack.i.l.bf16 %v10231_v20  ;;  %7482 = vmatprep.subr.bf16.mxu1 %v7481_v28  ;;  %v7099_v61 = vpop.f32.mrb[11].mxu1  ;;  %v5569_v17 = vld [vmem:[#allocation3 + $0x128] sm:$0xf] }
 0x27b   :  { %v7479_v13 = vpack.c.bf16 %v4428_v43, %v4421_v4  ;;  %8489 = vrot.lane.b32.xlu1 %v8488_v27, %s8548_s17  ;;  %v10240_v52 = vpop.permute.xlu0 %8309  ;;  %7484 = vmatpush1.bf16.msra.mxu1 %v7483_v23  ;;  %v10265_v11 = vld [vmem:[%s11057_s1 + $0x90] sm:$0xff] }
 0x27c   :  { %v8312_v60 = vunpack.i.h.bf16 %v10240_v52  ;;  %v8311_v9 = vunpack.i.l.bf16 %v10240_v52  ;;  %v4423_v48 = vsel %vm4406_vm0, %v8282_v26, %v8306_v5  ;;  %v4424_v15 = vsel %vm4406_vm0, %v8306_v5, %v8307_v30 }
 0x27d   :  { %v4393_v21 = vpop.permute.xlu1 %4392  ;;  %8494 = vrot.lane.b32.xlu0 %v8493_v63, %s8548_s17  ;;  %7480 = vmatpush1.bf16.msra.mxu0 %v7479_v13 }
 0x27e   :  { %v4430_v18 = vsel %vm4406_vm0, %v8287_v41, %v8311_v9  ;;  %v4431_v12 = vsel %vm4406_vm0, %v8311_v9, %v8312_v60  ;;  %v5570_v41 = vld [vmem:[#allocation3 + $0x130] sm:$0xf] }
 0x27f   :  { %v7487_v29 = vpack.c.bf16 %v4430_v18, %v4423_v48  ;;  %8499 = vrot.lane.b32.xlu1 %v8498_v50, %s8548_s17  ;;  %v4395_v51 = vpop.permute.xlu0 %4394  ;;  %v7485_v37 = vpack.c.bf16 %v4431_v12, %v4424_v15 }
 0x280   :  { %v4436_v26 = vsel %vm4406_vm0, %v4393_v21, %v4395_v51 }
 0x281   :  { %v4391_v59 = vpop.permute.xlu1 %4390  ;;  %5686 = vrot.lane.b32.xlu0 %v5569_v17, %s8548_s17  ;;  %6804 = vmatprep.subr.msk.mxu0 %vm634_vm9, %v4436_v26 }
 0x282   :  { %v4435_v38 = vsel %vm4406_vm0, %v4391_v59, %v4393_v21  ;;  %7486 = vmatprep.subr.bf16.mxu1 %v7485_v37  ;;  %v1593_v6 = vpop.f32.mrb[12].mxu1 }
 0x283   :  { %7488 = vmatpush1.bf16.msra.mxu1 %v7487_v29  ;;  %5688 = vrot.lane.b32.xlu1 %v5570_v41, %s8548_s17  ;;  %v10268_v8 = vpop.permute.xlu0 %8314  ;;  %v10273_v49 = vadd.f32 %v1593_v6, %v971_v47  ;;  %v7112_v53 = vpop.f32.mrb[13].mxu1 }
 0x284   :  { %v8317_v25 = vunpack.i.h.bf16 %v10268_v8  ;;  %v8316_v7 = vunpack.i.l.bf16 %v10268_v8  ;;  %6805 = vmatpush1.msk.msra.mxu0 %vm634_vm9, %v4435_v38 }
 0x285   :  { %v8320_v35 = vpop.permute.xlu1 %8319  ;;  %5690 = vrot.lane.b32.xlu0 %v5571_v42, %s8548_s17  ;;  %6806 = vmatmul.mubr.msk.f32.vlgmr.msra.gmra.mrb[0].mxu0 %vm544_vm8, %v10265_v11 }
 0x286   :  { %v8322_v36 = vunpack.i.h.bf16 %v8320_v35  ;;  %v8321_v46 = vunpack.i.l.bf16 %v8320_v35  ;;  %4563 = vmatprep.mubr.f32.mxu0 %v8529_v2  ;;  %v4411_v57 = vsel %vm4406_vm0, %v8292_v39, %v8316_v7  ;;  %v1598_v33 = vpop.f32.mrb[14].mxu1  ;;  %v4412_v0 = vsel %vm4406_vm0, %v8316_v7, %v8317_v25 }
 0x287   :  { %v4397_v56 = vpop.permute.xlu0 %4396  ;;  %v10292_v55 = vadd.f32 %v1598_v33, %v976_v19  ;;  %v7115_v22 = vpop.f32.mrb[15].mxu1 }
 0x288   :  { %v4418_v62 = vsel %vm4406_vm0, %v8297_v54, %v8321_v46  ;;  %v4419_v34 = vsel %vm4406_vm0, %v8321_v46, %v8322_v36  ;;  %v4437_v39 = vsel %vm4406_vm0, %v4395_v51, %v4397_v56  ;;  %v10303_v54 = vld [vmem:[%s11057_s1 + $0xa0] sm:$0xff]  ;;  %v8549_v46 = vmov 0   ;;  %v6173_v22 = vld [vmem:[%s11058_s2 + $0x10] sm:$0xff] }
 0x289   :  { %v7491_v44 = vpack.c.bf16 %v4418_v62, %v4411_v57  ;;  %v4399_v1 = vpop.permute.xlu1 %4398  ;;  %v7489_v23 = vpack.c.bf16 %v4419_v34, %v4412_v0  ;;  %6807 = vmatmul.mubr.msk.f32.gmra.mrb[2].mxu0 %vm544_vm8, %v10282_v40  ;;  %8503 = vset.pattern.permute.xlu1 %v8549_v46  ;;  %v6171_v57 = vld [vmem:[%s11058_s2] sm:$0xff] }
 0x28a   :  { %v4438_v10 = vsel %vm4406_vm0, %v4397_v56, %v4399_v1  ;;  %4569 = vmatprep.mubr.f32.mxu0 %v8529_v2  ;;  %v1603_v27 = vpop.f32.mrb[16].mxu1  ;;  %6176 = vperm.xlu1 %8503, %v6171_v57   ;;  %v10427_v57 = vld [vmem:[%s11057_s1 + $0xb0] sm:$0xff] }
 0x28b   :  { %v8325_v58 = vpop.permute.xlu0 %8324  ;;  %6809 = vmatprep.subr.msk.mxu1 %vm634_vm9, %v4438_v10  ;;  %7490 = vmatprep.subr.bf16.mxu0 %v7489_v23  ;;  %v10306_v43 = vadd.f32 %v1603_v27, %v981_v32  ;;  %v7118_v4 = vpop.f32.mrb[17].mxu1  ;;  %v6172_v23 = vld [vmem:[%s11058_s2 + $0x8] sm:$0xff] }
 0x28c   :  { %v8327_v28 = vunpack.i.h.bf16 %v8325_v58  ;;  %v8326_v47 = vunpack.i.l.bf16 %v8325_v58  ;;  %6810 = vmatpush1.msk.msra.mxu1 %vm634_vm9, %v4437_v39  ;;  %7492 = vmatpush1.bf16.msra.mxu0 %v7491_v44 }
 0x28d   :  { %v8330_v5 = vpop.permute.xlu1 %8329  ;;  %6811 = vmatmul.mubr.msk.f32.vlgmr.msra.gmra.mrb[0].mxu1 %vm544_vm8, %v10265_v11  ;;  %7497 = vmatprep.subr.bf16.mxu1 %v8540_v16 }
 0x28e   :  { %v8332_v45 = vunpack.i.h.bf16 %v8330_v5  ;;  %v8331_v24 = vunpack.i.l.bf16 %v8330_v5  ;;  %4646 = vmatprep.mubr.f32.mxu1 %v8529_v2  ;;  %6808 = vmatmul.mubr.msk.f32.gmra.mrb[4].mxu0 %vm544_vm8, %v10303_v54  ;;  %v4425_v3 = vsel %vm4406_vm0, %v8307_v30, %v8326_v47  ;;  %v4426_v63 = vsel %vm4406_vm0, %v8326_v47, %v8327_v28 }
 0x28f   :  { %v8335_v13 = vpop.permute.xlu0 %8334  ;;  %4723 = vmatprep.mubr.f32.mxu0 %v8529_v2  ;;  %8504 = vset.pattern.permute.xlu0 %v8549_v46 }
 0x290   :  { %v4432_v19 = vsel %vm4406_vm0, %v8312_v60, %v8331_v24  ;;  %v8337_v9 = vunpack.i.h.bf16 %v8335_v13  ;;  %v8336_v31 = vunpack.i.l.bf16 %v8335_v13  ;;  %v4433_v14 = vsel %vm4406_vm0, %v8331_v24, %v8332_v45  ;;  %6186 = vperm.xlu1 %8503, %v6173_v22   ;;  %6181 = vperm.xlu0 %8504, %v6172_v23  }
 0x291   :  { %v7495_v21 = vpack.c.bf16 %v4432_v19, %v4425_v3  ;;  %v8340_v50 = vpop.permute.xlu1 %8339  ;;  %v7493_v48 = vpack.c.bf16 %v4433_v14, %v4426_v63  ;;  %6812 = vmatmul.mubr.msk.f32.gmra.mrb[2].mxu1 %vm544_vm8, %v10282_v40 }
 0x292   :  { %v4420_v20 = vsel %vm4406_vm0, %v8322_v36, %v8337_v9  ;;  %v4413_v30 = vsel %vm4406_vm0, %v8317_v25, %v8336_v31  ;;  %v8342_v18 = vunpack.i.h.bf16 %v8340_v50  ;;  %v8341_v15 = vunpack.i.l.bf16 %v8340_v50  ;;  %4652 = vmatprep.mubr.f32.mxu1 %v8529_v2 }
 0x293   :  { %v7498_v52 = vpack.c.bf16 %v4420_v20, %v4413_v30  ;;  %v4401_v60 = vpop.permute.xlu0 %4400  ;;  %7494 = vmatprep.subr.bf16.mxu0 %v7493_v48 }
 0x294   :  { %v4427_v12 = vsel %vm4406_vm0, %v8327_v28, %v8341_v15  ;;  %v4434_v32 = vsel %vm4406_vm0, %v8332_v45, %v8342_v18  ;;  %7496 = vmatpush1.bf16.msra.mxu0 %v7495_v21  ;;  %v4439_v61 = vsel %vm4406_vm0, %v4399_v1, %v4401_v60 }
 0x295   :  { %v4403_v29 = vpop.permute.xlu1 %4402  ;;  %7499 = vmatpush3.bf16.msra.mxu1 %v7498_v52  ;;  %v7501_v37 = vpack.c.bf16 %v4434_v32, %v4427_v12 }
 0x296   :  { %v4440_v51 = vsel %vm4406_vm0, %v4401_v60, %v4403_v29  ;;  %7500 = vmatprep.subr.bf16.mxu1 %v8540_v16  ;;  %6813 = vmatmul.mubr.msk.f32.gmra.mrb[4].mxu1 %vm544_vm8, %v10303_v54 }
 0x297   :  { %v10335_v26 = vpop.permute.xlu0 %8344  ;;  %6814 = vmatprep.subr.msk.mxu0 %vm634_vm9, %v4440_v51  ;;  %7205 = vmatprep.mubr.msk.f32.mxu1 %vm8541_vm10, %v8529_v2 }
 0x298   :  { %v8347_v17 = vunpack.i.h.bf16 %v10335_v26  ;;  %v8346_v59 = vunpack.i.l.bf16 %v10335_v26  ;;  %6815 = vmatpush1.msk.msra.mxu0 %vm634_vm9, %v4439_v61 }
 0x299   :  { %v8350_v38 = vpop.permute.xlu1 %8349  ;;  %7502 = vmatpush3.bf16.msra.mxu1 %v7501_v37  ;;  %6816 = vmatmul.mubr.msk.f32.vlgmr.msra.gmra.mrb[6].mxu0 %vm544_vm8, %v10265_v11 }
 0x29a   :  { %v8352_v41 = vunpack.i.h.bf16 %v8350_v38  ;;  %v8351_v8 = vunpack.i.l.bf16 %v8350_v38  ;;  %7203 = vmatprep.subr.mxu1 %v8529_v2  ;;  %4729 = vmatprep.mubr.f32.mxu0 %v8529_v2  ;;  %v5051_v25 = vsel %vm5049_vm1, %v8346_v59, %v8347_v17 }
 0x29b   :  { %v8355_v6 = vpop.permute.xlu0 %8354 }
 0x29c   :  { %v8357_v7 = vunpack.i.h.bf16 %v8355_v6  ;;  %v8356_v42 = vunpack.i.l.bf16 %v8355_v6  ;;  %v5058_v53 = vsel %vm5049_vm1, %v8351_v8, %v8352_v41 }
 0x29d   :  { %v4405_v35 = vpop.permute.xlu1 %4404  ;;  %v7503_v36 = vpack.c.bf16 %v5058_v53, %v5051_v25  ;;  %6817 = vmatmul.mubr.msk.f32.gmra.mrb[8].mxu0 %vm544_vm8, %v10282_v40 }
 0x29e   :  { %v5057_v56 = vsel %vm5049_vm1, %v8357_v7, %v8351_v8  ;;  %v5050_v33 = vsel %vm5049_vm1, %v8356_v42, %v8346_v59  ;;  %v4441_v62 = vsel %vm4406_vm0, %v4403_v29, %v4405_v35  ;;  %4735 = vmatprep.mubr.f32.mxu0 %v8529_v2  ;;  %v10414_v8 = vld [vmem:[%s11057_s1 + $0xa8] sm:$0xff] }
 0x29f   :  { %v7505_v0 = vpack.c.bf16 %v5057_v56, %v5050_v33  ;;  %v8360_v34 = vpop.permute.xlu0 %8359  ;;  %7204 = vmatpush3.msk.msra.mxu1 %vm634_vm9, %v4441_v62  ;;  %7504 = vmatprep.subr.bf16.mxu0 %v7503_v36 }
 0x2a0   :  { %v8362_v44 = vunpack.i.h.bf16 %v8360_v34  ;;  %v8361_v1 = vunpack.i.l.bf16 %v8360_v34  ;;  %7206 = vmatmul.mubr.msk.f32.vlgmr.msra.gmra.mrb[42].mxu1 %vm544_vm8, %v10265_v11 }
 0x2a1   :  { %v8365_v10 = vpop.permute.xlu1 %8364  ;;  %7506 = vmatpush1.bf16.msra.mxu0 %v7505_v0  ;;  %7208 = vmatprep.mubr.msk.f32.mxu1 %vm8541_vm10, %v8529_v2 }
 0x2a2   :  { %v8367_v39 = vunpack.i.h.bf16 %v8365_v10  ;;  %v8366_v58 = vunpack.i.l.bf16 %v8365_v10  ;;  %6818 = vmatmul.mubr.msk.f32.gmra.mrb[10].mxu0 %vm544_vm8, %v10303_v54  ;;  %v5065_v47 = vsel %vm5049_vm1, %v8361_v1, %v8362_v44 }
 0x2a3   :  { %v10371_v27 = vpop.permute.xlu0 %8369  ;;  %5200 = vmatprep.mubr.f32.mxu0 %v8529_v2 }
 0x2a4   :  { %v8372_v11 = vunpack.i.h.bf16 %v10371_v27  ;;  %v8371_v28 = vunpack.i.l.bf16 %v10371_v27  ;;  %7209 = vmatmul.mubr.msk.f32.gmra.mrb[44].mxu1 %vm544_vm8, %v10282_v40  ;;  %v5072_v4 = vsel %vm5049_vm1, %v8366_v58, %v8367_v39 }
 0x2a5   :  { %v8375_v5 = vpop.permute.xlu1 %8374  ;;  %7211 = vmatprep.mubr.msk.f32.mxu1 %vm8541_vm10, %v8529_v2  ;;  %v7507_v45 = vpack.c.bf16 %v5072_v4, %v5065_v47  ;;  %v10447_v47 = vld [vmem:[%s11057_s1 + $0xb8] sm:$0xff] }
 0x2a6   :  { %v8377_v24 = vunpack.i.h.bf16 %v8375_v5  ;;  %v8376_v3 = vunpack.i.l.bf16 %v8375_v5  ;;  %v5052_v13 = vsel %vm5049_vm1, %v8347_v17, %v8371_v28  ;;  %v5053_v19 = vsel %vm5049_vm1, %v8371_v28, %v8372_v11 }
 0x2a7   :  { %v8380_v63 = vpop.permute.xlu0 %8379  ;;  %7508 = vmatprep.subr.bf16.mxu0 %v7507_v45 }
 0x2a8   :  { %v5059_v40 = vsel %vm5049_vm1, %v8352_v41, %v8376_v3  ;;  %v8382_v9 = vunpack.i.h.bf16 %v8380_v63  ;;  %v8381_v31 = vunpack.i.l.bf16 %v8380_v63  ;;  %7212 = vmatmul.mubr.msk.f32.gmra.mrb[46].mxu1 %vm544_vm8, %v10303_v54  ;;  %v5060_v14 = vsel %vm5049_vm1, %v8376_v3, %v8377_v24 }
 0x2a9   :  { %v7513_v21 = vpack.c.bf16 %v5059_v40, %v5052_v13  ;;  %v10390_v50 = vpop.permute.xlu1 %8384  ;;  %v7511_v48 = vpack.c.bf16 %v5060_v14, %v5053_v19  ;;  %5283 = vmatprep.mubr.f32.mxu1 %v8529_v2 }
 0x2aa   :  { %v5071_v20 = vsel %vm5049_vm1, %v8382_v9, %v8366_v58  ;;  %v5064_v30 = vsel %vm5049_vm1, %v8381_v31, %v8361_v1  ;;  %v8387_v18 = vunpack.i.h.bf16 %v10390_v50  ;;  %v8386_v15 = vunpack.i.l.bf16 %v10390_v50 }
 0x2ab   :  { %v7509_v52 = vpack.c.bf16 %v5071_v20, %v5064_v30  ;;  %v10397_v60 = vpop.permute.xlu0 %8389  ;;  %7512 = vmatprep.subr.bf16.mxu1 %v7511_v48 }
 0x2ac   :  { %v8392_v54 = vunpack.i.h.bf16 %v10397_v60  ;;  %v8391_v12 = vunpack.i.l.bf16 %v10397_v60  ;;  %7514 = vmatpush1.bf16.msra.mxu1 %v7513_v21  ;;  %v5066_v29 = vsel %vm5049_vm1, %v8362_v44, %v8386_v15  ;;  %v5067_v37 = vsel %vm5049_vm1, %v8386_v15, %v8387_v18 }
 0x2ad   :  { %v5036_v32 = vpop.permute.xlu1 %5035  ;;  %7510 = vmatpush1.bf16.msra.mxu0 %v7509_v52 }
 0x2ae   :  { %v5073_v51 = vsel %vm5049_vm1, %v8367_v39, %v8391_v12  ;;  %v5074_v61 = vsel %vm5049_vm1, %v8391_v12, %v8392_v54 }
 0x2af   :  { %v7517_v26 = vpack.c.bf16 %v5073_v51, %v5066_v29  ;;  %v5038_v17 = vpop.permute.xlu0 %5037  ;;  %v7515_v59 = vpack.c.bf16 %v5074_v61, %v5067_v37 }
 0x2b0   :  { %v5079_v38 = vsel %vm5049_vm1, %v5036_v32, %v5038_v17 }
 0x2b1   :  { %v5034_v41 = vpop.permute.xlu1 %5033  ;;  %6826 = vmatprep.subr.msk.mxu0 %vm634_vm9, %v5079_v38  ;;  %7516 = vmatprep.subr.bf16.mxu1 %v7515_v59 }
 0x2b2   :  { %v5078_v6 = vsel %vm5049_vm1, %v5034_v41, %v5036_v32  ;;  %7518 = vmatpush1.bf16.msra.mxu1 %v7517_v26 }
 0x2b3   :  { %v8395_v25 = vpop.permute.xlu0 %8394  ;;  %6827 = vmatpush1.msk.msra.mxu0 %vm634_vm9, %v5078_v6  ;;  %v2236_v7 = vpop.f32.mrb[18].mxu1 }
 0x2b4   :  { %v8397_v42 = vunpack.i.h.bf16 %v8395_v25  ;;  %v8396_v53 = vunpack.i.l.bf16 %v8395_v25  ;;  %6828 = vmatmul.mubr.msk.f32.vlgmr.msra.gmra.mrb[0].mxu0 %vm544_vm8, %v10414_v8  ;;  %v10421_v35 = vadd.f32 %v2236_v7, %v10273_v49  ;;  %v7131_v36 = vpop.f32.mrb[19].mxu1 }
 0x2b5   :  { %v8400_v46 = vpop.permute.xlu1 %8399  ;;  %5206 = vmatprep.mubr.f32.mxu0 %v8529_v2 }
 0x2b6   :  { %v8402_v56 = vunpack.i.h.bf16 %v8400_v46  ;;  %v8401_v33 = vunpack.i.l.bf16 %v8400_v46  ;;  %v5054_v62 = vsel %vm5049_vm1, %v8372_v11, %v8396_v53  ;;  %v5055_v22 = vsel %vm5049_vm1, %v8396_v53, %v8397_v42 }
 0x2b7   :  { %v5040_v0 = vpop.permute.xlu0 %5039  ;;  %v2241_v34 = vpop.f32.mrb[20].mxu1 }
 0x2b8   :  { %v5061_v49 = vsel %vm5049_vm1, %v8377_v24, %v8401_v33  ;;  %v5062_v44 = vsel %vm5049_vm1, %v8401_v33, %v8402_v56  ;;  %6829 = vmatmul.mubr.msk.f32.gmra.mrb[2].mxu0 %vm544_vm8, %v10427_v57  ;;  %v10438_v1 = vadd.f32 %v2241_v34, %v10292_v55  ;;  %v7134_v23 = vpop.f32.mrb[21].mxu1  ;;  %v5080_v11 = vsel %vm5049_vm1, %v5038_v17, %v5040_v0 }
 0x2b9   :  { %v7521_v10 = vpack.c.bf16 %v5061_v49, %v5054_v62  ;;  %v5042_v39 = vpop.permute.xlu1 %5041  ;;  %v7519_v58 = vpack.c.bf16 %v5062_v44, %v5055_v22  ;;  %5212 = vmatprep.mubr.f32.mxu0 %v8529_v2 }
 0x2ba   :  { %v5081_v27 = vsel %vm5049_vm1, %v5040_v0, %v5042_v39 }
 0x2bb   :  { %v8405_v28 = vpop.permute.xlu0 %8404  ;;  %6831 = vmatprep.subr.msk.mxu1 %vm634_vm9, %v5081_v27  ;;  %7520 = vmatprep.subr.bf16.mxu0 %v7519_v58  ;;  %v2246_v55 = vpop.f32.mrb[22].mxu1 }
 0x2bc   :  { %v8407_v4 = vunpack.i.h.bf16 %v8405_v28  ;;  %v8406_v5 = vunpack.i.l.bf16 %v8405_v28  ;;  %6832 = vmatpush1.msk.msra.mxu1 %vm634_vm9, %v5080_v11  ;;  %7522 = vmatpush1.bf16.msra.mxu0 %v7521_v10  ;;  %v10451_v45 = vadd.f32 %v2246_v55, %v10306_v43  ;;  %v7137_v24 = vpop.f32.mrb[23].mxu1 }
 0x2bd   :  { %v8410_v3 = vpop.permute.xlu1 %8409  ;;  %6833 = vmatmul.mubr.msk.f32.vlgmr.msra.gmra.mrb[0].mxu1 %vm544_vm8, %v10414_v8  ;;  %7527 = vmatprep.subr.bf16.mxu1 %v8540_v16 }
 0x2be   :  { %v8412_v13 = vunpack.i.h.bf16 %v8410_v3  ;;  %v8411_v63 = vunpack.i.l.bf16 %v8410_v3  ;;  %5289 = vmatprep.mubr.f32.mxu1 %v8529_v2  ;;  %6830 = vmatmul.mubr.msk.f32.gmra.mrb[4].mxu0 %vm544_vm8, %v10447_v47  ;;  %v5068_v19 = vsel %vm5049_vm1, %v8387_v18, %v8406_v5  ;;  %v5069_v40 = vsel %vm5049_vm1, %v8406_v5, %v8407_v4 }
 0x2bf   :  { %v8415_v43 = vpop.permute.xlu0 %8414  ;;  %5366 = vmatprep.mubr.f32.mxu0 %v8529_v2 }
 0x2c0   :  { %v5075_v9 = vsel %vm5049_vm1, %v8392_v54, %v8411_v63  ;;  %v8417_v31 = vunpack.i.h.bf16 %v8415_v43  ;;  %v8416_v14 = vunpack.i.l.bf16 %v8415_v43  ;;  %v5076_v21 = vsel %vm5049_vm1, %v8411_v63, %v8412_v13 }
 0x2c1   :  { %v7525_v48 = vpack.c.bf16 %v5075_v9, %v5068_v19  ;;  %v8420_v20 = vpop.permute.xlu1 %8419  ;;  %v7523_v30 = vpack.c.bf16 %v5076_v21, %v5069_v40  ;;  %6834 = vmatmul.mubr.msk.f32.gmra.mrb[2].mxu1 %vm544_vm8, %v10427_v57 }
 0x2c2   :  { %v5063_v50 = vsel %vm5049_vm1, %v8402_v56, %v8417_v31  ;;  %v5056_v18 = vsel %vm5049_vm1, %v8397_v42, %v8416_v14  ;;  %v8422_v15 = vunpack.i.h.bf16 %v8420_v20  ;;  %v8421_v52 = vunpack.i.l.bf16 %v8420_v20  ;;  %5295 = vmatprep.mubr.f32.mxu1 %v8529_v2 }
 0x2c3   :  { %v7528_v60 = vpack.c.bf16 %v5063_v50, %v5056_v18  ;;  %v5044_v54 = vpop.permute.xlu0 %5043  ;;  %7524 = vmatprep.subr.bf16.mxu0 %v7523_v30 }
 0x2c4   :  { %v5070_v12 = vsel %vm5049_vm1, %v8407_v4, %v8421_v52  ;;  %v5077_v32 = vsel %vm5049_vm1, %v8412_v13, %v8422_v15  ;;  %7526 = vmatpush1.bf16.msra.mxu0 %v7525_v48  ;;  %v5082_v61 = vsel %vm5049_vm1, %v5042_v39, %v5044_v54 }
 0x2c5   :  { %v5046_v29 = vpop.permute.xlu1 %5045  ;;  %7529 = vmatpush3.bf16.msra.mxu1 %v7528_v60  ;;  %v7531_v37 = vpack.c.bf16 %v5077_v32, %v5070_v12 }
 0x2c6   :  { %v5083_v51 = vsel %vm5049_vm1, %v5044_v54, %v5046_v29  ;;  %7530 = vmatprep.subr.bf16.mxu1 %v8540_v16  ;;  %6835 = vmatmul.mubr.msk.f32.gmra.mrb[4].mxu1 %vm544_vm8, %v10447_v47 }
 0x2c7   :  { %v8425_v26 = vpop.permute.xlu0 %8424  ;;  %6836 = vmatprep.subr.msk.mxu0 %vm634_vm9, %v5083_v51  ;;  %7224 = vmatprep.mubr.msk.f32.mxu1 %vm8541_vm10, %v8529_v2 }
 0x2c8   :  { %v8427_v17 = vunpack.i.h.bf16 %v8425_v26  ;;  %v8426_v59 = vunpack.i.l.bf16 %v8425_v26  ;;  %6837 = vmatpush1.msk.msra.mxu0 %vm634_vm9, %v5082_v61 }
 0x2c9   :  { %v8430_v38 = vpop.permute.xlu1 %8429  ;;  %7532 = vmatpush3.bf16.msra.mxu1 %v7531_v37  ;;  %6838 = vmatmul.mubr.msk.f32.vlgmr.msra.gmra.mrb[6].mxu0 %vm544_vm8, %v10414_v8 }
 0x2ca   :  { %v8432_v41 = vunpack.i.h.bf16 %v8430_v38  ;;  %v8431_v6 = vunpack.i.l.bf16 %v8430_v38  ;;  %7222 = vmatprep.subr.mxu1 %v8529_v2  ;;  %5372 = vmatprep.mubr.f32.mxu0 %v8529_v2  ;;  %v5694_v53 = vsel %vm5692_vm2, %v8426_v59, %v8427_v17 }
 0x2cb   :  { %v8435_v25 = vpop.permute.xlu0 %8434 }
 0x2cc   :  { %v8437_v7 = vunpack.i.h.bf16 %v8435_v25  ;;  %v8436_v42 = vunpack.i.l.bf16 %v8435_v25  ;;  %v5701_v36 = vsel %vm5692_vm2, %v8431_v6, %v8432_v41 }
 0x2cd   :  { %v5048_v46 = vpop.permute.xlu1 %5047  ;;  %v7533_v56 = vpack.c.bf16 %v5701_v36, %v5694_v53  ;;  %6839 = vmatmul.mubr.msk.f32.gmra.mrb[8].mxu0 %vm544_vm8, %v10427_v57 }
 0x2ce   :  { %v5700_v33 = vsel %vm5692_vm2, %v8437_v7, %v8431_v6  ;;  %v5693_v62 = vsel %vm5692_vm2, %v8436_v42, %v8426_v59  ;;  %v5084_v0 = vsel %vm5049_vm1, %v5046_v29, %v5048_v46  ;;  %5378 = vmatprep.mubr.f32.mxu0 %v8529_v2  ;;  %v10567_v42 = vld [vmem:[%s11057_s1 + $0xc8] sm:$0xff] }
 0x2cf   :  { %v7535_v34 = vpack.c.bf16 %v5700_v33, %v5693_v62  ;;  %v8440_v49 = vpop.permute.xlu0 %8439  ;;  %7223 = vmatpush3.msk.msra.mxu1 %vm634_vm9, %v5084_v0  ;;  %7534 = vmatprep.subr.bf16.mxu0 %v7533_v56 }
 0x2d0   :  { %v8442_v22 = vunpack.i.h.bf16 %v8440_v49  ;;  %v8441_v44 = vunpack.i.l.bf16 %v8440_v49  ;;  %7225 = vmatmul.mubr.msk.f32.vlgmr.msra.gmra.mrb[48].mxu1 %vm544_vm8, %v10414_v8  ;;  %v10585_v49 = vld [vmem:[%s11057_s1 + $0xd0] sm:$0xff] }
 0x2d1   :  { %v8445_v23 = vpop.permute.xlu1 %8444  ;;  %7536 = vmatpush1.bf16.msra.mxu0 %v7535_v34  ;;  %7227 = vmatprep.mubr.msk.f32.mxu1 %vm8541_vm10, %v8529_v2 }
 0x2d2   :  { %v8447_v10 = vunpack.i.h.bf16 %v8445_v23  ;;  %v8446_v39 = vunpack.i.l.bf16 %v8445_v23  ;;  %6840 = vmatmul.mubr.msk.f32.gmra.mrb[10].mxu0 %vm544_vm8, %v10447_v47  ;;  %v5708_v8 = vsel %vm5692_vm2, %v8441_v44, %v8442_v22 }
 0x2d3   :  { %v10503_v58 = vpop.permute.xlu0 %8449  ;;  %5843 = vmatprep.mubr.f32.mxu0 %v8529_v2 }
 0x2d4   :  { %v8452_v27 = vunpack.i.h.bf16 %v10503_v58  ;;  %v8451_v11 = vunpack.i.l.bf16 %v10503_v58  ;;  %7228 = vmatmul.mubr.msk.f32.gmra.mrb[50].mxu1 %vm544_vm8, %v10427_v57  ;;  %v5715_v28 = vsel %vm5692_vm2, %v8446_v39, %v8447_v10 }
 0x2d5   :  { %v10512_v55 = vpop.permute.xlu1 %8454  ;;  %7230 = vmatprep.mubr.msk.f32.mxu1 %vm8541_vm10, %v8529_v2  ;;  %v7537_v4 = vpack.c.bf16 %v5715_v28, %v5708_v8 }
 0x2d6   :  { %v8457_v5 = vunpack.i.h.bf16 %v10512_v55  ;;  %v8456_v24 = vunpack.i.l.bf16 %v10512_v55  ;;  %v5695_v3 = vsel %vm5692_vm2, %v8427_v17, %v8451_v11  ;;  %v5696_v57 = vsel %vm5692_vm2, %v8451_v11, %v8452_v27  ;;  %v10552_v17 = vld [vmem:[%s11057_s1 + $0xc0] sm:$0xff] }
 0x2d7   :  { %v8460_v13 = vpop.permute.xlu0 %8459  ;;  %7538 = vmatprep.subr.bf16.mxu0 %v7537_v4 }
 0x2d8   :  { %v5702_v63 = vsel %vm5692_vm2, %v8432_v41, %v8456_v24  ;;  %v8462_v19 = vunpack.i.h.bf16 %v8460_v13  ;;  %v8461_v43 = vunpack.i.l.bf16 %v8460_v13  ;;  %7231 = vmatmul.mubr.msk.f32.gmra.mrb[52].mxu1 %vm544_vm8, %v10447_v47  ;;  %v5703_v40 = vsel %vm5692_vm2, %v8456_v24, %v8457_v5 }
 0x2d9   :  { %v7543_v9 = vpack.c.bf16 %v5702_v63, %v5695_v3  ;;  %v10528_v31 = vpop.permute.xlu1 %8464  ;;  %v7541_v14 = vpack.c.bf16 %v5703_v40, %v5696_v57  ;;  %5926 = vmatprep.mubr.f32.mxu1 %v8529_v2 }
 0x2da   :  { %v5714_v21 = vsel %vm5692_vm2, %v8462_v19, %v8446_v39  ;;  %v5707_v48 = vsel %vm5692_vm2, %v8461_v43, %v8441_v44  ;;  %v8467_v20 = vunpack.i.h.bf16 %v10528_v31  ;;  %v8466_v30 = vunpack.i.l.bf16 %v10528_v31 }
 0x2db   :  { %v7539_v50 = vpack.c.bf16 %v5714_v21, %v5707_v48  ;;  %v10535_v47 = vpop.permute.xlu0 %8469  ;;  %7542 = vmatprep.subr.bf16.mxu1 %v7541_v14 }
 0x2dc   :  { %v8472_v18 = vunpack.i.h.bf16 %v10535_v47  ;;  %v8471_v15 = vunpack.i.l.bf16 %v10535_v47  ;;  %7544 = vmatpush1.bf16.msra.mxu1 %v7543_v9  ;;  %v5709_v60 = vsel %vm5692_vm2, %v8442_v22, %v8466_v30  ;;  %v5710_v12 = vsel %vm5692_vm2, %v8466_v30, %v8467_v20 }
 0x2dd   :  { %v5679_v52 = vpop.permute.xlu1 %5678  ;;  %7540 = vmatpush1.bf16.msra.mxu0 %v7539_v50 }
 0x2de   :  { %v5716_v54 = vsel %vm5692_vm2, %v8447_v10, %v8471_v15  ;;  %v5717_v32 = vsel %vm5692_vm2, %v8471_v15, %v8472_v18 }
 0x2df   :  { %v7547_v29 = vpack.c.bf16 %v5716_v54, %v5709_v60  ;;  %v5681_v51 = vpop.permute.xlu0 %5680  ;;  %v7545_v37 = vpack.c.bf16 %v5717_v32, %v5710_v12 }
 0x2e0   :  { %v5722_v61 = vsel %vm5692_vm2, %v5679_v52, %v5681_v51 }
 0x2e1   :  { %v5677_v26 = vpop.permute.xlu1 %5676  ;;  %6848 = vmatprep.subr.msk.mxu0 %vm634_vm9, %v5722_v61  ;;  %7546 = vmatprep.subr.bf16.mxu1 %v7545_v37  ;;  %v6247_v37 = vld [vmem:[%s11059_s3 + $0x80] sm:$0xff]  ;;  %v6248_v61 = vld [vmem:[%s11059_s3 + $0x88] sm:$0xff] }
 0x2e2   :  { %v5721_v59 = vsel %vm5692_vm2, %v5677_v26, %v5679_v52  ;;  %7548 = vmatpush1.bf16.msra.mxu1 %v7547_v29  ;;  %v6231_v26 = vld [vmem:[%s11059_s3] sm:$0xff] }
 0x2e3   :  { %v5683_v38 = vpop.permute.xlu0 %5682  ;;  %6849 = vmatpush1.msk.msra.mxu0 %vm634_vm9, %v5721_v59  ;;  %v2879_v41 = vpop.f32.mrb[24].mxu1  ;;  %v7563_v59 = vpack.c.bf16 %v6248_v61, %v6247_v37  ;;  %v6257_v37 = vld [vmem:[%s11059_s3 + $0xd0] sm:$0xff]  ;;  %v6258_v61 = vld [vmem:[%s11059_s3 + $0xd8] sm:$0xff] }
 0x2e4   :  { %6850 = vmatmul.mubr.msk.f32.vlgmr.msra.gmra.mrb[0].mxu0 %vm544_vm8, %v10552_v17  ;;  %v10559_v6 = vadd.f32 %v2879_v41, %v10421_v35  ;;  %v7150_v25 = vpop.f32.mrb[25].mxu1  ;;  %v5723_v36 = vsel %vm5692_vm2, %v5681_v51, %v5683_v38  ;;  %v6249_v41 = vld [vmem:[%s11059_s3 + $0x90] sm:$0xff] }
 0x2e5   :  { %v10561_v7 = vpop.permute.xlu1 %5684  ;;  %5849 = vmatprep.mubr.f32.mxu0 %v8529_v2  ;;  %v6250_v25 = vld [vmem:[%s11059_s3 + $0x98] sm:$0xff] }
 0x2e6   :  { %v5724_v53 = vsel %vm5692_vm2, %v5683_v38, %v10561_v7  ;;  %v6232_v38 = vld [vmem:[%s11059_s3 + $0x8] sm:$0xff] }
 0x2e7   :  { %v8475_v46 = vpop.permute.xlu0 %8474  ;;  %6853 = vmatprep.subr.msk.mxu1 %vm634_vm9, %v5724_v53  ;;  %v2884_v35 = vpop.f32.mrb[26].mxu1  ;;  %v6233_v53 = vld [vmem:[%s11059_s3 + $0x10] sm:$0xff] }
 0x2e8   :  { %v8477_v56 = vunpack.i.h.bf16 %v8475_v46  ;;  %v8476_v33 = vunpack.i.l.bf16 %v8475_v46  ;;  %6851 = vmatmul.mubr.msk.f32.gmra.mrb[2].mxu0 %vm544_vm8, %v10567_v42  ;;  %6854 = vmatpush1.msk.msra.mxu1 %vm634_vm9, %v5723_v36  ;;  %v10577_v62 = vadd.f32 %v2884_v35, %v10438_v1  ;;  %v7153_v0 = vpop.f32.mrb[27].mxu1  ;;  %v6234_v36 = vld [vmem:[%s11059_s3 + $0x18] sm:$0xff]  ;;  %v6279_v46 = vld [vmem:[%s11059_s3 + $0x180] sm:$0xff]  ;;  %v6280_v35 = vld [vmem:[%s11059_s3 + $0x188] sm:$0xff] }
 0x2e9   :  { %v8480_v34 = vpop.permute.xlu1 %8479  ;;  %6855 = vmatmul.mubr.msk.f32.vlgmr.msra.gmra.mrb[0].mxu1 %vm544_vm8, %v10552_v17  ;;  %5855 = vmatprep.mubr.f32.mxu0 %v8529_v2 }
 0x2ea   :  { %v8482_v22 = vunpack.i.h.bf16 %v8480_v34  ;;  %v8481_v44 = vunpack.i.l.bf16 %v8480_v34  ;;  %5932 = vmatprep.mubr.f32.mxu1 %v8529_v2  ;;  %7557 = vmatprep.subr.bf16.mxu1 %v8540_v16  ;;  %v5697_v1 = vsel %vm5692_vm2, %v8452_v27, %v8476_v33  ;;  %v5698_v10 = vsel %vm5692_vm2, %v8476_v33, %v8477_v56 }
 0x2eb   :  { %v8485_v23 = vpop.permute.xlu0 %8484  ;;  %v2889_v39 = vpop.f32.mrb[28].mxu1  ;;  %v7569_v33 = vpack.c.bf16 %v6234_v36, %v6233_v53  ;;  %v6271_v53 = vld [vmem:[%s11059_s3 + $0x140] sm:$0xff]  ;;  %v6272_v36 = vld [vmem:[%s11059_s3 + $0x148] sm:$0xff] }
 0x2ec   :  { %v5704_v11 = vsel %vm5692_vm2, %v8457_v5, %v8481_v44  ;;  %v8487_v8 = vunpack.i.h.bf16 %v8485_v23  ;;  %v8486_v28 = vunpack.i.l.bf16 %v8485_v23  ;;  %6852 = vmatmul.mubr.msk.f32.gmra.mrb[4].mxu0 %vm544_vm8, %v10585_v49  ;;  %v5705_v4 = vsel %vm5692_vm2, %v8481_v44, %v8482_v22  ;;  %v7156_v24 = vpop.f32.mrb[29].mxu1 }
 0x2ed   :  { %v7551_v3 = vpack.c.bf16 %v5704_v11, %v5697_v1  ;;  %v8490_v58 = vpop.permute.xlu1 %8489  ;;  %6856 = vmatmul.mubr.msk.f32.gmra.mrb[2].mxu1 %vm544_vm8, %v10567_v42  ;;  %v7549_v27 = vpack.c.bf16 %v5705_v4, %v5698_v10  ;;  %6009 = vmatprep.mubr.f32.mxu0 %v8529_v2  ;;  %v10603_v55 = vadd.f32 %v2889_v39, %v10451_v45  ;;  %v6251_v11 = vld [vmem:[%s11059_s3 + $0xa0] sm:$0xff]  ;;  %v6236_v4 = vld [vmem:[%s11059_s3 + $0x28] sm:$0xff] }
 0x2ee   :  { %v8492_v5 = vunpack.i.h.bf16 %v8490_v58  ;;  %v8491_v13 = vunpack.i.l.bf16 %v8490_v58  ;;  %5938 = vmatprep.mubr.f32.mxu1 %v8529_v2  ;;  %v5711_v57 = vsel %vm5692_vm2, %v8467_v20, %v8486_v28  ;;  %v5712_v19 = vsel %vm5692_vm2, %v8486_v28, %v8487_v8  ;;  %v6235_v28 = vld [vmem:[%s11059_s3 + $0x20] sm:$0xff]  ;;  %v6281_v58 = vld [vmem:[%s11059_s3 + $0x190] sm:$0xff] }
 0x2ef   :  { %v8495_v63 = vpop.permute.xlu0 %8494  ;;  %7550 = vmatprep.subr.bf16.mxu0 %v7549_v27  ;;  %v6282_v27 = vld [vmem:[%s11059_s3 + $0x198] sm:$0xff] }
 0x2f0   :  { %v5718_v43 = vsel %vm5692_vm2, %v8472_v18, %v8491_v13  ;;  %v8497_v40 = vunpack.i.h.bf16 %v8495_v63  ;;  %v8496_v9 = vunpack.i.l.bf16 %v8495_v63  ;;  %7552 = vmatpush1.bf16.msra.mxu0 %v7551_v3  ;;  %v5719_v45 = vsel %vm5692_vm2, %v8491_v13, %v8492_v5  ;;  %v6266_v13 = vld [vmem:[%s11059_s3 + $0x118] sm:$0xff] }
 0x2f1   :  { %v7555_v14 = vpack.c.bf16 %v5718_v43, %v5711_v57  ;;  %v8500_v21 = vpop.permute.xlu1 %8499  ;;  %6857 = vmatmul.mubr.msk.f32.gmra.mrb[4].mxu1 %vm544_vm8, %v10585_v49  ;;  %v7553_v31 = vpack.c.bf16 %v5719_v45, %v5712_v19  ;;  %v7573_v3 = vpack.c.bf16 %v6236_v4, %v6235_v28  ;;  %v6253_v57 = vld [vmem:[%s11059_s3 + $0xb0] sm:$0xff]  ;;  %v6254_v19 = vld [vmem:[%s11059_s3 + $0xb8] sm:$0xff] }
 0x2f2   :  { %v5706_v48 = vsel %vm5692_vm2, %v8482_v22, %v8497_v40  ;;  %v5699_v20 = vsel %vm5692_vm2, %v8477_v56, %v8496_v9  ;;  %v8502_v30 = vunpack.i.h.bf16 %v8500_v21  ;;  %v8501_v50 = vunpack.i.l.bf16 %v8500_v21  ;;  %7243 = vmatprep.mubr.msk.f32.mxu1 %vm8541_vm10, %v8529_v2  ;;  %v6237_v43 = vld [vmem:[%s11059_s3 + $0x30] sm:$0xff]  ;;  %v6238_v40 = vld [vmem:[%s11059_s3 + $0x38] sm:$0xff]  ;;  %v6284_v21 = vld [vmem:[%s11059_s3 + $0x1a8] sm:$0xff] }
 0x2f3   :  { %v7558_v47 = vpack.c.bf16 %v5706_v48, %v5699_v20  ;;  %v5687_v18 = vpop.permute.xlu0 %5686  ;;  %7554 = vmatprep.subr.bf16.mxu0 %v7553_v31  ;;  %v7595_v56 = vpack.c.bf16 %v6280_v35, %v6279_v46  ;;  %v7575_v9 = vpack.c.bf16 %v6254_v19, %v6253_v57  ;;  %v7577_v45 = vpack.c.bf16 %v6238_v40, %v6237_v43  ;;  %v6267_v48 = vld [vmem:[%s11059_s3 + $0x120] sm:$0xff]  ;;  %v6268_v20 = vld [vmem:[%s11059_s3 + $0x128] sm:$0xff]  ;;  %v6262_v28 = vld [vmem:[%s11059_s3 + $0xf8] sm:$0xff] }
 0x2f4   :  { %v5713_v15 = vsel %vm5692_vm2, %v8487_v8, %v8501_v50  ;;  %v5720_v52 = vsel %vm5692_vm2, %v8492_v5, %v8502_v30  ;;  %7556 = vmatpush1.bf16.msra.mxu0 %v7555_v14  ;;  %v5725_v32 = vsel %vm5692_vm2, %v10561_v7, %v5687_v18  ;;  %v7565_v7 = vpack.c.bf16 %v6232_v38, %v6231_v26  ;;  %v6252_v8 = vld [vmem:[%s11059_s3 + $0xa8] sm:$0xff]  ;;  %v6265_v5 = vld [vmem:[%s11059_s3 + $0x110] sm:$0xff]  ;;  %v6283_v14 = vld [vmem:[%s11059_s3 + $0x1a0] sm:$0xff] }
 0x2f5   :  { %v5689_v60 = vpop.permute.xlu1 %5688  ;;  %7559 = vmatpush3.bf16.msra.mxu1 %v7558_v47  ;;  %v7561_v12 = vpack.c.bf16 %v5720_v52, %v5713_v15  ;;  %v7571_v24 = vpack.c.bf16 %v6252_v8, %v6251_v11  ;;  %v7601_v63 = vpack.c.bf16 %v6266_v13, %v6265_v5  ;;  %v7603_v31 = vpack.c.bf16 %v6284_v21, %v6283_v14  ;;  %v6255_v30 = vld [vmem:[%s11059_s3 + $0xc0] sm:$0xff]  ;;  %v6256_v47 = vld [vmem:[%s11059_s3 + $0xc8] sm:$0xff]  ;;  %v6241_v38 = vld [vmem:[%s11059_s3 + $0x50] sm:$0xff] }
 0x2f6   :  { %v5726_v54 = vsel %vm5692_vm2, %v5687_v18, %v5689_v60  ;;  %7560 = vmatprep.subr.bf16.mxu1 %v8540_v16  ;;  %v7605_v50 = vpack.c.bf16 %v6268_v20, %v6267_v48  ;;  %v6239_v18 = vld [vmem:[%s11059_s3 + $0x40] sm:$0xff]  ;;  %v6240_v15 = vld [vmem:[%s11059_s3 + $0x48] sm:$0xff]  ;;  %v7579_v52 = vpack.c.bf16 %v6256_v47, %v6255_v30  ;;  %v6274_v11 = vld [vmem:[%s11059_s3 + $0x158] sm:$0xff] }
 0x2f7   :  { %6858 = vmatprep.subr.msk.mxu0 %vm634_vm9, %v5726_v54  ;;  %v5691_v29 = vpop.permute.xlu0 %5690  ;;  %v6285_v54 = vld [vmem:[%s11059_s3 + $0x1b0] sm:$0xff]  ;;  %v6259_v35 = vld [vmem:[%s11059_s3 + $0xe0] sm:$0xff]  ;;  %v6276_v57 = vld [vmem:[%s11059_s3 + $0x168] sm:$0xff] }
 0x2f8   :  { %6859 = vmatpush1.msk.msra.mxu0 %vm634_vm9, %v5725_v32  ;;  %v5727_v51 = vsel %vm5692_vm2, %v5689_v60, %v5691_v29  ;;  %v7581_v60 = vpack.c.bf16 %v6240_v15, %v6239_v18  ;;  %v6269_v32 = vld [vmem:[%s11059_s3 + $0x130] sm:$0xff]  ;;  %v6275_v13 = vld [vmem:[%s11059_s3 + $0x160] sm:$0xff]  ;;  %v6312_v43 = vld [vmem:[%s11059_s3 + $0x288] sm:$0xff] }
 0x2f9   :  { %6860 = vmatmul.mubr.msk.f32.vlgmr.msra.gmra.mrb[6].mxu0 %vm544_vm8, %v10552_v17  ;;  %7562 = vmatpush3.bf16.msra.mxu1 %v7561_v12  ;;  %v6286_v12 = vld [vmem:[%s11059_s3 + $0x1b8] sm:$0xff]  ;;  %v6261_v8 = vld [vmem:[%s11059_s3 + $0xf0] sm:$0xff]  ;;  %v6311_v19 = vld [vmem:[%s11059_s3 + $0x280] sm:$0xff] }
 0x2fa   :  { %6015 = vmatprep.mubr.f32.mxu0 %v8529_v2  ;;  %7241 = vmatprep.subr.mxu1 %v8529_v2  ;;  %v7607_v29 = vpack.c.bf16 %v6286_v12, %v6285_v54  ;;  %v6245_v4 = vld [vmem:[%s11059_s3 + $0x70] sm:$0xff] }
 0x2fb   :  { %7564 = vmatprep.subr.bf16.mxu0 %v7563_v59  ;;  %v7583_v59 = vpack.c.bf16 %v6258_v61, %v6257_v37  ;;  %v6293_v40 = vld [vmem:[%s11059_s3 + $0x1f0] sm:$0xff] }
 0x2fc   :  { %7566 = vmatpush3.bf16.msra.mxu0 %v7565_v7  ;;  %v6277_v21 = vld [vmem:[%s11059_s3 + $0x170] sm:$0xff] }
 0x2fd   :  { %6861 = vmatmul.mubr.msk.f32.gmra.mrb[8].mxu0 %vm544_vm8, %v10567_v42  ;;  %7242 = vmatpush3.msk.msra.mxu1 %vm634_vm9, %v5727_v51  ;;  %v6270_v51 = vld [vmem:[%s11059_s3 + $0x138] sm:$0xff] }
 0x2fe   :  { %7244 = vmatmul.mubr.msk.f32.vlgmr.msra.gmra.mrb[54].mxu1 %vm544_vm8, %v10552_v17  ;;  %6021 = vmatprep.mubr.f32.mxu0 %v8529_v2  ;;  %v7567_v17 = vpack.c.bf16 %v6250_v25, %v6249_v41  ;;  %v7609_v26 = vpack.c.bf16 %v6270_v51, %v6269_v32  ;;  %v6242_v41 = vld [vmem:[%s11059_s3 + $0x58] sm:$0xff]  ;;  %v6287_v25 = vld [vmem:[%s11059_s3 + $0x1c0] sm:$0xff] }
 0x2ff   :  { %7246 = vmatprep.mubr.msk.f32.mxu1 %vm8541_vm10, %v8529_v2  ;;  %7596 = vmatprep.subr.bf16.mxu1 %v7595_v56  ;;  %v7585_v7 = vpack.c.bf16 %v6242_v41, %v6241_v38  ;;  %v6260_v56 = vld [vmem:[%s11059_s3 + $0xe8] sm:$0xff] }
 0x300   :  { %7568 = vmatprep.subr.bf16.mxu0 %v7567_v17  ;;  %v6288_v17 = vld [vmem:[%s11059_s3 + $0x1c8] sm:$0xff] }
 0x301   :  { %6862 = vmatmul.mubr.msk.f32.gmra.mrb[10].mxu0 %vm544_vm8, %v10585_v49  ;;  %v7611_v46 = vpack.c.bf16 %v6288_v17, %v6287_v25 }
 0x302   :  { %7247 = vmatmul.mubr.msk.f32.gmra.mrb[56].mxu1 %vm544_vm8, %v10567_v42  ;;  %7570 = vmatpush3.bf16.msra.mxu0 %v7569_v33  ;;  %v6243_v33 = vld [vmem:[%s11059_s3 + $0x60] sm:$0xff] }
 0x303   :  { %7249 = vmatprep.mubr.msk.f32.mxu1 %vm8541_vm10, %v8529_v2  ;;  %7572 = vmatprep.subr.bf16.mxu0 %v7571_v24  ;;  %v7591_v24 = vpack.c.bf16 %v6262_v28, %v6261_v8 }
 0x306   :  { %7250 = vmatmul.mubr.msk.f32.gmra.mrb[58].mxu1 %vm544_vm8, %v10585_v49  ;;  %v6263_v49 = vld [vmem:[%s11059_s3 + $0x100] sm:$0xff]  ;;  %7574 = vmatpush3.bf16.msra.mxu0 %v7573_v3  ;;  %v6246_v3 = vld [vmem:[%s11059_s3 + $0x78] sm:$0xff] }
 0x307   :  { %7576 = vmatprep.subr.bf16.mxu0 %v7575_v9  ;;  %v7627_v9 = vpack.c.bf16 %v6312_v43, %v6311_v19  ;;  %v6316_v19 = vld [vmem:[%s11059_s3 + $0x2a8] sm:$0xff] }
 0x30a   :  { %7578 = vmatpush3.bf16.msra.mxu0 %v7577_v45  ;;  %v6294_v45 = vld [vmem:[%s11059_s3 + $0x1f8] sm:$0xff] }
 0x30b   :  { %7580 = vmatprep.subr.bf16.mxu0 %v7579_v52  ;;  %v7623_v14 = vpack.c.bf16 %v6294_v45, %v6293_v40 }
 0x30e   :  { %7582 = vmatpush3.bf16.msra.mxu0 %v7581_v60 }
 0x30f   :  { %7584 = vmatprep.subr.bf16.mxu0 %v7583_v59 }
 0x312   :  { %v3522_v0 = vpop.f32.mrb[30].mxu1  ;;  %7586 = vmatpush3.bf16.msra.mxu0 %v7585_v7 }
 0x313   :  { %v10680_v34 = vadd.f32 %v3522_v0, %v10559_v6  ;;  %v7169_v22 = vpop.f32.mrb[31].mxu1  ;;  %v6264_v6 = vld [vmem:[%s11059_s3 + $0x108] sm:$0xff]  ;;  %v7613_v0 = vpack.c.bf16 %v6272_v36, %v6271_v53 }
 0x314   :  { %v7587_v22 = vpack.c.bf16 %v6260_v56, %v6259_v35 }
 0x316   :  { %v3527_v44 = vpop.f32.mrb[32].mxu1  ;;  %7588 = vmatprep.subr.bf16.mxu0 %v7587_v22  ;;  %v6296_v22 = vld [vmem:[%s11059_s3 + $0x208] sm:$0xff] }
 0x317   :  { %v10683_v1 = vadd.f32 %v3527_v44, %v10577_v62  ;;  %v7172_v42 = vpop.f32.mrb[33].mxu1  ;;  %v7597_v62 = vpack.c.bf16 %v6264_v6, %v6263_v49  ;;  %v6244_v44 = vld [vmem:[%s11059_s3 + $0x68] sm:$0xff]  ;;  %v6273_v6 = vld [vmem:[%s11059_s3 + $0x150] sm:$0xff] }
 0x318   :  { %v6289_v42 = vld [vmem:[%s11059_s3 + $0x1d0] sm:$0xff]  ;;  %v7589_v49 = vpack.c.bf16 %v6244_v44, %v6243_v33 }
 0x319   :  { %7598 = vmatpush3.bf16.msra.mxu1 %v7597_v62  ;;  %v7617_v62 = vpack.c.bf16 %v6274_v11, %v6273_v6 }
 0x31a   :  { %v3532_v23 = vpop.f32.mrb[34].mxu1  ;;  %7590 = vmatpush3.bf16.msra.mxu0 %v7589_v49 }
 0x31b   :  { %v10686_v10 = vadd.f32 %v3532_v23, %v10603_v55  ;;  %v7175_v39 = vpop.f32.mrb[35].mxu1  ;;  %v7599_v55 = vpack.c.bf16 %v6282_v27, %v6281_v58  ;;  %v6290_v23 = vld [vmem:[%s11059_s3 + $0x1d8] sm:$0xff]  ;;  %v6291_v58 = vld [vmem:[%s11059_s3 + $0x1e0] sm:$0xff]  ;;  %v6292_v27 = vld [vmem:[%s11059_s3 + $0x1e8] sm:$0xff]  ;;  %7592 = vmatprep.subr.bf16.mxu0 %v7591_v24 }
 0x31c   :  { %v7615_v39 = vpack.c.bf16 %v6290_v23, %v6289_v42  ;;  %v7619_v5 = vpack.c.bf16 %v6292_v27, %v6291_v58  ;;  %v10876_v42 = vpop.permute.xlu0 %6181  ;;  %v6313_v23 = vld [vmem:[%s11059_s3 + $0x290] sm:$0xff]  ;;  %v6298_v58 = vld [vmem:[%s11059_s3 + $0x218] sm:$0xff]  ;;  %v6327_v27 = vld [vmem:[%s11059_s3 + $0x300] sm:$0xff] }
 0x31d   :  { %7600 = vmatprep.subr.bf16.mxu1 %v7599_v55  ;;  %v7593_v55 = vpack.c.bf16 %v6246_v3, %v6245_v4 }
 0x31e   :  { %7602 = vmatpush3.bf16.msra.mxu1 %v7601_v63  ;;  %v7621_v63 = vpack.c.bf16 %v6276_v57, %v6275_v13 }
 0x31f   :  { %7604 = vmatprep.subr.bf16.mxu1 %v7603_v31  ;;  %7594 = vmatpush3.bf16.msra.mxu0 %v7593_v55  ;;  %v6278_v31 = vld [vmem:[%s11059_s3 + $0x178] sm:$0xff]  ;;  %v6328_v55 = vld [vmem:[%s11059_s3 + $0x308] sm:$0xff] }
 0x320   :  { %7628 = vmatprep.subr.bf16.mxu0 %v7627_v9  ;;  %v7625_v20 = vpack.c.bf16 %v6278_v31, %v6277_v21  ;;  %v7660_v21 = vpack.c.bf16 %v6328_v55, %v6327_v27  ;;  %v6299_v31 = vld [vmem:[%s11059_s3 + $0x220] sm:$0xff]  ;;  %v6322_v27 = vld [vmem:[%s11059_s3 + $0x2d8] sm:$0xff] }
 0x322   :  { %7606 = vmatpush3.bf16.msra.mxu1 %v7605_v50 }
 0x323   :  { %7608 = vmatprep.subr.bf16.mxu1 %v7607_v29 }
 0x326   :  { %7610 = vmatpush3.bf16.msra.mxu1 %v7609_v26 }
 0x327   :  { %7612 = vmatprep.subr.bf16.mxu1 %v7611_v46  ;;  %v10866_v46 = vpop.permute.xlu1 %6176 }
 0x32a   :  { %7614 = vmatpush3.bf16.msra.mxu1 %v7613_v0  ;;  %v6295_v0 = vld [vmem:[%s11059_s3 + $0x200] sm:$0xff] }
 0x32b   :  { %7616 = vmatprep.subr.bf16.mxu1 %v7615_v39  ;;  %v6314_v39 = vld [vmem:[%s11059_s3 + $0x298] sm:$0xff]  ;;  %v7629_v11 = vpack.c.bf16 %v6296_v22, %v6295_v0  ;;  %v10906_v40 = vpop.permute.xlu1 %6186  ;;  %v6332_v22 = vld [vmem:[%s11059_s3 + $0x328] sm:$0xff] }
 0x32c   :  { %v7631_v3 = vpack.c.bf16 %v6314_v39, %v6313_v23  ;;  %v6320_v23 = vld [vmem:[%s11059_s3 + $0x2c8] sm:$0xff] }
 0x32e   :  { %7618 = vmatpush3.bf16.msra.mxu1 %v7617_v62  ;;  %v6297_v62 = vld [vmem:[%s11059_s3 + $0x210] sm:$0xff] }
 0x32f   :  { %7620 = vmatprep.subr.bf16.mxu1 %v7619_v5 }
 0x332   :  { %7622 = vmatpush3.bf16.msra.mxu1 %v7621_v63  ;;  %v6315_v63 = vld [vmem:[%s11059_s3 + $0x2a0] sm:$0xff] }
 0x333   :  { %7624 = vmatprep.subr.bf16.mxu1 %v7623_v14  ;;  %v7633_v14 = vpack.c.bf16 %v6298_v58, %v6297_v62  ;;  %v6321_v58 = vld [vmem:[%s11059_s3 + $0x2d0] sm:$0xff] }
 0x336   :  { %7626 = vmatpush3.bf16.msra.mxu1 %v7625_v20 }
 0x337   :  { %7659 = vmatprep.subr.bf16.mxu1 %v8540_v16 }
 0x342   :  { %v4165_v48 = vpop.f32.mrb[36].mxu1 }
 0x343   :  { %v4185_v30 = vadd.f32 %v4165_v48, %v10680_v34  ;;  %v7188_v50 = vpop.f32.mrb[37].mxu1 }
 0x346   :  { %v4170_v47 = vpop.f32.mrb[38].mxu1 }
 0x347   :  { %v4192_v18 = vadd.f32 %v4170_v47, %v10683_v1  ;;  %v7191_v15 = vpop.f32.mrb[39].mxu1 }
 0x348   :  { %v6300_v15 = vld [vmem:[%s11059_s3 + $0x228] sm:$0xff] }
 0x34a   :  { %v4175_v52 = vpop.f32.mrb[40].mxu1 }
 0x34b   :  { %v4199_v60 = vadd.f32 %v4175_v52, %v10686_v10  ;;  %v7194_v54 = vpop.f32.mrb[41].mxu1  ;;  %v6329_v52 = vld [vmem:[%s11059_s3 + $0x310] sm:$0xff] }
 0x373   :  { %v4808_v12 = vpop.f32.mrb[42].mxu1 }
 0x374   :  { %v4828_v32 = vadd.f32 %v4808_v12, %v4185_v30  ;;  %v7207_v29 = vpop.f32.mrb[43].mxu1 }
 0x375   :  { %v6330_v29 = vld [vmem:[%s11059_s3 + $0x318] sm:$0xff] }
 0x377   :  { %v4813_v51 = vpop.f32.mrb[44].mxu1 }
 0x378   :  { %v4835_v37 = vadd.f32 %v4813_v51, %v4192_v18  ;;  %v7210_v61 = vpop.f32.mrb[45].mxu1  ;;  %v7635_v18 = vpack.c.bf16 %v6316_v19, %v6315_v63  ;;  %v6317_v51 = vld [vmem:[%s11059_s3 + $0x2b0] sm:$0xff]  ;;  %v6306_v19 = vld [vmem:[%s11059_s3 + $0x258] sm:$0xff] }
 0x379   :  { %v6305_v63 = vld [vmem:[%s11059_s3 + $0x250] sm:$0xff] }
 0x37b   :  { %v4818_v34 = vpop.f32.mrb[46].mxu1 }
 0x37c   :  { %v4842_v26 = vadd.f32 %v4818_v34, %v4199_v60  ;;  %v7213_v59 = vpop.f32.mrb[47].mxu1 }
 0x3a3   :  { %v5451_v38 = vpop.f32.mrb[48].mxu1 }
 0x3a4   :  { %v10860_v41 = vadd.f32 %v5451_v38, %v4828_v32  ;;  %v7226_v25 = vpop.f32.mrb[49].mxu1 }
 0x3a7   :  { %v5456_v7 = vpop.f32.mrb[50].mxu1 }
 0x3a8   :  { %v10862_v1 = vadd.f32 %v5456_v7, %v4835_v37  ;;  %v7229_v17 = vpop.f32.mrb[51].mxu1  ;;  %v6318_v37 = vld [vmem:[%s11059_s3 + $0x2b8] sm:$0xff]  ;;  %v7663_v7 = vpack.c.bf16 %v6330_v29, %v6329_v52  ;;  %v6337_v52 = vld [vmem:[%s11059_s3 + $0x350] sm:$0xff] }
 0x3a9   :  { %v7639_v17 = vpack.c.bf16 %v6318_v37, %v6317_v51  ;;  %v6326_v29 = vld [vmem:[%s11059_s3 + $0x2f8] sm:$0xff] }
 0x3ab   :  { %v5461_v53 = vpop.f32.mrb[52].mxu1 }
 0x3ac   :  { %v10864_v10 = vadd.f32 %v5461_v53, %v4842_v26  ;;  %v7232_v36 = vpop.f32.mrb[53].mxu1  ;;  %v7637_v26 = vpack.c.bf16 %v6300_v15, %v6299_v31  ;;  %v6301_v53 = vld [vmem:[%s11059_s3 + $0x230] sm:$0xff]  ;;  %v6308_v15 = vld [vmem:[%s11059_s3 + $0x268] sm:$0xff] }
 0x3ad   :  { %v6302_v36 = vld [vmem:[%s11059_s3 + $0x238] sm:$0xff] }
 0x3b7   :  { %v5845_v35 = vpop.f32.mrb[0].mxu0 }
 0x3b8   :  { %v6189_v56 = vadd.f32 %v10866_v46, %v5845_v35  ;;  %v5847_v33 = vpop.f32.mrb[1].mxu0  ;;  %v6331_v35 = vld [vmem:[%s11059_s3 + $0x320] sm:$0xff] }
 0x3b9   :  { %v6190_v44 = vadd.f32 %v10866_v46, %v5847_v33 }
 0x3ba   :  { %v6210_v8 = vmax.f32 %v6189_v56, 0.0 }
 0x3bb   :  { %v6211_v49 = vmax.f32 %v6190_v44, 0.0  ;;  %v5851_v6 = vpop.f32.mrb[2].mxu0  ;;  %v6319_v44 = vld [vmem:[%s11059_s3 + $0x2c0] sm:$0xff] }
 0x3bc   :  { %v6196_v28 = vadd.f32 %v10876_v42, %v5851_v6  ;;  %v5853_v4 = vpop.f32.mrb[3].mxu0  ;;  %v5928_v24 = vpop.f32.mrb[0].mxu1  ;;  %v7643_v62 = vpack.c.bf16 %v6320_v23, %v6319_v44  ;;  %v6341_v23 = vld [vmem:[%s11059_s3 + $0x370] sm:$0xff] }
 0x3bd   :  { %v6197_v5 = vadd.f32 %v10876_v42, %v5853_v4  ;;  %v6191_v13 = vadd.f32 %v10866_v46, %v5928_v24  ;;  %v5930_v57 = vpop.f32.mrb[1].mxu1  ;;  %6407 = vmatprep.mubr.f32.mxu0 %v6211_v49  ;;  %v7641_v49 = vpack.c.bf16 %v6302_v36, %v6301_v53  ;;  %v6333_v4 = vld [vmem:[%s11059_s3 + $0x330] sm:$0xff]  ;;  %v6340_v53 = vld [vmem:[%s11059_s3 + $0x368] sm:$0xff] }
 0x3be   :  { %v6192_v43 = vadd.f32 %v10866_v46, %v5930_v57  ;;  %6408 = vmatmul.mubr.f32.vlgmr.msra.gmra.mrb[12].mxu0 %v6210_v8  ;;  %v6217_v48 = vmax.f32 %v6196_v28, 0.0  ;;  %v6303_v8 = vld [vmem:[%s11059_s3 + $0x240] sm:$0xff]  ;;  %v6304_v28 = vld [vmem:[%s11059_s3 + $0x248] sm:$0xff]  ;;  %v7647_v57 = vpack.c.bf16 %v6322_v27, %v6321_v58 }
 0x3bf   :  { %v6218_v9 = vmax.f32 %v6197_v5, 0.0  ;;  %7630 = vmatpush3.bf16.msra.mxu0 %v7629_v11  ;;  %v5857_v45 = vpop.f32.mrb[4].mxu0  ;;  %v6212_v60 = vmax.f32 %v6191_v13, 0.0  ;;  %v7666_v11 = vpack.c.bf16 %v6332_v22, %v6331_v35  ;;  %v7645_v55 = vpack.c.bf16 %v6304_v28, %v6303_v8 }
 0x3c0   :  { %v6213_v20 = vmax.f32 %v6192_v43, 0.0  ;;  %v6203_v30 = vadd.f32 %v10906_v40, %v5857_v45  ;;  %v5859_v50 = vpop.f32.mrb[5].mxu0  ;;  %v5934_v47 = vpop.f32.mrb[2].mxu1  ;;  %7632 = vmatprep.subr.bf16.mxu0 %v7631_v3  ;;  %v6334_v3 = vld [vmem:[%s11059_s3 + $0x338] sm:$0xff]  ;;  %v6335_v43 = vld [vmem:[%s11059_s3 + $0x340] sm:$0xff]  ;;  %v6336_v45 = vld [vmem:[%s11059_s3 + $0x348] sm:$0xff] }
 0x3c1   :  { %v6204_v54 = vadd.f32 %v10906_v40, %v5859_v50  ;;  %v6198_v12 = vadd.f32 %v10876_v42, %v5934_v47  ;;  %v5936_v32 = vpop.f32.mrb[3].mxu1  ;;  %6412 = vmatprep.mubr.f32.mxu0 %v6218_v9  ;;  %v7669_v13 = vpack.c.bf16 %v6334_v3, %v6333_v4  ;;  %v7672_v50 = vpack.c.bf16 %v6336_v45, %v6335_v43 }
 0x3c2   :  { %v6199_v61 = vadd.f32 %v10876_v42, %v5936_v32  ;;  %6413 = vmatmul.mubr.f32.gmra.mrb[14].mxu0 %v6217_v48  ;;  %6487 = vmatprep.mubr.f32.mxu1 %v6213_v20  ;;  %v6224_v59 = vmax.f32 %v6203_v30, 0.0  ;;  %v7649_v48 = vpack.c.bf16 %v6306_v19, %v6305_v63  ;;  %v6325_v32 = vld [vmem:[%s11059_s3 + $0x2f0] sm:$0xff] }
 0x3c3   :  { %v6225_v34 = vmax.f32 %v6204_v54, 0.0  ;;  %7634 = vmatpush3.bf16.msra.mxu0 %v7633_v14  ;;  %6488 = vmatmul.mubr.f32.vlgmr.msra.gmra.mrb[60].mxu1 %v6212_v60  ;;  %v6219_v56 = vmax.f32 %v6198_v12, 0.0  ;;  %v6323_v14 = vld [vmem:[%s11059_s3 + $0x2e0] sm:$0xff]  ;;  %v6338_v12 = vld [vmem:[%s11059_s3 + $0x358] sm:$0xff] }
 0x3c4   :  { %v6220_v38 = vmax.f32 %v6199_v61, 0.0  ;;  %7661 = vmatpush3.bf16.msra.mxu1 %v7660_v21  ;;  %v5940_v25 = vpop.f32.mrb[4].mxu1  ;;  %7636 = vmatprep.subr.bf16.mxu0 %v7635_v18  ;;  %v6324_v21 = vld [vmem:[%s11059_s3 + $0x2e8] sm:$0xff]  ;;  %v6307_v18 = vld [vmem:[%s11059_s3 + $0x260] sm:$0xff] }
 0x3c5   :  { %v6205_v33 = vadd.f32 %v10906_v40, %v5940_v25  ;;  %v5942_v0 = vpop.f32.mrb[5].mxu1  ;;  %6417 = vmatprep.mubr.f32.mxu0 %v6225_v34  ;;  %7662 = vmatprep.subr.bf16.mxu1 %v8540_v16  ;;  %v7651_v47 = vpack.c.bf16 %v6324_v21, %v6323_v14  ;;  %v7653_v61 = vpack.c.bf16 %v6308_v15, %v6307_v18  ;;  %v6310_v25 = vld [vmem:[%s11059_s3 + $0x278] sm:$0xff] }
 0x3c6   :  { %v6206_v39 = vadd.f32 %v10906_v40, %v5942_v0  ;;  %6418 = vmatmul.mubr.f32.gmra.mrb[16].mxu0 %v6224_v59  ;;  %6492 = vmatprep.mubr.f32.mxu1 %v6220_v38  ;;  %v7655_v59 = vpack.c.bf16 %v6326_v29, %v6325_v32  ;;  %v6309_v38 = vld [vmem:[%s11059_s3 + $0x270] sm:$0xff] }
 0x3c7   :  { %7638 = vmatpush3.bf16.msra.mxu0 %v7637_v26  ;;  %6493 = vmatmul.mubr.f32.gmra.mrb[62].mxu1 %v6219_v56  ;;  %v6226_v24 = vmax.f32 %v6205_v33, 0.0  ;;  %v7675_v26 = vpack.c.bf16 %v6338_v12, %v6337_v52  ;;  %v7657_v56 = vpack.c.bf16 %v6310_v25, %v6309_v38 }
 0x3c8   :  { %v6227_v6 = vmax.f32 %v6206_v39, 0.0  ;;  %7664 = vmatpush3.bf16.msra.mxu1 %v7663_v7  ;;  %7640 = vmatprep.subr.bf16.mxu0 %v7639_v17 }
 0x3c9   :  { %7665 = vmatprep.subr.bf16.mxu1 %v8540_v16 }
 0x3ca   :  { %6497 = vmatprep.mubr.f32.mxu1 %v6227_v6 }
 0x3cb   :  { %7642 = vmatpush3.bf16.msra.mxu0 %v7641_v49  ;;  %6498 = vmatmul.mubr.f32.gmra.mrb[64].mxu1 %v6226_v24 }
 0x3cc   :  { %7667 = vmatpush3.bf16.msra.mxu1 %v7666_v11  ;;  %v6011_v5 = vpop.f32.mrb[6].mxu0  ;;  %7644 = vmatprep.subr.bf16.mxu0 %v7643_v62 }
 0x3cd   :  { %v6013_v9 = vpop.f32.mrb[7].mxu0  ;;  %7668 = vmatprep.subr.bf16.mxu1 %v8540_v16  ;;  %7284 = vmatprep.mubr.msk.f32.mxu1 %vm8541_vm10, %v8529_v2  ;;  %v6193_v33 = vadd.f32 %v10866_v46, %v6011_v5 }
 0x3ce   :  { %v6194_v31 = vadd.f32 %v10866_v46, %v6013_v9 }
 0x3cf   :  { %7646 = vmatpush3.bf16.msra.mxu0 %v7645_v55  ;;  %v6214_v6 = vmax.f32 %v6193_v33, 0.0 }
 0x3d0   :  { %v6215_v20 = vmax.f32 %v6194_v31, 0.0  ;;  %7670 = vmatpush3.bf16.msra.mxu1 %v7669_v13  ;;  %v6017_v30 = vpop.f32.mrb[8].mxu0  ;;  %7648 = vmatprep.subr.bf16.mxu0 %v7647_v57 }
 0x3d1   :  { %v6019_v60 = vpop.f32.mrb[9].mxu0  ;;  %v6094_v54 = vpop.f32.mrb[54].mxu1  ;;  %7671 = vmatprep.subr.bf16.mxu1 %v8540_v16  ;;  %v6200_v11 = vadd.f32 %v10876_v42, %v6017_v30 }
 0x3d2   :  { %v6114_v51 = vadd.f32 %v6094_v54, %v10860_v41  ;;  %6567 = vmatprep.mubr.f32.mxu0 %v6215_v20  ;;  %v7245_v37 = vpop.f32.mrb[55].mxu1  ;;  %v6339_v41 = vld [vmem:[%s11059_s3 + $0x360] sm:$0xff]  ;;  %v6201_v22 = vadd.f32 %v10876_v42, %v6019_v60 }
 0x3d3   :  { %7650 = vmatpush3.bf16.msra.mxu0 %v7649_v48  ;;  %v7678_v0 = vpack.c.bf16 %v6340_v53, %v6339_v41  ;;  %v6221_v24 = vmax.f32 %v6200_v11, 0.0 }
 0x3d4   :  { %7673 = vmatpush3.bf16.msra.mxu1 %v7672_v50  ;;  %v6023_v34 = vpop.f32.mrb[10].mxu0  ;;  %7652 = vmatprep.subr.bf16.mxu0 %v7651_v47  ;;  %v6222_v8 = vmax.f32 %v6201_v22, 0.0  ;;  %v6195_v28 = vadd.f32 %v10866_v46, %v6114_v51 }
 0x3d5   :  { %v6025_v7 = vpop.f32.mrb[11].mxu0  ;;  %v6099_v17 = vpop.f32.mrb[56].mxu1  ;;  %7674 = vmatprep.subr.bf16.mxu1 %v8540_v16  ;;  %v6207_v3 = vadd.f32 %v10906_v40, %v6023_v34 }
 0x3d6   :  { %v6121_v36 = vadd.f32 %v6099_v17, %v10862_v1  ;;  %v7248_v35 = vpop.f32.mrb[57].mxu1  ;;  %v6342_v1 = vld [vmem:[%s11059_s3 + $0x378] sm:$0xff]  ;;  %v6208_v4 = vadd.f32 %v10906_v40, %v6025_v7 }
 0x3d7   :  { %7654 = vmatpush3.bf16.msra.mxu0 %v7653_v61  ;;  %v7681_v62 = vpack.c.bf16 %v6342_v1, %v6341_v23  ;;  %v6228_v55 = vmax.f32 %v6207_v3, 0.0 }
 0x3d8   :  { %7676 = vmatpush3.bf16.msra.mxu1 %v7675_v26  ;;  %7656 = vmatprep.subr.bf16.mxu0 %v7655_v59  ;;  %v6229_v58 = vmax.f32 %v6208_v4, 0.0  ;;  %v6202_v27 = vadd.f32 %v10876_v42, %v6121_v36 }
 0x3d9   :  { %v6104_v44 = vpop.f32.mrb[58].mxu1  ;;  %7677 = vmatprep.subr.bf16.mxu1 %v8540_v16 }
 0x3da   :  { %v6128_v39 = vadd.f32 %v6104_v44, %v10864_v10  ;;  %v7251_v49 = vpop.f32.mrb[59].mxu1  ;;  %v6216_v10 = vmax.f32 %v6195_v28, 0.0  ;;  %v6223_v46 = vmax.f32 %v6202_v27, 0.0 }
 0x3db   :  { %7658 = vmatpush3.bf16.msra.mxu0 %v7657_v56 }
 0x3dc   :  { %7679 = vmatpush3.bf16.msra.mxu1 %v7678_v0 }
 0x3dd   :  { %7680 = vmatprep.subr.bf16.mxu1 %v8540_v16  ;;  %v6209_v16 = vadd.f32 %v10906_v40, %v6128_v39 }
 0x3de   :  { %6568 = vmatmul.mubr.f32.vlgmr.msra.gmra.mrb[18].mxu0 %v6214_v6 }
 0x3df   :  { %6572 = vmatprep.mubr.f32.mxu0 %v6222_v8  ;;  %v6230_v5 = vmax.f32 %v6209_v16, 0.0 }
 0x3e0   :  { %7682 = vmatpush3.bf16.msra.mxu1 %v7681_v62 }
 0x3e2   :  { %6573 = vmatmul.mubr.f32.gmra.mrb[20].mxu0 %v6221_v24 }
 0x3e3   :  { %6577 = vmatprep.mubr.f32.mxu0 %v6229_v58  ;;  %7285 = vmatmul.mubr.f32.vlgmr.msra.gmra.mrb[66].mxu1 %v6216_v10 }
 0x3e4   :  { %7287 = vmatprep.mubr.msk.f32.mxu1 %vm8541_vm10, %v8529_v2 }
 0x3e6   :  { %6578 = vmatmul.mubr.f32.gmra.mrb[22].mxu0 %v6228_v55 }
 0x3e7   :  { %7288 = vmatmul.mubr.f32.gmra.mrb[68].mxu1 %v6223_v46 }
 0x3e8   :  { %7290 = vmatprep.mubr.msk.f32.mxu1 %vm8541_vm10, %v8529_v2 }
 0x3eb   :  { %7291 = vmatmul.mubr.f32.gmra.mrb[70].mxu1 %v6230_v5 }
 0x491   :  { %v6971_v13 = vpop.f32.mrb[12].mxu0 }
 0x492   :  { %v6972_v57 = vpop.f32.mrb[13].mxu0 }
 0x493   :  { %v6973_v42 = vadd.f32 %v6972_v57, %v6971_v13 }
 0x495   :  { %v6974_v63 = vpop.f32.mrb[14].mxu0 }
 0x496   :  { %v6975_v19 = vpop.f32.mrb[15].mxu0  ;;  %v7012_v43 = vpop.f32.mrb[60].mxu1 }
 0x497   :  { %v6976_v9 = vadd.f32 %v6975_v19, %v6974_v63  ;;  %v7013_v45 = vpop.f32.mrb[61].mxu1 }
 0x498   :  { %v7014_v14 = vadd.f32 %v7013_v45, %v7012_v43 }
 0x499   :  { %v6977_v21 = vpop.f32.mrb[16].mxu0 }
 0x49a   :  { %v6490_v31 = vadd.f32 %v7014_v14, %v6973_v42  ;;  %v6978_v48 = vpop.f32.mrb[17].mxu0  ;;  %v7015_v40 = vpop.f32.mrb[62].mxu1 }
 0x49b   :  { %v6979_v20 = vadd.f32 %v6978_v48, %v6977_v21  ;;  %v7016_v30 = vpop.f32.mrb[63].mxu1 }
 0x49c   :  { %v7017_v50 = vadd.f32 %v7016_v30, %v7015_v40 }
 0x49e   :  { %v6495_v47 = vadd.f32 %v7017_v50, %v6976_v9  ;;  %v7018_v2 = vpop.f32.mrb[64].mxu1 }
 0x49f   :  { %v7019_v18 = vpop.f32.mrb[65].mxu1 }
 0x4a0   :  { %v7020_v15 = vadd.f32 %v7019_v18, %v7018_v2 }
 0x4a2   :  { %v6500_v52 = vadd.f32 %v7020_v15, %v6979_v20 }
 0x4b1   :  { %v7053_v60 = vpop.f32.mrb[18].mxu0 }
 0x4b2   :  { %v7054_v54 = vpop.f32.mrb[19].mxu0 }
 0x4b3   :  { %v7055_v12 = vadd.f32 %v7054_v54, %v7053_v60 }
 0x4b5   :  { %v7056_v32 = vpop.f32.mrb[20].mxu0  ;;  %v6570_v29 = vadd.f32 %v7055_v12, %v6490_v31 }
 0x4b6   :  { %v7057_v51 = vpop.f32.mrb[21].mxu0  ;;  %v6649_v37 = vpop.f32.mrb[66].mxu1 }
 0x4b7   :  { %v7058_v61 = vadd.f32 %v7057_v51, %v7056_v32  ;;  %v6650_v34 = vadd.f32 %v6649_v37, %v6570_v29  ;;  %v7286_v26 = vpop.f32.mrb[67].mxu1 }
 0x4b9   :  { %6663 = vst [vmem:[%s11060_s4] sm:$0xff] %v6650_v34  ;;  %v7059_v59 = vpop.f32.mrb[22].mxu0  ;;  %v6575_v38 = vadd.f32 %v7058_v61, %v6495_v47 }
 0x4ba   :  { %v7060_v25 = vpop.f32.mrb[23].mxu0  ;;  %v6654_v7 = vpop.f32.mrb[68].mxu1 }
 0x4bb   :  { %v7061_v17 = vadd.f32 %v7060_v25, %v7059_v59  ;;  %v6655_v41 = vadd.f32 %v6654_v7, %v6575_v38  ;;  %v7289_v53 = vpop.f32.mrb[69].mxu1 }
 0x4bd   :  { %6664 = vst [vmem:[%s11060_s4 + $0x8] sm:$0xff] %v6655_v41  ;;  %v6580_v36 = vadd.f32 %v7061_v17, %v6500_v52 }
 0x4be   :  { %v6659_v35 = vpop.f32.mrb[70].mxu1 }
 0x4bf   :  { %v6660_v56 = vadd.f32 %v6659_v35, %v6580_v36  ;;  %v7292_v33 = vpop.f32.mrb[71].mxu1 }
 0x4c1   :  { %6665 = vst [vmem:[%s11060_s4 + $0x10] sm:$0xff] %v6660_v56 }

</bundles_post_ra>
